<compile_context>
chip_gen: v5e
topology: v5e:2x2
jax: 0.10.0
libtpu: 0.0.40
codegen_flags: <defaults>
</compile_context>

<pallas_src>
import jax
import jax.numpy as jnp
from jax.experimental import pallas as pl
from jax.experimental.pallas import tpu as pltpu

# ---- model hyper-parameters (small, consistent with the module) ------------
N       = 16    # nodes per graph
NFEAT   = 32    # input feature dim
NHID    = 16    # hidden dim per head
NCLASS  = 8     # output classes
NHEADS  = 2     # attention heads
ALPHA   = 0.2   # LeakyReLU negative slope
DROPOUT = 0.6   # TODO(synk): dropout is a no-op in eval mode (inference only)

GB  = 8         # graphs per grid step; GB*N = 128 stacked rows
GBN = GB * N


def _elu(x):
    # Clamp the discarded branch so exp() never overflows / wastes EUP work.
    return jnp.where(x > 0, x, jnp.exp(jnp.minimum(x, 0.0)) - 1.0)


def _masked_softmax(scores, mask, *, approx):
    """LeakyReLU -> adjacency mask -> row softmax along the last axis."""
    e = jnp.where(scores > 0, scores, ALPHA * scores)
    e = jnp.where(mask, e, jnp.float32(-9e15))
    e = e - jnp.max(e, axis=-1, keepdims=True)
    p = jnp.exp(e)                                   # masked entries -> exactly 0
    s = jnp.sum(p, axis=-1, keepdims=True)
    if approx:
        return p * pl.reciprocal(s, approx=True)     # EUP slot, hidden layer only
    return p / s                                     # exact divide (output layer)


def gat_kernel(x_ref, adjbd_ref, w_all_ref, a_all_ref, wout_ref, aout_ref, out_ref):
    x = x_ref[0]                         # [GBN, NFEAT]  GB graphs stacked on sublanes
    mask = adjbd_ref[0] > 0.0            # [GBN, GBN]    block-diagonal adjacency

    # ---- multi-head attention layer (concat=True) --------------------------
    Wh_all = jnp.dot(x, w_all_ref[...], preferred_element_type=jnp.float32)       # [GBN, H*NHID]
    f_all = jnp.dot(Wh_all, a_all_ref[...], preferred_element_type=jnp.float32)   # [GBN, 2H]
    f_allT = jnp.transpose(f_all)                                                  # [2H, GBN] (one transpose)

    # scores[h, i, j] = f1_h[i] + f2_h[j]; heads stacked on the leading axis,
    # masked with a broadcast of the single block-diagonal mask.
    scores = jnp.stack(
        [f_all[:, h:h + 1] + f_allT[NHEADS + h:NHEADS + h + 1, :]
         for h in range(NHEADS)], axis=0)                                          # [H, GBN, GBN]
    att = _masked_softmax(scores, mask[None], approx=True)                         # [H, GBN, GBN]

    # Per-head aggregation against lane slices of Wh_all; lane-concat heads.
    hcat = jnp.concatenate(
        [jnp.dot(att[h], Wh_all[:, h * NHID:(h + 1) * NHID],
                 preferred_element_type=jnp.float32) for h in range(NHEADS)],
        axis=1)                                                                    # [GBN, H*NHID]
    hcat = _elu(hcat)

    # ---- output attention layer (concat=False) -----------------------------
    Wh_o = jnp.dot(hcat, wout_ref[...], preferred_element_type=jnp.float32)        # [GBN, NCLASS]
    f_o = jnp.dot(Wh_o, aout_ref[...], preferred_element_type=jnp.float32)         # [GBN, 2]
    f_oT = jnp.transpose(f_o)                                                       # [2, GBN]
    scores_o = f_o[:, 0:1] + f_oT[1:2, :]                                           # [GBN, GBN]
    att_o = _masked_softmax(scores_o, mask, approx=False)
    logits = _elu(jnp.dot(att_o, Wh_o, preferred_element_type=jnp.float32))         # [GBN, NCLASS]

    # F.log_softmax along the class dim; unpadded store (tiny masked vst).
    z = logits - jnp.max(logits, axis=-1, keepdims=True)
    out_ref[0] = z - jnp.log(jnp.sum(jnp.exp(z), axis=-1, keepdims=True))


def pack_params(W_heads, a_heads, W_out, a_out):
    """One-time packing of PyTorch-shaped params (hoisted out of the per-call path).
       W_all : [NFEAT, H*NHID]  column block h == W_heads[h]
       A_cat : [H*NHID, 2H]     block-diag a1/a2 so Wh_all @ A_cat == all f1|f2 scores
    """
    W_all = jnp.transpose(W_heads, (1, 0, 2)).reshape(NFEAT, NHEADS * NHID)
    A_cat = jnp.zeros((NHEADS * NHID, 2 * NHEADS), jnp.float32)
    for h in range(NHEADS):
        A_cat = A_cat.at[h * NHID:(h + 1) * NHID, h].set(a_heads[h, 0])
        A_cat = A_cat.at[h * NHID:(h + 1) * NHID, NHEADS + h].set(a_heads[h, 1])
    return W_all, A_cat, W_out, jnp.transpose(a_out)      # a_out packed: [NCLASS, 2]


@jax.jit
def gat_forward(x, adj, W_all, A_cat, W_out, a_out_packed):
    B = x.shape[0]
    G = -(-B // GB)                      # grid steps (>= 2 keeps both v7x TCs busy)
    pad = G * GB - B
    if pad:
        # Padded graphs: zero features + identity adjacency (self-loops keep their
        # softmax rows well-defined); their outputs are sliced off below.
        x = jnp.concatenate([x, jnp.zeros((pad, N, NFEAT), x.dtype)], axis=0)
        adj = jnp.concatenate(
            [adj, jnp.broadcast_to(jnp.eye(N, dtype=adj.dtype), (pad, N, N))], axis=0)

    # Stack GB graphs per grid step; pack their adjacencies block-diagonally so one
    # [GBN, GBN] softmax / matmul keeps per-graph attention exactly separate.
    xg = x.reshape(G, GBN, NFEAT)
    adj_bd = jnp.einsum('pq,gpij->gpiqj', jnp.eye(GB, dtype=adj.dtype),
                        adj.reshape(G, GB, N, N)).reshape(G, GBN, GBN)

    out = pl.pallas_call(
        gat_kernel,
        out_shape=jax.ShapeDtypeStruct((G, GBN, NCLASS), jnp.float32),
        grid=(G,),
        in_specs=[
            pl.BlockSpec((1, GBN, NFEAT), lambda g: (g, 0, 0)),           # x group
            pl.BlockSpec((1, GBN, GBN), lambda g: (g, 0, 0)),             # block-diag adj
            pl.BlockSpec((NFEAT, NHEADS * NHID), lambda g: (0, 0)),       # W_all (VMEM resident)
            pl.BlockSpec((NHEADS * NHID, 2 * NHEADS), lambda g: (0, 0)),  # A_cat
            pl.BlockSpec((NHEADS * NHID, NCLASS), lambda g: (0, 0)),      # W_out
            pl.BlockSpec((NCLASS, 2), lambda g: (0, 0)),                  # a_out packed
        ],
        out_specs=pl.BlockSpec((1, GBN, NCLASS), lambda g: (g, 0, 0)),
        compiler_params=pltpu.CompilerParams(
            dimension_semantics=("parallel",)),
    )(xg, adj_bd, W_all, A_cat, W_out, a_out_packed)
    return out.reshape(G * GB, N, NCLASS)[:B]


def init_params(key):
    """Deterministic xavier-uniform-ish init, matching PyTorch param shapes:
       per head: W [nfeat, nhid], a [2*nhid, 1]  (stored as [2, nhid])
       out:      W [nhid*nheads, nclass], a [2*nclass, 1] (stored as [2, nclass])
    """
    k = jax.random.split(key, 4)

    def xavier(k, shape):
        fan_in, fan_out = shape[-2], shape[-1]
        lim = (6.0 / (fan_in + fan_out)) ** 0.5
        return jax.random.uniform(k, shape, jnp.float32, -lim, lim)

    W_heads = xavier(k[0], (NHEADS, NFEAT, NHID))
    a_heads = xavier(k[1], (NHEADS, 2, NHID))
    W_out   = xavier(k[2], (NHID * NHEADS, NCLASS))
    a_out   = xavier(k[3], (2, NCLASS))
    return W_heads, a_heads, W_out, a_out


def gat_reference(x, adj, W_heads, a_heads, W_out, a_out):
    """Pure-JAX reference (PyTorch module semantics, eval mode), vmapped over B."""
    hp = jax.lax.Precision.HIGHEST

    def layer(h, adjg, W, a1, a2, concat):
        Wh = jnp.dot(h, W, precision=hp)
        e = (jnp.dot(Wh, a1[:, None], precision=hp)
             + jnp.dot(Wh, a2[:, None], precision=hp).T)
        e = jnp.where(e > 0, e, ALPHA * e)
        e = jnp.where(adjg > 0, e, -9e15)
        att = jax.nn.softmax(e, axis=1)
        out = jnp.dot(att, Wh, precision=hp)
        return jax.nn.elu(out) if concat else out

    def single(xg, adjg):
        heads = [layer(xg, adjg, W_heads[h], a_heads[h, 0], a_heads[h, 1], True)
                 for h in range(NHEADS)]
        hcat = jnp.concatenate(heads, axis=1)
        logits = jax.nn.elu(layer(hcat, adjg, W_out, a_out[0], a_out[1], False))
        return jax.nn.log_softmax(logits, axis=1)

    return jax.vmap(single)(x, adj)


if __name__ == "__main__":
    key = jax.random.PRNGKey(0)
    kx, ka, kp = jax.random.split(key, 3)

    B = 12                                # -> grid=(2,) at GB=8, exercises padding too
    x = jax.random.normal(kx, (B, N, NFEAT), jnp.float32)
    # random sparse-ish adjacency with guaranteed self-loops
    adj = (jax.random.uniform(ka, (B, N, N)) > 0.7).astype(jnp.float32)
    adj = jnp.maximum(adj, jnp.eye(N, dtype=jnp.float32)[None])

    W_heads, a_heads, W_out, a_out = init_params(kp)
    packed = pack_params(W_heads, a_heads, W_out, a_out)   # once, outside the hot path

    out = gat_forward(x, adj, *packed)
    out = jax.block_until_ready(out)
    assert out.shape == (B, N, NCLASS)
    assert bool(jnp.all(jnp.isfinite(out)))

    ref = gat_reference(x, adj, W_heads, a_heads, W_out, a_out)
    max_err = float(jnp.max(jnp.abs(out - ref)))
    assert max_err < 1e-2, f"max abs error vs reference: {max_err}"
    print("KERNEL_OK")
</pallas_src>

<mosaic_0001>
module attributes {stable_mosaic.version = 11 : i64} {
  func.func @gat_kernel(%arg0: i32, %arg1: memref<1x128x32xf32, #tpu.memory_space<vmem>>, %arg2: memref<1x128x128xf32, #tpu.memory_space<vmem>>, %arg3: memref<32x32xf32, #tpu.memory_space<vmem>>, %arg4: memref<32x4xf32, #tpu.memory_space<vmem>>, %arg5: memref<32x8xf32, #tpu.memory_space<vmem>>, %arg6: memref<8x2xf32, #tpu.memory_space<vmem>>, %arg7: memref<1x128x8xf32, #tpu.memory_space<vmem>>) attributes {dimension_semantics = [#tpu.dimension_semantics<parallel>], iteration_bounds = array<i64: 2>, scalar_prefetch = 0 : i64, scratch_operands = 0 : i64, tpu.core_type = #tpu.core_type<tc>, window_params = [{transform_indices = @transform_0, window_bounds = array<i64: 1, 128, 32>}, {transform_indices = @transform_1, window_bounds = array<i64: 1, 128, 128>}, {pipeline_mode = #tpu.pipeline_mode<synchronous>, transform_indices = @transform_2, window_bounds = array<i64: 32, 32>}, {pipeline_mode = #tpu.pipeline_mode<synchronous>, transform_indices = @transform_3, window_bounds = array<i64: 32, 4>}, {pipeline_mode = #tpu.pipeline_mode<synchronous>, transform_indices = @transform_4, window_bounds = array<i64: 32, 8>}, {pipeline_mode = #tpu.pipeline_mode<synchronous>, transform_indices = @transform_5, window_bounds = array<i64: 8, 2>}, {transform_indices = @transform_6, window_bounds = array<i64: 1, 128, 8>}]} {
    %c0 = arith.constant 0 : index
    %c0_0 = arith.constant 0 : index
    %c0_1 = arith.constant 0 : index
    %0 = vector.load %arg1[%c0, %c0_0, %c0_1] : memref<1x128x32xf32, #tpu.memory_space<vmem>>, vector<1x128x32xf32>
    %1 = vector.shape_cast %0 : vector<1x128x32xf32> to vector<128x32xf32>
    %c0_2 = arith.constant 0 : index
    %c0_3 = arith.constant 0 : index
    %c0_4 = arith.constant 0 : index
    %2 = vector.load %arg2[%c0_2, %c0_3, %c0_4] : memref<1x128x128xf32, #tpu.memory_space<vmem>>, vector<1x128x128xf32>
    %3 = vector.shape_cast %2 : vector<1x128x128xf32> to vector<128x128xf32>
    %cst = arith.constant 0.000000e+00 : f32
    %4 = vector.broadcast %cst : f32 to vector<128x128xf32>
    %5 = arith.cmpf ogt, %3, %4 : vector<128x128xf32>
    %c0_5 = arith.constant 0 : index
    %c0_6 = arith.constant 0 : index
    %6 = vector.load %arg3[%c0_5, %c0_6] : memref<32x32xf32, #tpu.memory_space<vmem>>, vector<32x32xf32>
    %cst_7 = arith.constant dense<0.000000e+00> : vector<128x32xf32>
    %7 = tpu.matmul %1, %6, %cst_7 {dimension_numbers = #tpu.dot_dimension_numbers<[1], [0], [0], [1], [0, 0, 1, 1], [], []>} : vector<128x32xf32>, vector<32x32xf32>, vector<128x32xf32> -> vector<128x32xf32>
    %c0_8 = arith.constant 0 : index
    %c0_9 = arith.constant 0 : index
    %8 = vector.load %arg4[%c0_8, %c0_9] : memref<32x4xf32, #tpu.memory_space<vmem>>, vector<32x4xf32>
    %cst_10 = arith.constant dense<0.000000e+00> : vector<128x4xf32>
    %9 = tpu.matmul %7, %8, %cst_10 {dimension_numbers = #tpu.dot_dimension_numbers<[1], [0], [0], [1], [0, 0, 1, 1], [], []>} : vector<128x32xf32>, vector<32x4xf32>, vector<128x4xf32> -> vector<128x4xf32>
    %10 = tpu.transpose %9, [1, 0] : vector<128x4xf32> -> vector<4x128xf32>
    %11 = vector.extract_strided_slice %9 {offsets = [0, 0], sizes = [128, 1], strides = [1, 1]} : vector<128x4xf32> to vector<128x1xf32>
    %12 = vector.extract_strided_slice %10 {offsets = [2, 0], sizes = [1, 128], strides = [1, 1]} : vector<4x128xf32> to vector<1x128xf32>
    %13 = vector.broadcast %11 : vector<128x1xf32> to vector<128x128xf32>
    %14 = vector.broadcast %12 : vector<1x128xf32> to vector<128x128xf32>
    %15 = arith.addf %13, %14 : vector<128x128xf32>
    %16 = vector.extract_strided_slice %9 {offsets = [0, 1], sizes = [128, 1], strides = [1, 1]} : vector<128x4xf32> to vector<128x1xf32>
    %17 = vector.extract_strided_slice %10 {offsets = [3, 0], sizes = [1, 128], strides = [1, 1]} : vector<4x128xf32> to vector<1x128xf32>
    %18 = vector.broadcast %16 : vector<128x1xf32> to vector<128x128xf32>
    %19 = vector.broadcast %17 : vector<1x128xf32> to vector<128x128xf32>
    %20 = arith.addf %18, %19 : vector<128x128xf32>
    %21 = vector.shape_cast %15 : vector<128x128xf32> to vector<1x128x128xf32>
    %22 = vector.shape_cast %20 : vector<128x128xf32> to vector<1x128x128xf32>
    %23 = tpu.concatenate %21, %22 in 0 : vector<1x128x128xf32>, vector<1x128x128xf32> -> vector<2x128x128xf32>
    %24 = vector.shape_cast %5 : vector<128x128xi1> to vector<1x128x128xi1>
    %cst_11 = arith.constant 0.000000e+00 : f32
    %25 = vector.broadcast %cst_11 : f32 to vector<2x128x128xf32>
    %26 = arith.cmpf ogt, %23, %25 : vector<2x128x128xf32>
    %cst_12 = arith.constant 2.000000e-01 : f32
    %27 = vector.broadcast %cst_12 : f32 to vector<2x128x128xf32>
    %28 = arith.mulf %27, %23 : vector<2x128x128xf32>
    %29 = arith.select %26, %23, %28 : vector<2x128x128xi1>, vector<2x128x128xf32>
    %cst_13 = arith.constant -9.000000e+15 : f32
    %30 = vector.shape_cast %24 : vector<1x128x128xi1> to vector<1x128x128xi1>
    %31 = vector.broadcast %30 : vector<1x128x128xi1> to vector<2x128x128xi1>
    %32 = vector.broadcast %cst_13 : f32 to vector<2x128x128xf32>
    %33 = arith.select %31, %29, %32 : vector<2x128x128xi1>, vector<2x128x128xf32>
    %cst_14 = arith.constant dense<0xFF800000> : vector<2x128xf32>
    %34 = vector.multi_reduction <maximumf>, %33, %cst_14 [2] : vector<2x128x128xf32> to vector<2x128xf32>
    %35 = vector.shape_cast %34 : vector<2x128xf32> to vector<2x128x1xf32>
    %36 = vector.broadcast %35 : vector<2x128x1xf32> to vector<2x128x128xf32>
    %37 = arith.subf %33, %36 : vector<2x128x128xf32>
    %38 = math.exp %37 : vector<2x128x128xf32>
    %cst_15 = arith.constant dense<0.000000e+00> : vector<2x128xf32>
    %39 = vector.multi_reduction <add>, %38, %cst_15 [2] : vector<2x128x128xf32> to vector<2x128xf32>
    %40 = vector.shape_cast %39 : vector<2x128xf32> to vector<2x128x1xf32>
    %41 = tpu.reciprocal %40 {approx = true} : vector<2x128x1xf32> -> vector<2x128x1xf32>
    %42 = vector.broadcast %41 : vector<2x128x1xf32> to vector<2x128x128xf32>
    %43 = arith.mulf %38, %42 : vector<2x128x128xf32>
    %44 = vector.extract_strided_slice %43 {offsets = [0, 0, 0], sizes = [1, 128, 128], strides = [1, 1, 1]} : vector<2x128x128xf32> to vector<1x128x128xf32>
    %45 = vector.shape_cast %44 : vector<1x128x128xf32> to vector<128x128xf32>
    %46 = vector.extract_strided_slice %7 {offsets = [0, 0], sizes = [128, 16], strides = [1, 1]} : vector<128x32xf32> to vector<128x16xf32>
    %cst_16 = arith.constant dense<0.000000e+00> : vector<128x16xf32>
    %47 = tpu.matmul %45, %46, %cst_16 {dimension_numbers = #tpu.dot_dimension_numbers<[1], [0], [0], [1], [0, 0, 1, 1], [], []>} : vector<128x128xf32>, vector<128x16xf32>, vector<128x16xf32> -> vector<128x16xf32>
    %48 = vector.extract_strided_slice %43 {offsets = [1, 0, 0], sizes = [1, 128, 128], strides = [1, 1, 1]} : vector<2x128x128xf32> to vector<1x128x128xf32>
    %49 = vector.shape_cast %48 : vector<1x128x128xf32> to vector<128x128xf32>
    %50 = vector.extract_strided_slice %7 {offsets = [0, 16], sizes = [128, 16], strides = [1, 1]} : vector<128x32xf32> to vector<128x16xf32>
    %cst_17 = arith.constant dense<0.000000e+00> : vector<128x16xf32>
    %51 = tpu.matmul %49, %50, %cst_17 {dimension_numbers = #tpu.dot_dimension_numbers<[1], [0], [0], [1], [0, 0, 1, 1], [], []>} : vector<128x128xf32>, vector<128x16xf32>, vector<128x16xf32> -> vector<128x16xf32>
    %52 = tpu.concatenate %47, %51 in 1 : vector<128x16xf32>, vector<128x16xf32> -> vector<128x32xf32>
    %cst_18 = arith.constant 0.000000e+00 : f32
    %53 = vector.broadcast %cst_18 : f32 to vector<128x32xf32>
    %54 = arith.cmpf ogt, %52, %53 : vector<128x32xf32>
    %cst_19 = arith.constant 0.000000e+00 : f32
    %55 = vector.broadcast %cst_19 : f32 to vector<128x32xf32>
    %56 = arith.minimumf %52, %55 : vector<128x32xf32>
    %57 = math.exp %56 : vector<128x32xf32>
    %cst_20 = arith.constant 1.000000e+00 : f32
    %58 = vector.broadcast %cst_20 : f32 to vector<128x32xf32>
    %59 = arith.subf %57, %58 : vector<128x32xf32>
    %60 = arith.select %54, %52, %59 : vector<128x32xi1>, vector<128x32xf32>
    %c0_21 = arith.constant 0 : index
    %c0_22 = arith.constant 0 : index
    %61 = vector.load %arg5[%c0_21, %c0_22] : memref<32x8xf32, #tpu.memory_space<vmem>>, vector<32x8xf32>
    %cst_23 = arith.constant dense<0.000000e+00> : vector<128x8xf32>
    %62 = tpu.matmul %60, %61, %cst_23 {dimension_numbers = #tpu.dot_dimension_numbers<[1], [0], [0], [1], [0, 0, 1, 1], [], []>} : vector<128x32xf32>, vector<32x8xf32>, vector<128x8xf32> -> vector<128x8xf32>
    %c0_24 = arith.constant 0 : index
    %c0_25 = arith.constant 0 : index
    %63 = vector.load %arg6[%c0_24, %c0_25] : memref<8x2xf32, #tpu.memory_space<vmem>>, vector<8x2xf32>
    %cst_26 = arith.constant dense<0.000000e+00> : vector<128x2xf32>
    %64 = tpu.matmul %62, %63, %cst_26 {dimension_numbers = #tpu.dot_dimension_numbers<[1], [0], [0], [1], [0, 0, 1, 1], [], []>} : vector<128x8xf32>, vector<8x2xf32>, vector<128x2xf32> -> vector<128x2xf32>
    %65 = tpu.transpose %64, [1, 0] : vector<128x2xf32> -> vector<2x128xf32>
    %66 = vector.extract_strided_slice %64 {offsets = [0, 0], sizes = [128, 1], strides = [1, 1]} : vector<128x2xf32> to vector<128x1xf32>
    %67 = vector.extract_strided_slice %65 {offsets = [1, 0], sizes = [1, 128], strides = [1, 1]} : vector<2x128xf32> to vector<1x128xf32>
    %68 = vector.broadcast %66 : vector<128x1xf32> to vector<128x128xf32>
    %69 = vector.broadcast %67 : vector<1x128xf32> to vector<128x128xf32>
    %70 = arith.addf %68, %69 : vector<128x128xf32>
    %cst_27 = arith.constant 0.000000e+00 : f32
    %71 = vector.broadcast %cst_27 : f32 to vector<128x128xf32>
    %72 = arith.cmpf ogt, %70, %71 : vector<128x128xf32>
    %cst_28 = arith.constant 2.000000e-01 : f32
    %73 = vector.broadcast %cst_28 : f32 to vector<128x128xf32>
    %74 = arith.mulf %73, %70 : vector<128x128xf32>
    %75 = arith.select %72, %70, %74 : vector<128x128xi1>, vector<128x128xf32>
    %cst_29 = arith.constant -9.000000e+15 : f32
    %76 = vector.broadcast %cst_29 : f32 to vector<128x128xf32>
    %77 = arith.select %5, %75, %76 : vector<128x128xi1>, vector<128x128xf32>
    %cst_30 = arith.constant dense<0xFF800000> : vector<128xf32>
    %78 = vector.multi_reduction <maximumf>, %77, %cst_30 [1] : vector<128x128xf32> to vector<128xf32>
    %79 = vector.shape_cast %78 : vector<128xf32> to vector<128x1xf32>
    %80 = vector.broadcast %79 : vector<128x1xf32> to vector<128x128xf32>
    %81 = arith.subf %77, %80 : vector<128x128xf32>
    %82 = math.exp %81 : vector<128x128xf32>
    %cst_31 = arith.constant dense<0.000000e+00> : vector<128xf32>
    %83 = vector.multi_reduction <add>, %82, %cst_31 [1] : vector<128x128xf32> to vector<128xf32>
    %84 = vector.shape_cast %83 : vector<128xf32> to vector<128x1xf32>
    %85 = vector.broadcast %84 : vector<128x1xf32> to vector<128x128xf32>
    %86 = arith.divf %82, %85 : vector<128x128xf32>
    %cst_32 = arith.constant dense<0.000000e+00> : vector<128x8xf32>
    %87 = tpu.matmul %86, %62, %cst_32 {dimension_numbers = #tpu.dot_dimension_numbers<[1], [0], [0], [1], [0, 0, 1, 1], [], []>} : vector<128x128xf32>, vector<128x8xf32>, vector<128x8xf32> -> vector<128x8xf32>
    %cst_33 = arith.constant 0.000000e+00 : f32
    %88 = vector.broadcast %cst_33 : f32 to vector<128x8xf32>
    %89 = arith.cmpf ogt, %87, %88 : vector<128x8xf32>
    %cst_34 = arith.constant 0.000000e+00 : f32
    %90 = vector.broadcast %cst_34 : f32 to vector<128x8xf32>
    %91 = arith.minimumf %87, %90 : vector<128x8xf32>
    %92 = math.exp %91 : vector<128x8xf32>
    %cst_35 = arith.constant 1.000000e+00 : f32
    %93 = vector.broadcast %cst_35 : f32 to vector<128x8xf32>
    %94 = arith.subf %92, %93 : vector<128x8xf32>
    %95 = arith.select %89, %87, %94 : vector<128x8xi1>, vector<128x8xf32>
    %cst_36 = arith.constant dense<0xFF800000> : vector<128xf32>
    %96 = vector.multi_reduction <maximumf>, %95, %cst_36 [1] : vector<128x8xf32> to vector<128xf32>
    %97 = vector.shape_cast %96 : vector<128xf32> to vector<128x1xf32>
    %98 = vector.broadcast %97 : vector<128x1xf32> to vector<128x8xf32>
    %99 = arith.subf %95, %98 : vector<128x8xf32>
    %100 = math.exp %99 : vector<128x8xf32>
    %cst_37 = arith.constant dense<0.000000e+00> : vector<128xf32>
    %101 = vector.multi_reduction <add>, %100, %cst_37 [1] : vector<128x8xf32> to vector<128xf32>
    %102 = vector.shape_cast %101 : vector<128xf32> to vector<128x1xf32>
    %103 = math.log %102 : vector<128x1xf32>
    %104 = vector.broadcast %103 : vector<128x1xf32> to vector<128x8xf32>
    %105 = arith.subf %99, %104 : vector<128x8xf32>
    %c0_38 = arith.constant 0 : index
    %c0_39 = arith.constant 0 : index
    %c0_40 = arith.constant 0 : index
    %106 = vector.load %arg7[%c0_38, %c0_39, %c0_40] : memref<1x128x8xf32, #tpu.memory_space<vmem>>, vector<1x128x8xf32>
    %107 = vector.shape_cast %106 : vector<1x128x8xf32> to vector<128x8xf32>
    %108 = vector.shape_cast %105 : vector<128x8xf32> to vector<1x128x8xf32>
    tpu.vector_store %arg7[%c0_38, %c0_39, %c0_40], %108 {strides = array<i32>} : memref<1x128x8xf32, #tpu.memory_space<vmem>>, vector<1x128x8xf32>,
    return
  }
  func.func @transform_0(%arg0: i32) -> (i32, i32, i32) {
    %c0_i32 = arith.constant 0 : i32
    %c0_i32_0 = arith.constant 0 : i32
    %c0_i32_1 = arith.constant 0 : i32
    return %arg0, %c0_i32, %c0_i32_0 : i32, i32, i32
  }
  func.func @transform_1(%arg0: i32) -> (i32, i32, i32) {
    %c0_i32 = arith.constant 0 : i32
    %c0_i32_0 = arith.constant 0 : i32
    %c0_i32_1 = arith.constant 0 : i32
    return %arg0, %c0_i32, %c0_i32_0 : i32, i32, i32
  }
  func.func @transform_2(%arg0: i32) -> (i32, i32) {
    %c0_i32 = arith.constant 0 : i32
    %c0_i32_0 = arith.constant 0 : i32
    %c0_i32_1 = arith.constant 0 : i32
    return %c0_i32, %c0_i32_0 : i32, i32
  }
  func.func @transform_3(%arg0: i32) -> (i32, i32) {
    %c0_i32 = arith.constant 0 : i32
    %c0_i32_0 = arith.constant 0 : i32
    %c0_i32_1 = arith.constant 0 : i32
    return %c0_i32, %c0_i32_0 : i32, i32
  }
  func.func @transform_4(%arg0: i32) -> (i32, i32) {
    %c0_i32 = arith.constant 0 : i32
    %c0_i32_0 = arith.constant 0 : i32
    %c0_i32_1 = arith.constant 0 : i32
    return %c0_i32, %c0_i32_0 : i32, i32
  }
  func.func @transform_5(%arg0: i32) -> (i32, i32) {
    %c0_i32 = arith.constant 0 : i32
    %c0_i32_0 = arith.constant 0 : i32
    %c0_i32_1 = arith.constant 0 : i32
    return %c0_i32, %c0_i32_0 : i32, i32
  }
  func.func @transform_6(%arg0: i32) -> (i32, i32, i32) {
    %c0_i32 = arith.constant 0 : i32
    %c0_i32_0 = arith.constant 0 : i32
    %c0_i32_1 = arith.constant 0 : i32
    return %arg0, %c0_i32, %c0_i32_0 : i32, i32, i32
  }
}

</mosaic_0001>

<bundles_post_ra>
// kernel: gat_forward.1
= control target key start
LH: loop header
LB: loop body
LE: loop exit
PB: predicated region body
PF: predicated region fallthrough
CT: control target
= control target key end

     0   :  { %s3349_s21 = smov 0   ;;  %s4617_s0 = inlined_call_operand.vmem [shape: f32[2,128,32], index: 0, kind: input, shape index: {}]   ;;  %s4618_s1 = inlined_call_operand.vmem [shape: f32[2,128,128], index: 1, kind: input, shape index: {}]   ;;  %s4619_s2 = inlined_call_operand.vmem [shape: f32[32,32], index: 2, kind: input, shape index: {}]   ;;  %s4620_s3 = inlined_call_operand.vmem [shape: f32[32,4], index: 3, kind: input, shape index: {}]   ;;  %s4621_s4 = inlined_call_operand.vmem [shape: f32[32,8], index: 4, kind: input, shape index: {}]   ;;  %s4622_s5 = inlined_call_operand.vmem [shape: f32[8,2], index: 5, kind: input, shape index: {}]   ;;  %s4623_s6 = inlined_call_operand.vmem [shape: f32[2,128,8], index: 6, kind: output, shape index: {}]  }
   0x1 LB: > { %s2781_s22 = sadd.s32 4294967295, %s3308_s21   ;;  %p2785_p0 = scmp.ge.s32.totalorder %s3308_s21, 1  ;;  %s3308_s21 = sphi %s3349_s21, %s16_s21  }
   0x2   : > { %p222_p1 = scmp.lt.s32.totalorder %s3308_s21, 3 }
   0x4   : > { %p223_p2 = pnand %p2785_p0, %p222_p1 }
   0x5   : > { %p257_p3 = scmp.lt.s32.totalorder (!%p223_p2), %s2781_s22, 1  ;;  %s3310_s19 = smov (!%p223_p2), 112  }
   0x6   : > { %226 = sbr.rel (%p223_p2) target bundleno = 2706 (0xa92), region = 44  ;;  %s3313_s24 = smov (!%p223_p2), 16  }
   0xb   : > { %v323_v0 = vld [vmem:[%s4619_s2 + $0x18] sm:$0xff]  ;;  %v322_v1 = vld [vmem:[%s4619_s2 + $0x10] sm:$0xff]  ;;  %v321_v2 = vld [vmem:[%s4619_s2 + $0x8] sm:$0xff]  ;;  %s4637_s22 = smov (!%p257_p3, %s2781_s22), 1  ;;  %vm324_vm0 = vcmask 261120   ;;  %v3311_v42 = vmov 1  }
   0xc   : > { %385 = vmatpush.msra.mxu0 %v323_v0  ;;  %v320_v3 = vld [vmem:[%s4619_s2] sm:$0xff]  ;;  %s3369_s7 = sshll.u32 %s4637_s22, 7  ;;  %v441_v15 = vld [vmem:[%s4620_s3 + $0x18] sm:$0xff]  ;;  %v440_v17 = vld [vmem:[%s4620_s3 + $0x10] sm:$0xff]  ;;  %2966 = vset.pattern.permute.xlu0 %v3311_v42  ;;  %v3312_v44 = vmov 0  }
   0xd   : > { %s3375_s10 = scalar_lea.vmem %s4617_s0, %s3369_s7  ;;  %502 = vmatpush.msra.mxu1 %v441_v15  ;;  %v439_v18 = vld [vmem:[%s4620_s3 + $0x8] sm:$0xff]  ;;  %v438_v19 = vld [vmem:[%s4620_s3] sm:$0xff]  ;;  %2967 = vset.pattern.permute.xlu2 %v3312_v44  ;;  %s3566_s23 = scalar_lea.vmem %s4618_s1, %s3369_s7 }
   0xe   : > { %386 = vmatpush.msra.mxu0 %v322_v1  ;;  %v272_v4 = vld [vmem:[%s3375_s10] sm:$0xff]  ;;  %v273_v5 = vld [vmem:[%s3375_s10 + $0x8] sm:$0xff]  ;;  %v274_v6 = vld [vmem:[%s3375_s10 + $0x10] sm:$0xff]  ;;  %2975 = vset.pattern.permute.xlu1 %v3312_v44  ;;  %s4562_s14 = scalar_lea.vmem %s4623_s6, %s3369_s7 }
   0xf   : > { %v275_v7 = vld [vmem:[%s3375_s10 + $0x18] sm:$0xff]  ;;  %v276_v8 = vld [vmem:[%s3375_s10 + $0x20] sm:$0xff]  ;;  %v277_v9 = vld [vmem:[%s3375_s10 + $0x28] sm:$0xff]  ;;  %503 = vmatpush.msra.mxu1 %v440_v17 }
  0x10   : > { %387 = vmatpush.msra.mxu0 %v321_v2  ;;  %v278_v10 = vld [vmem:[%s3375_s10 + $0x30] sm:$0xff]  ;;  %v279_v11 = vld [vmem:[%s3375_s10 + $0x38] sm:$0xff]  ;;  %v280_v12 = vld [vmem:[%s3375_s10 + $0x40] sm:$0xff] }
  0x11   : > { %v281_v13 = vld [vmem:[%s3375_s10 + $0x48] sm:$0xff]  ;;  %v282_v14 = vld [vmem:[%s3375_s10 + $0x50] sm:$0xff]  ;;  %v283_v16 = vld [vmem:[%s3375_s10 + $0x58] sm:$0xff]  ;;  %504 = vmatpush.msra.mxu1 %v439_v18 }
  0x12   : > { %388 = vmatpush.msra.mxu0 %v320_v3  ;;  %v284_v20 = vld [vmem:[%s3375_s10 + $0x60] sm:$0xff]  ;;  %v285_v21 = vld [vmem:[%s3375_s10 + $0x68] sm:$0xff]  ;;  %v286_v22 = vld [vmem:[%s3375_s10 + $0x70] sm:$0xff] }
  0x13   : > { %2792 = vmatmul.msk.f32.vlgmr.msra.gmra.mxu0 %vm324_vm0, %v272_v4  ;;  %505 = vmatpush.msra.mxu1 %v438_v19  ;;  %v287_v23 = vld [vmem:[%s3375_s10 + $0x78] sm:$0xff] }
  0x1b   : > { %2793 = vmatmul.msk.f32.gmra.mxu0 %vm324_vm0, %v273_v5 }
  0x23   : > { %2794 = vmatmul.msk.f32.gmra.mxu0 %vm324_vm0, %v274_v6 }
  0x2b   : > { %2795 = vmatmul.msk.f32.gmra.mxu0 %vm324_vm0, %v275_v7 }
  0x33   : > { %2796 = vmatmul.msk.f32.gmra.mxu0 %vm324_vm0, %v276_v8 }
  0x3b   : > { %2797 = vmatmul.msk.f32.gmra.mxu0 %vm324_vm0, %v277_v9 }
  0x43   : > { %2798 = vmatmul.msk.f32.gmra.mxu0 %vm324_vm0, %v278_v10 }
  0x4b   : > { %2799 = vmatmul.msk.f32.gmra.mxu0 %vm324_vm0, %v279_v11 }
  0x53   : > { %2800 = vmatmul.msk.f32.gmra.mxu0 %vm324_vm0, %v280_v12 }
  0x5b   : > { %2801 = vmatmul.msk.f32.gmra.mxu0 %vm324_vm0, %v281_v13 }
  0x63   : > { %2802 = vmatmul.msk.f32.gmra.mxu0 %vm324_vm0, %v282_v14 }
  0x6b   : > { %2803 = vmatmul.msk.f32.gmra.mxu0 %vm324_vm0, %v283_v16 }
  0x73   : > { %2804 = vmatmul.msk.f32.gmra.mxu0 %vm324_vm0, %v284_v20 }
  0x7b   : > { %2805 = vmatmul.msk.f32.gmra.mxu0 %vm324_vm0, %v285_v21 }
  0x83   : > { %2806 = vmatmul.msk.f32.gmra.mxu0 %vm324_vm0, %v286_v22 }
  0x8b   : > { %2807 = vmatmul.msk.f32.gmra.mxu0 %vm324_vm0, %v287_v23 }
  0x90   : > { %v3421_v24 = vpop.f32.mrf.mxu0 }
  0x91   : > { %2808 = vmatmul.msk.f32.vlgmr.msra.gmra.mxu1 %vm324_vm0, %v3421_v24 }
  0x98   : > { %v3425_v25 = vpop.f32.mrf.mxu0 }
  0x99   : > { %2809 = vmatmul.msk.f32.gmra.mxu1 %vm324_vm0, %v3425_v25  ;;  %v2926_v26 = vpack.i.bf16 %v3421_v24, %v3425_v25 }
  0x9b   : > { %2927 = vrot.lane.b32.xlu2 %v2926_v26, %s3310_s19 }
  0xa0   : > { %v3432_v27 = vpop.f32.mrf.mxu0 }
  0xa1   : > { %2810 = vmatmul.msk.f32.gmra.mxu1 %vm324_vm0, %v3432_v27 }
  0xa8   : > { %v3436_v28 = vpop.f32.mrf.mxu0 }
  0xa9   : > { %2811 = vmatmul.msk.f32.gmra.mxu1 %vm324_vm0, %v3436_v28  ;;  %v2931_v29 = vpack.i.bf16 %v3432_v27, %v3436_v28 }
  0xab   : > { %2932 = vrot.lane.b32.xlu2 %v2931_v29, %s3310_s19 }
  0xb0   : > { %v3443_v30 = vpop.f32.mrf.mxu0 }
  0xb1   : > { %2812 = vmatmul.msk.f32.gmra.mxu1 %vm324_vm0, %v3443_v30 }
  0xb8   : > { %v3447_v31 = vpop.f32.mrf.mxu0 }
  0xb9   : > { %2813 = vmatmul.msk.f32.gmra.mxu1 %vm324_vm0, %v3447_v31  ;;  %v2936_v32 = vpack.i.bf16 %v3443_v30, %v3447_v31 }
  0xbb   : > { %2937 = vrot.lane.b32.xlu1 %v2936_v32, %s3310_s19 }
  0xc0   : > { %v408_v33 = vpop.f32.mrf.mxu0 }
  0xc1   : > { %2814 = vmatmul.msk.f32.gmra.mxu1 %vm324_vm0, %v408_v33 }
  0xc8   : > { %v411_v34 = vpop.f32.mrf.mxu0 }
  0xc9   : > { %2815 = vmatmul.msk.f32.gmra.mxu1 %vm324_vm0, %v411_v34  ;;  %v2941_v35 = vpack.i.bf16 %v408_v33, %v411_v34 }
  0xcb   : > { %2942 = vrot.lane.b32.xlu2 %v2941_v35, %s3310_s19 }
  0xd0   : > { %v414_v36 = vpop.f32.mrf.mxu0 }
  0xd1   : > { %2816 = vmatmul.msk.f32.gmra.mxu1 %vm324_vm0, %v414_v36 }
  0xd8   : > { %v417_v37 = vpop.f32.mrf.mxu0 }
  0xd9   : > { %2817 = vmatmul.msk.f32.gmra.mxu1 %vm324_vm0, %v417_v37  ;;  %v2946_v38 = vpack.i.bf16 %v414_v36, %v417_v37 }
  0xdb   : > { %2947 = vrot.lane.b32.xlu2 %v2946_v38, %s3310_s19 }
  0xe0   : > { %v420_v39 = vpop.f32.mrf.mxu0 }
  0xe1   : > { %2818 = vmatmul.msk.f32.gmra.mxu1 %vm324_vm0, %v420_v39 }
  0xe8   : > { %v423_v40 = vpop.f32.mrf.mxu0 }
  0xe9   : > { %2819 = vmatmul.msk.f32.gmra.mxu1 %vm324_vm0, %v423_v40  ;;  %v2951_v41 = vpack.i.bf16 %v420_v39, %v423_v40 }
  0xeb   : > { %2952 = vrot.lane.b32.xlu1 %v2951_v41, %s3310_s19 }
  0xf0   : > { %v426_v43 = vpop.f32.mrf.mxu0 }
  0xf1   : > { %2820 = vmatmul.msk.f32.gmra.mxu1 %vm324_vm0, %v426_v43 }
  0xf5   : > { %v3507_v56 = vpop.permute.xlu2 %2927 }
  0xf6   : > { %v2929_v22 = vunpack.i.l.bf16 %v3507_v56  ;;  %v2930_v23 = vunpack.i.h.bf16 %v3507_v56 }
  0xf8   : > { %v429_v45 = vpop.f32.mrf.mxu0 }
  0xf9   : > { %2821 = vmatmul.msk.f32.gmra.mxu1 %vm324_vm0, %v429_v45  ;;  %v2956_v46 = vpack.i.bf16 %v426_v43, %v429_v45 }
  0xfb   : > { %2957 = vrot.lane.b32.xlu2 %v2956_v46, %s3310_s19 }
 0x100   : > { %v432_v47 = vpop.f32.mrf.mxu0 }
 0x101   : > { %2822 = vmatmul.msk.f32.gmra.mxu1 %vm324_vm0, %v432_v47 }
 0x105   : > { %v2933_v58 = vpop.permute.xlu2 %2932 }
 0x106   : > { %v2934_v20 = vunpack.i.l.bf16 %v2933_v58  ;;  %v2935_v21 = vunpack.i.h.bf16 %v2933_v58 }
 0x108   : > { %v435_v48 = vpop.f32.mrf.mxu0 }
 0x109   : > { %1213 = vmatpush.msra.mxu2 %v435_v48  ;;  %2893 = vmatpush.msra.mxu3 %v435_v48  ;;  %v2961_v49 = vpack.i.bf16 %v432_v47, %v435_v48 }
 0x10a   : > { %2823 = vmatmul.msk.f32.gmra.mxu1 %vm324_vm0, %v435_v48 }
 0x10b   : > { %2962 = vrot.lane.b32.xlu2 %v2961_v49, %s3310_s19  ;;  %1214 = vmatpush.msra.mxu2 %v432_v47 }
 0x10c   : > { %2894 = vmatpush.msra.mxu3 %v432_v47 }
 0x10d   : > { %1215 = vmatpush.msra.mxu2 %v429_v45 }
 0x10e   : > { %2895 = vmatpush.msra.mxu3 %v429_v45  ;;  %v3472_v50 = vpop.f32.mrf.mxu1 }
 0x10f   : > { %685 = vperm.xlu0 %2966, %v3472_v50   ;;  %1216 = vmatpush.msra.mxu2 %v426_v43 }
 0x110   : > { %2896 = vmatpush.msra.mxu3 %v426_v43 }
 0x111   : > { %1217 = vmatpush.msra.mxu2 %v423_v40 }
 0x112   : > { %2897 = vmatpush.msra.mxu3 %v423_v40 }
 0x113   : > { %589 = vperm.xlu2 %2967, %v3472_v50   ;;  %1218 = vmatpush.msra.mxu2 %v420_v39 }
 0x114   : > { %2898 = vmatpush.msra.mxu3 %v420_v39  ;;  %v3571_v39 = vld [vmem:[%s3566_s23 + $0x18] sm:$0xff] }
 0x115   : > { %1219 = vmatpush.msra.mxu2 %v417_v37  ;;  %vm307_vm1 = vcmp.gt.f32.partialorder %v3571_v39, 0.0 }
 0x116   : > { %2899 = vmatpush.msra.mxu3 %v417_v37  ;;  %v3476_v51 = vpop.f32.mrf.mxu1 }
 0x117   : > { %689 = vperm.xlu0 %2966, %v3476_v51   ;;  %1220 = vmatpush.msra.mxu2 %v414_v36 }
 0x118   : > { %2900 = vmatpush.msra.mxu3 %v414_v36 }
 0x119   : > { %1221 = vmatpush.msra.mxu2 %v411_v34 }
 0x11a   : > { %2901 = vmatpush.msra.mxu3 %v411_v34 }
 0x11b   : > { %1222 = vmatpush.msra.mxu2 %v408_v33  ;;  %2969 = vset.pattern.permute.xlu2 %v3311_v42 }
 0x11c   : > { %2902 = vmatpush.msra.mxu3 %v408_v33 }
 0x11d   : > { %1223 = vmatpush.msra.mxu2 %v3447_v31 }
 0x11e   : > { %2903 = vmatpush.msra.mxu3 %v3447_v31  ;;  %v3482_v52 = vpop.f32.mrf.mxu1 }
 0x11f   : > { %2968 = vset.pattern.permute.xlu0 %v3312_v44  ;;  %693 = vperm.xlu2 %2969, %v3482_v52  }
 0x120   : > { %1224 = vmatpush.msra.mxu2 %v3443_v30  ;;  %2904 = vmatpush.msra.mxu3 %v3443_v30 }
 0x121   : > { %594 = vperm.xlu0 %2968, %v3476_v51  }
 0x122   : > { %1225 = vmatpush.msra.mxu2 %v3436_v28  ;;  %2905 = vmatpush.msra.mxu3 %v3436_v28 }
 0x124   : > { %1226 = vmatpush.msra.mxu2 %v3432_v27  ;;  %2906 = vmatpush.msra.mxu3 %v3432_v27 }
 0x125   : > { %v2943_v60 = vpop.permute.xlu2 %2942 }
 0x126   : > { %1227 = vmatpush.msra.mxu2 %v3425_v25  ;;  %2907 = vmatpush.msra.mxu3 %v3425_v25  ;;  %v3495_v53 = vpop.f32.mrf.mxu1  ;;  %v2944_v16 = vunpack.i.l.bf16 %v2943_v60  ;;  %v2945_v17 = vunpack.i.h.bf16 %v2943_v60 }
 0x128   : > { %1228 = vmatpush.msra.mxu2 %v3421_v24  ;;  %2908 = vmatpush.msra.mxu3 %v3421_v24 }
 0x129   : > { %2970 = vset.pattern.permute.xlu0 %v3311_v42 }
 0x12a   : > { %697 = vperm.xlu0 %2970, %v3495_v53  }
 0x12d   : > { %v2938_v2 = vpop.permute.xlu1 %2937 }
 0x12e   : > { %v3501_v54 = vpop.f32.mrf.mxu1  ;;  %v2939_v18 = vunpack.i.l.bf16 %v2938_v2  ;;  %v2940_v19 = vunpack.i.h.bf16 %v2938_v2  ;;  %v3600_v2 = vld [vmem:[%s3566_s23 + $0x8] sm:$0xff] }
 0x12f   : > { %701 = vperm.xlu2 %2969, %v3501_v54   ;;  %vm305_vm8 = vcmp.gt.f32.partialorder %v3600_v2, 0.0 }
 0x135   : > { %v2948_v62 = vpop.permute.xlu2 %2947 }
 0x136   : > { %v3504_v55 = vpop.f32.mrf.mxu1  ;;  %v2949_v13 = vunpack.i.l.bf16 %v2948_v62  ;;  %v2950_v14 = vunpack.i.h.bf16 %v2948_v62  ;;  %v3597_v62 = vld [vmem:[%s3566_s23 + $0x30] sm:$0xff] }
 0x137   : > { %705 = vperm.xlu2 %2969, %v3504_v55   ;;  %vm310_vm7 = vcmp.gt.f32.partialorder %v3597_v62, 0.0 }
 0x13e   : > { %v3509_v57 = vpop.f32.mrf.mxu1 }
 0x13f   : > { %709 = vperm.xlu2 %2969, %v3509_v57  }
 0x146   : > { %v3512_v59 = vpop.f32.mrf.mxu1 }
 0x147   : > { %713 = vperm.xlu2 %2969, %v3512_v59  }
 0x14e   : > { %v3515_v61 = vpop.f32.mrf.mxu1 }
 0x14f   : > { %717 = vperm.xlu2 %2969, %v3515_v61  }
 0x155   : > { %v2958_v0 = vpop.permute.xlu2 %2957 }
 0x156   : > { %v3518_v63 = vpop.f32.mrf.mxu1  ;;  %v2959_v7 = vunpack.i.l.bf16 %v2958_v0  ;;  %v2960_v9 = vunpack.i.h.bf16 %v2958_v0 }
 0x157   : > { %721 = vperm.xlu0 %2970, %v3518_v63  }
 0x15d   : > { %v2953_v8 = vpop.permute.xlu1 %2952 }
 0x15e   : > { %v3521_v1 = vpop.f32.mrf.mxu1  ;;  %v2954_v11 = vunpack.i.l.bf16 %v2953_v8  ;;  %v2955_v12 = vunpack.i.h.bf16 %v2953_v8 }
 0x15f   : > { %725 = vperm.xlu2 %2969, %v3521_v1   ;;  %2971 = vset.pattern.permute.xlu0 %v3312_v44 }
 0x165   : > { %v2963_v3 = vpop.permute.xlu2 %2962 }
 0x166   : > { %v540_v4 = vpop.f32.mrf.mxu1  ;;  %v2964_v5 = vunpack.i.l.bf16 %v2963_v3  ;;  %v2965_v6 = vunpack.i.h.bf16 %v2963_v3 }
 0x167   : > { %644 = vperm.xlu0 %2971, %v540_v4   ;;  %2977 = vset.pattern.permute.xlu2 %v3312_v44 }
 0x168   : > { %1326 = vmatpush.msrb.mxu3 %v2964_v5 }
 0x16a   : > { %1327 = vmatpush.msrb.mxu3 %v2965_v6 }
 0x16c   : > { %1328 = vmatpush.msrb.mxu3 %v2959_v7 }
 0x16d   : > { %v3551_v26 = vpop.permute.xlu2 %589 }
 0x16e   : > { %v543_v10 = vpop.f32.mrf.mxu1  ;;  %1329 = vmatpush.msrb.mxu3 %v2960_v9 }
 0x16f   : > { %2972 = vset.pattern.permute.xlu0 %v3311_v42 }
 0x170   : > { %729 = vperm.xlu0 %2972, %v540_v4   ;;  %1330 = vmatpush.msrb.mxu3 %v2954_v11 }
 0x172   : > { %1331 = vmatpush.msrb.mxu3 %v2955_v12 }
 0x174   : > { %1332 = vmatpush.msrb.mxu3 %v2949_v13  ;;  %v3619_v13 = vld [vmem:[%s3566_s23 + $0x40] sm:$0xff] }
 0x175   : > { %vm312_vm11 = vcmp.gt.f32.partialorder %v3619_v13, 0.0 }
 0x176   : > { %v546_v15 = vpop.f32.mrf.mxu1  ;;  %1333 = vmatpush.msrb.mxu3 %v2950_v14 }
 0x177   : > { %654 = vperm.xlu1 %2975, %v546_v15  }
 0x178   : > { %2973 = vset.pattern.permute.xlu0 %v3312_v44  ;;  %1334 = vmatpush.msrb.mxu3 %v2944_v16 }
 0x179   : > { %649 = vperm.xlu0 %2973, %v543_v10   ;;  %v694_v27 = vpop.permute.xlu2 %693 }
 0x17a   : > { %1335 = vmatpush.msrb.mxu3 %v2945_v17 }
 0x17c   : > { %1336 = vmatpush.msrb.mxu3 %v2939_v18 }
 0x17e   : > { %1337 = vmatpush.msrb.mxu3 %v2940_v19  ;;  %v3537_v24 = vpop.f32.mrf.mxu1 }
 0x17f   : > { %2976 = vset.pattern.permute.xlu1 %v3311_v42  ;;  %659 = vperm.xlu2 %2977, %v3537_v24  }
 0x180   : > { %737 = vperm.xlu1 %2976, %v546_v15   ;;  %1338 = vmatpush.msrb.mxu3 %v2934_v20 }
 0x181   : > { %2974 = vset.pattern.permute.xlu0 %v3311_v42  ;;  %v686_v28 = vpop.permute.xlu0 %685 }
 0x182   : > { %733 = vperm.xlu0 %2974, %v543_v10   ;;  %1339 = vmatpush.msrb.mxu3 %v2935_v21 }
 0x184   : > { %1340 = vmatpush.msrb.mxu3 %v2929_v22 }
 0x186   : > { %1341 = vmatpush.msrb.mxu3 %v2930_v23 }
 0x187   : > { %v3541_v25 = vpop.f32.mrf.mxu1 }
 0x188   : > { %664 = vperm.xlu2 %2977, %v3541_v25  }
 0x189   : > { %v702_v29 = vpop.permute.xlu2 %701  ;;  %v690_v30 = vpop.permute.xlu0 %689 }
 0x190   : > { %2978 = vset.pattern.permute.xlu2 %v3311_v42  ;;  %v3577_v42 = vld [vmem:[%s3566_s23] sm:$0xff] }
 0x191   : > { %v3554_v31 = vpop.permute.xlu2 %705  ;;  %vm4624_vm4 = vcmp.gt.f32.partialorder %v3577_v42, 0.0 }
 0x193   : > { %v3558_v33 = vpop.permute.xlu0 %594 }
 0x199   : > { %v710_v34 = vpop.permute.xlu2 %709 }
 0x19c   : > { %v698_v37 = vpop.permute.xlu0 %697 }
 0x1a1   : > { %v3573_v40 = vpop.permute.xlu2 %713 }
 0x1a9   : > { %v718_v3 = vpop.permute.xlu2 %717 }
 0x1b5   : > { %555 = vxpose.xlu1.b32.start [1/16] (narrow) %v3472_v50, 8 }
 0x1bd   : > { %556 = vxpose.xlu1.b32.cont [2/16] (narrow) %v3476_v51, 8 }
 0x1c5   : > { %557 = vxpose.xlu1.b32.cont [3/16] (narrow) %v3482_v52, 8 }
 0x1c9   : > { %v3588_v56 = vpop.permute.xlu0 %721 }
 0x1cd   : > { %558 = vxpose.xlu1.b32.cont [4/16] (narrow) %v3495_v53, 8 }
 0x1d5   : > { %559 = vxpose.xlu1.b32.cont [5/16] (narrow) %v3501_v54, 8 }
 0x1d9   : > { %v645_v9 = vpop.permute.xlu0 %644 }
 0x1dd   : > { %560 = vxpose.xlu1.b32.cont [6/16] (narrow) %v3504_v55, 8 }
 0x1e5   : > { %561 = vxpose.xlu1.b32.cont [7/16] (narrow) %v3509_v57, 8 }
 0x1e9   : > { %v3556_v32 = vpop.permute.xlu1 %654 }
 0x1ed   : > { %562 = vxpose.xlu1.b32.cont [8/16] (narrow) %v3512_v59, 8 }
 0x1f2   : > { %v3560_v35 = vpop.permute.xlu1 %737 }
 0x1f5   : > { %563 = vxpose.xlu1.b32.cont [9/16] (narrow) %v3515_v61, 8 }
 0x1fd   : > { %564 = vxpose.xlu1.b32.cont [10/16] (narrow) %v3518_v63, 8 }
 0x205   : > { %565 = vxpose.xlu1.b32.cont [11/16] (narrow) %v3521_v1, 8 }
 0x20d   : > { %566 = vxpose.xlu1.b32.cont [12/16] (narrow) %v540_v4, 8 }
 0x215   : > { %567 = vxpose.xlu1.b32.cont [13/16] (narrow) %v543_v10, 8 }
 0x21d   : > { %568 = vxpose.xlu1.b32.cont [14/16] (narrow) %v546_v15, 8  ;;  %v3622_v15 = vld [vmem:[%s3566_s23 + $0x10] sm:$0xff] }
 0x21e   : > { %vm4625_vm12 = vcmp.gt.f32.partialorder %v3622_v15, 0.0 }
 0x225   : > { %569 = vxpose.xlu1.b32.cont [15/16] (narrow) %v3537_v24, 8 }
 0x22d   : > { %570 = vxpose.xlu1.b32.end [16/16] (narrow) %v3541_v25, 8 }
 0x259   : > { %v571_v36 = vpop.trf.xlu1 }
 0x25a   : > { %v3568_v38 = vperm.slane %v571_v36, 3  ;;  %v3610_v10 = vperm.slane %v571_v36, 2 }
 0x25c   : > { %v752_v41 = vadd.f32 %v3568_v38, %v698_v37  ;;  %v749_v43 = vadd.f32 %v3568_v38, %v686_v28  ;;  %v755_v46 = vadd.f32 %v3568_v38, %v710_v34  ;;  %v750_v48 = vadd.f32 %v3568_v38, %v690_v30  ;;  %v3641_v28 = vpop.permute.xlu0 %729 }
 0x25d   : > { %v757_v5 = vadd.f32 %v3568_v38, %v718_v3  ;;  %v751_v7 = vadd.f32 %v3568_v38, %v694_v27  ;;  %v679_v17 = vadd.f32 %v3610_v10, %v645_v9  ;;  %v753_v19 = vadd.f32 %v3568_v38, %v702_v29  ;;  %v3639_v27 = vld [vmem:[%s3566_s23 + $0x58] sm:$0xff]  ;;  %v3644_v29 = vld [vmem:[%s3566_s23 + $0x20] sm:$0xff] }
 0x25e   : > { %vm784_vm2 = vcmp.gt.f32.partialorder %v752_v41, 0.0  ;;  %v816_v45 = vmul.f32 0.2, %v752_v41  ;;  %vm781_vm3 = vcmp.gt.f32.partialorder %v749_v43, 0.0  ;;  %v813_v47 = vmul.f32 0.2, %v749_v43 }
 0x25f   : > { %v819_v60 = vmul.f32 0.2, %v755_v46  ;;  %vm787_vm5 = vcmp.gt.f32.partialorder %v755_v46, 0.0  ;;  %v814_v0 = vmul.f32 0.2, %v750_v48  ;;  %vm782_vm6 = vcmp.gt.f32.partialorder %v750_v48, 0.0 }
 0x260   : > { %v848_v49 = vsel %vm784_vm2, %v752_v41, %v816_v45  ;;  %v845_v51 = vsel %vm781_vm3, %v749_v43, %v813_v47  ;;  %v821_v12 = vmul.f32 0.2, %v757_v5  ;;  %vm789_vm9 = vcmp.gt.f32.partialorder %v757_v5, 0.0  ;;  %v3666_v47 = vld [vmem:[%s3566_s23 + $0x38] sm:$0xff] }
 0x261   : > { %v3586_v50 = vsel %vm307_vm1, %v848_v49, -9e+15  ;;  %v3593_v58 = vsel %vm4624_vm4, %v845_v51, -9e+15  ;;  %v851_v4 = vsel %vm787_vm5, %v755_v46, %v819_v60  ;;  %v846_v6 = vsel %vm782_vm6, %v750_v48, %v814_v0  ;;  %v3663_v46 = vld [vmem:[%s3566_s23 + $0x68] sm:$0xff] }
 0x262   : > { %963 = vmax.xlane.f32.xlu2 %v3586_v50  ;;  %957 = vmax.xlane.f32.xlu0 %v3593_v58  ;;  %v3608_v8 = vsel %vm310_vm7, %v851_v4, -9e+15  ;;  %v3615_v11 = vsel %vm305_vm8, %v846_v6, -9e+15  ;;  %v815_v14 = vmul.f32 0.2, %v751_v7  ;;  %v853_v16 = vsel %vm789_vm9, %v757_v5, %v821_v12 }
 0x263   : > { %vm783_vm10 = vcmp.gt.f32.partialorder %v751_v7, 0.0  ;;  %v3630_v20 = vsel %vm312_vm11, %v853_v16, -9e+15  ;;  %v808_v22 = vmul.f32 0.2, %v679_v17  ;;  %vm776_vm13 = vcmp.gt.f32.partialorder %v679_v17, 0.0 }
 0x264   : > { %v847_v18 = vsel %vm783_vm10, %v751_v7, %v815_v14  ;;  %v817_v23 = vmul.f32 0.2, %v753_v19  ;;  %vm785_vm14 = vcmp.gt.f32.partialorder %v753_v19, 0.0  ;;  %vm4626_vm15 = vcmp.gt.f32.partialorder %v3639_v27, 0.0  ;;  %v3685_v5 = vld [vmem:[%s3566_s23 + $0x60] sm:$0xff]  ;;  %v3688_v7 = vld [vmem:[%s3566_s23 + $0x28] sm:$0xff] }
 0x265   : > { %v3635_v21 = vsel %vm4625_vm12, %v847_v18, -9e+15  ;;  %v840_v30 = vsel %vm776_vm13, %v679_v17, %v808_v22  ;;  %v681_v34 = vadd.f32 %v3610_v10, %v3556_v32  ;;  %vm308_vm2 = vcmp.gt.f32.partialorder %v3644_v29, 0.0 }
 0x266   : > { %v849_v36 = vsel %vm785_vm14, %v753_v19, %v817_v23  ;;  %v756_v37 = vadd.f32 %v3568_v38, %v3573_v40  ;;  %v3654_v41 = vsel %vm4626_vm15, %v840_v30, -9e+15  ;;  %v650_v40 = vpop.permute.xlu0 %649  ;;  %vm4629_vm6 = vcmp.gt.f32.partialorder %v3663_v46, 0.0 }
 0x267   : > { %v3658_v43 = vsel %vm308_vm2, %v849_v36, -9e+15  ;;  %v810_v45 = vmul.f32 0.2, %v681_v34  ;;  %vm778_vm3 = vcmp.gt.f32.partialorder %v681_v34, 0.0  ;;  %vm311_vm9 = vcmp.gt.f32.partialorder %v3666_v47, 0.0 }
 0x268   : > { %v820_v32 = vmul.f32 0.2, %v756_v37  ;;  %vm788_vm5 = vcmp.gt.f32.partialorder %v756_v37, 0.0  ;;  %v680_v51 = vadd.f32 %v3610_v10, %v650_v40  ;;  %v754_v0 = vadd.f32 %v3568_v38, %v3554_v31  ;;  %v3728_v36 = vld [vmem:[%s3566_s23 + $0x48] sm:$0xff] }
 0x269   : > { %v842_v48 = vsel %vm778_vm3, %v681_v34, %v810_v45  ;;  %vm316_vm14 = vcmp.gt.f32.partialorder %v3685_v5, 0.0  ;;  %vm309_vm3 = vcmp.gt.f32.partialorder %v3688_v7, 0.0  ;;  %v668_v12 = vadd.f32 %v3610_v10, %v3551_v26 }
 0x26a   : > { %969 = vmax.xlane.f32.xlu2 %v3608_v8  ;;  %959 = vmax.xlane.f32.xlu0 %v3615_v11  ;;  %v852_v49 = vsel %vm788_vm5, %v756_v37, %v820_v32  ;;  %v3674_v60 = vsel %vm4629_vm6, %v842_v48, -9e+15  ;;  %v809_v4 = vmul.f32 0.2, %v680_v51  ;;  %vm777_vm10 = vcmp.gt.f32.partialorder %v680_v51, 0.0 }
 0x26b   : > { %v3680_v3 = vsel %vm311_vm9, %v852_v49, -9e+15  ;;  %v818_v6 = vmul.f32 0.2, %v754_v0  ;;  %vm786_vm13 = vcmp.gt.f32.partialorder %v754_v0, 0.0  ;;  %vm765_vm5 = vcmp.gt.f32.partialorder %v668_v12, 0.0 }
 0x26c   : > { %v841_v9 = vsel %vm777_vm10, %v680_v51, %v809_v4  ;;  %v797_v17 = vmul.f32 0.2, %v668_v12  ;;  %v669_v19 = vadd.f32 %v3610_v10, %v3558_v33  ;;  %v758_v33 = vadd.f32 %v3568_v38, %v3588_v56  ;;  %v3741_v49 = vld [vmem:[%s3566_s23 + $0x70] sm:$0xff] }
 0x26d   : > { %v850_v31 = vsel %vm786_vm13, %v754_v0, %v818_v6  ;;  %v3696_v14 = vsel %vm316_vm14, %v841_v9, -9e+15 }
 0x26e   : > { %v3701_v16 = vsel %vm309_vm3, %v850_v31, -9e+15  ;;  %v829_v18 = vsel %vm765_vm5, %v668_v12, %v797_v17  ;;  %v798_v22 = vmul.f32 0.2, %v669_v19  ;;  %vm766_vm10 = vcmp.gt.f32.partialorder %v669_v19, 0.0  ;;  %v3736_v56 = vpop.permute.xlu0 %733 }
 0x26f   : > { %v3708_v26 = vsel %vm4624_vm4, %v829_v18, -9e+15  ;;  %v822_v34 = vmul.f32 0.2, %v758_v33  ;;  %vm790_vm13 = vcmp.gt.f32.partialorder %v758_v33, 0.0  ;;  %vm313_vm5 = vcmp.gt.f32.partialorder %v3728_v36, 0.0 }
 0x270   : > { %v830_v23 = vsel %vm766_vm10, %v669_v19, %v798_v22 }
 0x271   : > { %v3714_v30 = vsel %vm305_vm8, %v830_v23, -9e+15 }
 0x272   : > { %973 = vmax.xlane.f32.xlu2 %v3630_v20  ;;  %961 = vmax.xlane.f32.xlu0 %v3635_v21 }
 0x27a   : > { %947 = vmax.xlane.f32.xlu2 %v3654_v41  ;;  %965 = vmax.xlane.f32.xlu0 %v3658_v43 }
 0x280   : > { %2980 = vset.pattern.permute.xlu1 %v3312_v44 }
 0x282   : > { %951 = vmax.xlane.f32.xlu2 %v3674_v60  ;;  %971 = vmax.xlane.f32.xlu0 %v3680_v3 }
 0x28a   : > { %949 = vmax.xlane.f32.xlu0 %v3696_v14 }
 0x28d   : > { %967 = vmax.xlane.f32.xlu1 %v3701_v16 }
 0x295   : > { %925 = vmax.xlane.f32.xlu1 %v3708_v26 }
 0x29a   : > { %741 = vperm.xlu2 %2978, %v3537_v24   ;;  %v3725_v24 = vpop.permute.xlu2 %725 }
 0x29d   : > { %927 = vmax.xlane.f32.xlu1 %v3714_v30 }
 0x29e   : > { %745 = vperm.xlu0 %2974, %v3541_v25   ;;  %v854_v25 = vsel %vm790_vm13, %v758_v33, %v822_v34  ;;  %vm4628_vm13 = vcmp.gt.f32.partialorder %v3741_v49, 0.0 }
 0x2a2   : > { %2981 = vset.pattern.permute.xlu2 %v3312_v44 }
 0x2a6   : > { %2979 = vset.pattern.permute.xlu0 %v3312_v44  ;;  %v3733_v44 = vsel %vm313_vm5, %v854_v25, -9e+15 }
 0x2a7   : > { %599 = vperm.xlu0 %2979, %v3482_v52   ;;  %v660_v52 = vpop.permute.xlu2 %659 }
 0x2a8   : > { %v682_v45 = vadd.f32 %v3610_v10, %v660_v52 }
 0x2aa   : > { %v811_v48 = vmul.f32 0.2, %v682_v45  ;;  %vm779_vm10 = vcmp.gt.f32.partialorder %v682_v45, 0.0 }
 0x2ac   : > { %v843_v9 = vsel %vm779_vm10, %v682_v45, %v811_v48 }
 0x2ad   : > { %v3753_v18 = vsel %vm4628_vm13, %v843_v9, -9e+15 }
 0x2af   : > { %604 = vperm.xlu0 %2979, %v3495_v53   ;;  %v665_v53 = vpop.permute.xlu2 %664 }
 0x2b0   : > { %v683_v4 = vadd.f32 %v3610_v10, %v665_v53 }
 0x2b2   : > { %v812_v19 = vmul.f32 0.2, %v683_v4  ;;  %vm780_vm4 = vcmp.gt.f32.partialorder %v683_v4, 0.0 }
 0x2b4   : > { %v844_v23 = vsel %vm780_vm4, %v683_v4, %v812_v19 }
 0x2b7   : > { %614 = vperm.xlu0 %2979, %v3504_v55  }
 0x2c3   : > { %975 = vmax.xlane.f32.xlu2 %v3733_v44 }
 0x2d5   : > { %v964_v55 = vpop.xlane.xlu2 %963  ;;  %v958_v37 = vpop.xlane.xlu0 %957 }
 0x2d6   : > { %v1005_v32 = vsub.f32 %v3593_v58, %v958_v37  ;;  %v1008_v51 = vsub.f32 %v3586_v50, %v964_v55  ;;  %v3758_v50 = vld [vmem:[%s3566_s23 + $0x78] sm:$0xff] }
 0x2d7   : > { %vm4627_vm10 = vcmp.gt.f32.partialorder %v3758_v50, 0.0 }
 0x2d8   : > { %v1053_v40 = vmul.f32 1.442695, %v1005_v32  ;;  %v1059_v58 = vmul.f32 1.442695, %v1008_v51  ;;  %v908_v52 = vsel %vm4627_vm10, %v844_v23, -9e+15 }
 0x2da   : > { %2982 = vpow2.f32 %v1053_v40 }
 0x2dd   : > { %v3744_v0 = vpop.xlane.xlu2 %969  ;;  %v960_v6 = vpop.xlane.xlu0 %959 }
 0x2de   : > { %v1006_v31 = vsub.f32 %v3615_v11, %v960_v6 }
 0x2e0   : > { %v3749_v12 = vpop.eup %2982  ;;  %v1055_v17 = vmul.f32 1.442695, %v1006_v31 }
 0x2e1   : > { %953 = vmax.xlane.f32.xlu0 %v3753_v18  ;;  %1117 = vadd.xlane.f32.xlu1 %v3749_v12 }
 0x2e2   : > { %2984 = vpow2.f32 %v1055_v17 }
 0x2e3   : > { %2986 = vpow2.f32 %v1059_v58 }
 0x2e5   : > { %v3760_v22 = vpop.xlane.xlu2 %973  ;;  %v962_v11 = vpop.xlane.xlu0 %961 }
 0x2e6   : > { %v1007_v33 = vsub.f32 %v3635_v21, %v962_v11 }
 0x2e8   : > { %v3764_v34 = vpop.eup %2984  ;;  %v1057_v25 = vmul.f32 1.442695, %v1007_v33 }
 0x2e9   : > { %v3768_v53 = vpop.eup %2986  ;;  %955 = vmax.xlane.f32.xlu0 %v908_v52  ;;  %1119 = vadd.xlane.f32.xlu2 %v3764_v34 }
 0x2ea   : > { %2988 = vpow2.f32 %v1057_v25  ;;  %1123 = vadd.xlane.f32.xlu1 %v3768_v53 }
 0x2ed   : > { %v948_v55 = vpop.xlane.xlu2 %947  ;;  %v966_v37 = vpop.xlane.xlu0 %965 }
 0x2ee   : > { %v1000_v45 = vsub.f32 %v3654_v41, %v948_v55  ;;  %v1009_v9 = vsub.f32 %v3658_v43, %v966_v37 }
 0x2f0   : > { %v1043_v32 = vmul.f32 1.442695, %v1000_v45  ;;  %v3773_v21 = vpop.eup %2988  ;;  %v1061_v31 = vmul.f32 1.442695, %v1009_v9  ;;  %v760_v9 = vadd.f32 %v3568_v38, %v3641_v28 }
 0x2f1   : > { %1121 = vadd.xlane.f32.xlu0 %v3773_v21 }
 0x2f2   : > { %2990 = vpow2.f32 %v1043_v32 }
 0x2f5   : > { %v972_v40 = vpop.xlane.xlu0 %971  ;;  %v952_v19 = vpop.xlane.xlu2 %951 }
 0x2f8   : > { %v3776_v48 = vpop.eup %2990 }
 0x2f9   : > { %1107 = vadd.xlane.f32.xlu0 %v3776_v48 }
 0x2fd   : > { %v950_v51 = vpop.xlane.xlu0 %949 }
 0x2fe   : > { %v1001_v4 = vsub.f32 %v3696_v14, %v950_v51  ;;  %v1002_v14 = vsub.f32 %v3674_v60, %v952_v19 }
 0x300   : > { %v1045_v6 = vmul.f32 1.442695, %v1001_v4  ;;  %v1047_v33 = vmul.f32 1.442695, %v1002_v14  ;;  %v968_v45 = vpop.xlane.xlu1 %967 }
 0x302   : > { %2992 = vpow2.f32 %v1045_v6 }
 0x303   : > { %2994 = vpow2.f32 %v1061_v31 }
 0x304   : > { %2996 = vpow2.f32 %v1047_v33 }
 0x308   : > { %v3781_v41 = vpop.eup %2992  ;;  %v3806_v6 = vpop.xlane.xlu1 %925 }
 0x309   : > { %1109 = vadd.xlane.f32.xlu1 %v3781_v41  ;;  %v3785_v58 = vpop.eup %2994 }
 0x30d   : > { %619 = vperm.xlu0 %2979, %v3509_v57   ;;  %v3797_v57 = vpop.eup %2996 }
 0x310   : > { %v3787_v17 = vpop.permute.xlu0 %745  ;;  %v3815_v28 = vpop.xlane.xlu1 %927 }
 0x311   : > { %1125 = vadd.xlane.f32.xlu1 %v3785_v58 }
 0x319   : > { %v600_v11 = vpop.permute.xlu0 %599 }
 0x31a   : > { %v670_v43 = vadd.f32 %v3610_v10, %v600_v11 }
 0x31c   : > { %vm767_vm4 = vcmp.gt.f32.partialorder %v670_v43, 0.0  ;;  %v799_v23 = vmul.f32 0.2, %v670_v43 }
 0x31e   : > { %v831_v25 = vsel %vm767_vm4, %v670_v43, %v799_v23  ;;  %vm792_vm4 = vcmp.gt.f32.partialorder %v760_v9, 0.0 }
 0x31f   : > { %v3794_v55 = vsel %vm4625_vm12, %v831_v25, -9e+15  ;;  %v742_v25 = vpop.permute.xlu2 %741 }
 0x320   : > { %929 = vmax.xlane.f32.xlu2 %v3794_v55 }
 0x321   : > { %v605_v60 = vpop.permute.xlu0 %604 }
 0x328   : > { %1111 = vadd.xlane.f32.xlu2 %v3797_v57 }
 0x329   : > { %v3803_v37 = vpop.permute.xlu0 %614 }
 0x32a   : > { %609 = vperm.xlu1 %2980, %v3501_v54   ;;  %v671_v54 = vadd.f32 %v3610_v10, %v605_v60 }
 0x32c   : > { %v800_v43 = vmul.f32 0.2, %v671_v54  ;;  %vm768_vm12 = vcmp.gt.f32.partialorder %v671_v54, 0.0 }
 0x332   : > { %624 = vperm.xlu1 %2980, %v3512_v59   ;;  %v824_v59 = vmul.f32 0.2, %v760_v9 }
 0x33a   : > { %634 = vperm.xlu1 %2980, %v3518_v63   ;;  %v1012_v63 = vsub.f32 %v3680_v3, %v972_v40  ;;  %v759_v40 = vadd.f32 %v3568_v38, %v3725_v24 }
 0x33c   : > { %v1067_v23 = vmul.f32 1.442695, %v1012_v63 }
 0x354   : > { %v954_v32 = vpop.xlane.xlu0 %953  ;;  %v3839_v24 = vpop.xlane.xlu1 %1117 }
 0x355   : > { %v1003_v51 = vsub.f32 %v3753_v18, %v954_v32  ;;  %v856_v18 = vsel %vm792_vm4, %v760_v9, %v824_v59  ;;  %v1010_v9 = vsub.f32 %v3701_v16, %v968_v45 }
 0x356   : > { %v3819_v33 = vsel %vm4626_vm15, %v856_v18, -9e+15 }
 0x357   : > { %v1049_v4 = vmul.f32 1.442695, %v1003_v51  ;;  %v763_v51 = vadd.f32 %v3568_v38, %v742_v25  ;;  %v1063_v18 = vmul.f32 1.442695, %v1010_v9  ;;  %v764_v25 = vadd.f32 %v3568_v38, %v3787_v17 }
 0x359   : > { %2998 = vpow2.f32 %v1049_v4  ;;  %v823_v4 = vmul.f32 0.2, %v759_v40  ;;  %v827_v59 = vmul.f32 0.2, %v763_v51  ;;  %vm795_vm15 = vcmp.gt.f32.partialorder %v763_v51, 0.0 }
 0x35b   : > { %v859_v45 = vsel %vm795_vm15, %v763_v51, %v827_v59  ;;  %v976_v51 = vpop.xlane.xlu2 %975  ;;  %v828_v59 = vmul.f32 0.2, %v764_v25  ;;  %vm796_vm15 = vcmp.gt.f32.partialorder %v764_v25, 0.0 }
 0x35c   : > { %v956_v31 = vpop.xlane.xlu0 %955 }
 0x35d   : > { %v1004_v19 = vsub.f32 %v908_v52, %v956_v31  ;;  %v832_v52 = vsel %vm768_vm12, %v671_v54, %v800_v43  ;;  %v3837_v54 = vld [vmem:[%s3566_s23 + $0x50] sm:$0xff]  ;;  %vm791_vm12 = vcmp.gt.f32.partialorder %v759_v40, 0.0 }
 0x35e   : > { %v3830_v32 = vsel %vm307_vm1, %v832_v52, -9e+15  ;;  %vm314_vm4 = vcmp.gt.f32.partialorder %v3837_v54, 0.0  ;;  %v3854_v52 = vsel %vm4628_vm13, %v859_v45, -9e+15 }
 0x35f   : > { %v3812_v14 = vpop.eup %2998  ;;  %v1051_v11 = vmul.f32 1.442695, %v1004_v19  ;;  %v855_v19 = vsel %vm791_vm12, %v759_v40, %v823_v4  ;;  %v3856_v40 = vpop.xlane.xlu1 %1123 }
 0x360   : > { %1113 = vadd.xlane.f32.xlu2 %v3812_v14  ;;  %v3849_v16 = vsel %vm314_vm4, %v855_v19, -9e+15 }
 0x361   : > { %3000 = vpow2.f32 %v1051_v11  ;;  %v1013_v11 = vsub.f32 %v3630_v20, %v3760_v22 }
 0x362   : > { %3002 = vpow2.f32 %v1067_v23 }
 0x363   : > { %v1069_v43 = vmul.f32 1.442695, %v1013_v11  ;;  %v3879_v45 = vpop.xlane.xlu2 %1119 }
 0x364   : > { %v3821_v3 = vpop.xlane.xlu0 %1121  ;;  %979 = vmax.xlane.f32.xlu1 %v3819_v33 }
 0x367   : > { %v3826_v60 = vpop.eup %3000 }
 0x368   : > { %1115 = vadd.xlane.f32.xlu0 %v3826_v60  ;;  %931 = vmax.xlane.f32.xlu2 %v3830_v32  ;;  %v3841_v31 = vpop.eup %3002 }
 0x36c   : > { %v1108_v63 = vpop.xlane.xlu0 %1107  ;;  %1131 = vadd.xlane.f32.xlu1 %v3841_v31 }
 0x36d   : > { %3004 = vrcp.f32 %v1108_v63  ;;  %v1014_v63 = vsub.f32 %v3733_v44, %v976_v51 }
 0x36e   : > { %3006 = vpow2.f32 %v1063_v18 }
 0x36f   : > { %3008 = vpow2.f32 %v1069_v43  ;;  %v1071_v19 = vmul.f32 1.442695, %v1014_v63 }
 0x370   : > { %977 = vmax.xlane.f32.xlu0 %v3849_v16 }
 0x373   : > { %v3005_v23 = vpop.eup %3004 }
 0x374   : > { %985 = vmax.xlane.f32.xlu1 %v3854_v52  ;;  %v1192_v20 = vmul.f32 %v3005_v23, %v3776_v48  ;;  %v3860_v22 = vpop.eup %3006  ;;  %v860_v48 = vsel %vm796_vm15, %v764_v25, %v828_v59 }
 0x375   : > { %v3865_v4 = vpop.eup %3008  ;;  %v3872_v17 = vsel %vm4627_vm10, %v860_v48, -9e+15 }
 0x376   : > { %1262 = vmatmul.f32.vlgmr.msra.gmra.mxu3 %v1192_v20 }
 0x378   : > { %1127 = vadd.xlane.f32.xlu0 %v3860_v22 }
 0x37c   : > { %1133 = vadd.xlane.f32.xlu1 %v3865_v4  ;;  %v1110_v9 = vpop.xlane.xlu1 %1109 }
 0x37d   : > { %3010 = vrcp.f32 %v1110_v9 }
 0x37e   : > { %3012 = vpow2.f32 %v1071_v19  ;;  %v1011_v19 = vsub.f32 %v3608_v8, %v3744_v0  ;;  %v673_v0 = vadd.f32 %v3610_v10, %v3803_v37 }
 0x380   : > { %629 = vperm.xlu2 %2981, %v3515_v61  }
 0x383   : > { %v3011_v11 = vpop.eup %3010 }
 0x384   : > { %987 = vmax.xlane.f32.xlu1 %v3872_v17  ;;  %v1193_v18 = vmul.f32 %v3011_v11, %v3781_v41  ;;  %v3877_v44 = vpop.eup %3012  ;;  %v3882_v43 = vpop.xlane.xlu1 %1125  ;;  %v761_v41 = vadd.f32 %v3568_v38, %v3736_v56  ;;  %v762_v11 = vadd.f32 %v3568_v38, %v3560_v35 }
 0x386   : > { %1265 = vmatmul.f32.gmra.mxu3 %v1193_v18  ;;  %v825_v48 = vmul.f32 0.2, %v761_v41  ;;  %vm793_vm15 = vcmp.gt.f32.partialorder %v761_v41, 0.0  ;;  %v1065_v18 = vmul.f32 1.442695, %v1011_v19 }
 0x388   : > { %639 = vperm.xlu2 %2981, %v3521_v1   ;;  %v857_v56 = vsel %vm793_vm15, %v761_v41, %v825_v48  ;;  %vm770_vm15 = vcmp.gt.f32.partialorder %v673_v0, 0.0 }
 0x38c   : > { %1135 = vadd.xlane.f32.xlu1 %v3877_v44 }
 0x393   : > { %v930_v61 = vpop.xlane.xlu2 %929 }
 0x39b   : > { %v1112_v23 = vpop.xlane.xlu2 %1111 }
 0x39c   : > { %3014 = vrcp.f32 %v1112_v23  ;;  %v610_v20 = vpop.permute.xlu1 %609  ;;  %v826_v23 = vmul.f32 0.2, %v762_v11 }
 0x39d   : > { %v672_v25 = vadd.f32 %v3610_v10, %v610_v20  ;;  %v991_v20 = vsub.f32 %v3794_v55, %v930_v61  ;;  %3016 = vpow2.f32 %v1065_v18  ;;  %v802_v55 = vmul.f32 0.2, %v673_v0  ;;  %v620_v61 = vpop.permute.xlu0 %619 }
 0x39f   : > { %v801_v51 = vmul.f32 0.2, %v672_v25  ;;  %vm769_vm12 = vcmp.gt.f32.partialorder %v672_v25, 0.0  ;;  %v1025_v8 = vmul.f32 1.442695, %v991_v20  ;;  %v834_v41 = vsel %vm770_vm15, %v673_v0, %v802_v55 }
 0x3a0   : > { %v3919_v37 = vsel %vm309_vm3, %v834_v41, -9e+15  ;;  %v990_v20 = vsub.f32 %v3714_v30, %v3815_v28 }
 0x3a1   : > { %v833_v1 = vsel %vm769_vm12, %v672_v25, %v801_v51  ;;  %v3900_v25 = vsel %vm316_vm14, %v857_v56, -9e+15  ;;  %vm794_vm12 = vcmp.gt.f32.partialorder %v762_v11, 0.0  ;;  %3018 = vpow2.f32 %v1025_v8 }
 0x3a2   : > { %v3015_v9 = vpop.eup %3014  ;;  %v3889_v59 = vsel %vm308_vm2, %v833_v1, -9e+15  ;;  %v674_v51 = vadd.f32 %v3610_v10, %v620_v61 }
 0x3a3   : > { %933 = vmax.xlane.f32.xlu0 %v3889_v59  ;;  %v1194_v63 = vmul.f32 %v3015_v9, %v3797_v57  ;;  %v858_v57 = vsel %vm794_vm12, %v762_v11, %v826_v23  ;;  %v3910_v38 = vpop.eup %3016 }
 0x3a4   : > { %v3907_v35 = vsel %vm4629_vm6, %v858_v57, -9e+15  ;;  %v803_v9 = vmul.f32 0.2, %v674_v51  ;;  %vm771_vm12 = vcmp.gt.f32.partialorder %v674_v51, 0.0  ;;  %v625_v56 = vpop.permute.xlu1 %624 }
 0x3a5   : > { %1268 = vmatmul.f32.gmra.mxu3 %v1194_v63  ;;  %v989_v63 = vsub.f32 %v3708_v26, %v3806_v6  ;;  %v675_v18 = vadd.f32 %v3610_v10, %v625_v56  ;;  %v1023_v26 = vmul.f32 1.442695, %v990_v20 }
 0x3a6   : > { %v835_v48 = vsel %vm771_vm12, %v674_v51, %v803_v9 }
 0x3a7   : > { %v3914_v1 = vpop.eup %3018  ;;  %v1021_v19 = vmul.f32 1.442695, %v989_v63  ;;  %v3926_v11 = vsel %vm310_vm7, %v835_v48, -9e+15  ;;  %v804_v57 = vmul.f32 0.2, %v675_v18 }
 0x3a8   : > { %vm772_vm15 = vcmp.gt.f32.partialorder %v675_v18, 0.0 }
 0x3a9   : > { %3020 = vpow2.f32 %v1021_v19  ;;  %v836_v6 = vsel %vm772_vm15, %v675_v18, %v804_v57 }
 0x3aa   : > { %v3937_v8 = vsel %vm311_vm9, %v836_v6, -9e+15  ;;  %3022 = vpow2.f32 %v1023_v26 }
 0x3ab   : > { %981 = vmax.xlane.f32.xlu0 %v3900_v25 }
 0x3ac   : > { %v635_v9 = vpop.permute.xlu1 %634 }
 0x3af   : > { %v3930_v23 = vpop.eup %3020 }
 0x3b0   : > { %v3940_v55 = vpop.eup %3022 }
 0x3b1   : > { %983 = vmax.xlane.f32.xlu2 %v3907_v35 }
 0x3b3   : > { %1129 = vadd.xlane.f32.xlu0 %v3910_v38 }
 0x3b9   : > { %1089 = vadd.xlane.f32.xlu2 %v3914_v1 }
 0x3bb   : > { %935 = vmax.xlane.f32.xlu0 %v3919_v37 }
 0x3c3   : > { %937 = vmax.xlane.f32.xlu0 %v3926_v11 }
 0x3cb   : > { %1085 = vadd.xlane.f32.xlu0 %v3930_v23 }
 0x3d3   : > { %v1114_v0 = vpop.xlane.xlu2 %1113  ;;  %939 = vmax.xlane.f32.xlu0 %v3937_v8 }
 0x3d4   : > { %3024 = vrcp.f32 %v1114_v0 }
 0x3d7   : > { %v980_v26 = vpop.xlane.xlu1 %979 }
 0x3da   : > { %v3025_v61 = vpop.eup %3024 }
 0x3db   : > { %v1116_v51 = vpop.xlane.xlu0 %1115  ;;  %v932_v30 = vpop.xlane.xlu2 %931  ;;  %1087 = vadd.xlane.f32.xlu0 %v3940_v55  ;;  %v1195_v28 = vmul.f32 %v3025_v61, %v3812_v14 }
 0x3dc   : > { %v992_v41 = vsub.f32 %v3830_v32, %v932_v30  ;;  %3026 = vrcp.f32 %v1116_v51  ;;  %v677_v32 = vadd.f32 %v3610_v10, %v635_v9 }
 0x3dd   : > { %1271 = vmatmul.f32.gmra.mxu3 %v1195_v28 }
 0x3de   : > { %v1027_v63 = vmul.f32 1.442695, %v992_v41  ;;  %vm774_vm15 = vcmp.gt.f32.partialorder %v677_v32, 0.0 }
 0x3e0   : > { %3028 = vpow2.f32 %v1027_v63 }
 0x3e1   : > { %3030 = vrcp.f32 %v3839_v24  ;;  %v1016_v24 = vsub.f32 %v3819_v33, %v980_v26 }
 0x3e2   : > { %v3027_v48 = vpop.eup %3026 }
 0x3e3   : > { %v978_v19 = vpop.xlane.xlu0 %977  ;;  %v630_v56 = vpop.permute.xlu2 %629  ;;  %v1196_v57 = vmul.f32 %v3027_v48, %v3826_v60  ;;  %v806_v60 = vmul.f32 0.2, %v677_v32  ;;  %v1075_v28 = vmul.f32 1.442695, %v1016_v24 }
 0x3e4   : > { %v1015_v18 = vsub.f32 %v3849_v16, %v978_v19  ;;  %v676_v20 = vadd.f32 %v3610_v10, %v630_v56  ;;  %v1132_v24 = vpop.xlane.xlu1 %1131 }
 0x3e5   : > { %1274 = vmatmul.f32.gmra.mxu3 %v1196_v57  ;;  %v838_v63 = vsel %vm774_vm15, %v677_v32, %v806_v60  ;;  %vm1455_vm15 = vcmask 130048  }
 0x3e6   : > { %v3949_v14 = vpop.eup %3028  ;;  %v1073_v6 = vmul.f32 1.442695, %v1015_v18  ;;  %v805_v0 = vmul.f32 0.2, %v676_v20  ;;  %vm773_vm12 = vcmp.gt.f32.partialorder %v676_v20, 0.0 }
 0x3e7   : > { %1091 = vadd.xlane.f32.xlu2 %v3949_v14  ;;  %v3031_v16 = vpop.eup %3030  ;;  %v3967_v19 = vsel %vm313_vm5, %v838_v63, -9e+15 }
 0x3e8   : > { %3032 = vpow2.f32 %v1073_v6  ;;  %v837_v61 = vsel %vm773_vm12, %v676_v20, %v805_v0  ;;  %v1197_v41 = vmul.f32 %v3031_v16, %v3749_v12 }
 0x3e9   : > { %v3956_v51 = vsel %vm312_vm11, %v837_v61, -9e+15  ;;  %3034 = vrcp.f32 %v3879_v45 }
 0x3ea   : > { %941 = vmax.xlane.f32.xlu0 %v3956_v51  ;;  %3036 = vpow2.f32 %v1075_v28 }
 0x3eb   : > { %v640_v30 = vpop.permute.xlu2 %639  ;;  %3038 = vrcp.f32 %v3821_v3  ;;  %v1128_v26 = vpop.xlane.xlu0 %1127 }
 0x3ec   : > { %v678_v33 = vadd.f32 %v3610_v10, %v640_v30  ;;  %3040 = vrcp.f32 %v3856_v40 }
 0x3ed   : > { %1342 = vmatmul.f32.vlgmr.msrb.gmra.mxu3 %v1197_v41  ;;  %3042 = vrcp.f32 %v3882_v43  ;;  %v986_v43 = vpop.xlane.xlu1 %985 }
 0x3ee   : > { %v3961_v9 = vpop.eup %3032  ;;  %v807_v45 = vmul.f32 0.2, %v678_v33  ;;  %vm775_vm12 = vcmp.gt.f32.partialorder %v678_v33, 0.0  ;;  %3044 = vrcp.f32 %v1128_v26 }
 0x3ef   : > { %1137 = vadd.xlane.f32.xlu1 %v3961_v9  ;;  %v3035_v48 = vpop.eup %3034 }
 0x3f0   : > { %v1198_v12 = vmul.f32 %v3035_v48, %v3764_v34  ;;  %v3972_v56 = vpop.eup %3036  ;;  %v839_v10 = vsel %vm775_vm12, %v678_v33, %v807_v45 }
 0x3f1   : > { %v3039_v18 = vpop.eup %3038  ;;  %v3977_v20 = vsel %vm314_vm4, %v839_v10, -9e+15 }
 0x3f2   : > { %943 = vmax.xlane.f32.xlu0 %v3967_v19  ;;  %v1199_v3 = vmul.f32 %v3039_v18, %v3773_v21  ;;  %v3041_v57 = vpop.eup %3040 }
 0x3f3   : > { %v1200_v34 = vmul.f32 %v3041_v57, %v3768_v53  ;;  %v3043_v32 = vpop.eup %3042 }
 0x3f4   : > { %v1201_v6 = vmul.f32 %v3043_v32, %v3785_v58  ;;  %v3045_v0 = vpop.eup %3044 }
 0x3f5   : > { %1345 = vmatmul.f32.gmra.mxu3 %v1198_v12  ;;  %v1202_v61 = vmul.f32 %v3045_v0, %v3860_v22  ;;  %v1134_v22 = vpop.xlane.xlu1 %1133 }
 0x3f7   : > { %1139 = vadd.xlane.f32.xlu1 %v3972_v56 }
 0x3fa   : > { %945 = vmax.xlane.f32.xlu0 %v3977_v20 }
 0x3fd   : > { %1348 = vmatmul.f32.gmra.mxu3 %v1199_v3  ;;  %v988_v18 = vpop.xlane.xlu1 %987  ;;  %v1019_v3 = vsub.f32 %v3854_v52, %v986_v43 }
 0x3fe   : > { %v1020_v52 = vsub.f32 %v3872_v17, %v988_v18 }
 0x405   : > { %1351 = vmatmul.f32.gmra.mxu3 %v1200_v34  ;;  %v1081_v34 = vmul.f32 1.442695, %v1019_v3  ;;  %v1136_v0 = vpop.xlane.xlu1 %1135 }
 0x40d   : > { %1354 = vmatmul.f32.gmra.mxu3 %v1201_v6 }
 0x415   : > { %1357 = vmatmul.f32.gmra.mxu3 %v1202_v61 }
 0x416   : > { %v934_v40 = vpop.xlane.xlu0 %933 }
 0x417   : > { %v993_v21 = vsub.f32 %v3889_v59, %v934_v40 }
 0x419   : > { %v1029_v16 = vmul.f32 1.442695, %v993_v21  ;;  %v1083_v21 = vmul.f32 1.442695, %v1020_v52 }
 0x41b   : > { %3046 = vpow2.f32 %v1029_v16 }
 0x41e   : > { %v982_v60 = vpop.xlane.xlu0 %981 }
 0x41f   : > { %v1017_v53 = vsub.f32 %v3900_v25, %v982_v60 }
 0x421   : > { %v3988_v30 = vpop.eup %3046  ;;  %v1077_v28 = vmul.f32 1.442695, %v1017_v53 }
 0x422   : > { %1093 = vadd.xlane.f32.xlu2 %v3988_v30 }
 0x423   : > { %3048 = vpow2.f32 %v1077_v28  ;;  %v4017_v28 = vpop.f32.mrf.mxu3 }
 0x424   : > { %v984_v58 = vpop.xlane.xlu2 %983 }
 0x425   : > { %v1018_v41 = vsub.f32 %v3907_v35, %v984_v58 }
 0x426   : > { %v1130_v33 = vpop.xlane.xlu0 %1129 }
 0x427   : > { %v1079_v63 = vmul.f32 1.442695, %v1018_v41  ;;  %3050 = vrcp.f32 %v1130_v33 }
 0x429   : > { %v3992_v59 = vpop.eup %3048  ;;  %3052 = vpow2.f32 %v1079_v63 }
 0x42a   : > { %1141 = vadd.xlane.f32.xlu1 %v3992_v59  ;;  %3054 = vrcp.f32 %v1132_v24 }
 0x42b   : > { %v4022_v33 = vpop.f32.mrf.mxu3 }
 0x42d   : > { %v3051_v48 = vpop.eup %3050 }
 0x42e   : > { %v936_v25 = vpop.xlane.xlu0 %935  ;;  %v1203_v45 = vmul.f32 %v3051_v48, %v3910_v38 }
 0x42f   : > { %v3996_v12 = vpop.eup %3052  ;;  %v994_v10 = vsub.f32 %v3919_v37, %v936_v25 }
 0x430   : > { %1143 = vadd.xlane.f32.xlu2 %v3996_v12  ;;  %1360 = vmatmul.f32.gmra.mxu3 %v1203_v45  ;;  %v3055_v57 = vpop.eup %3054 }
 0x431   : > { %v1031_v35 = vmul.f32 1.442695, %v994_v10  ;;  %v1204_v32 = vmul.f32 %v3055_v57, %v3841_v31 }
 0x433   : > { %3056 = vpow2.f32 %v1031_v35  ;;  %v4028_v48 = vpop.f32.mrf.mxu3 }
 0x434   : > { %3058 = vrcp.f32 %v1134_v22 }
 0x435   : > { %3060 = vpow2.f32 %v1081_v34 }
 0x436   : > { %v938_v26 = vpop.xlane.xlu0 %937 }
 0x437   : > { %v995_v38 = vsub.f32 %v3926_v11, %v938_v26 }
 0x438   : > { %1363 = vmatmul.f32.gmra.mxu3 %v1204_v32 }
 0x439   : > { %v4003_v6 = vpop.eup %3056  ;;  %v1033_v37 = vmul.f32 1.442695, %v995_v38 }
 0x43a   : > { %1095 = vadd.xlane.f32.xlu0 %v4003_v6  ;;  %v3059_v24 = vpop.eup %3058 }
 0x43b   : > { %3062 = vpow2.f32 %v1033_v37  ;;  %v1205_v40 = vmul.f32 %v3059_v24, %v3865_v4  ;;  %v4008_v31 = vpop.eup %3060 }
 0x43c   : > { %3064 = vrcp.f32 %v1136_v0 }
 0x43e   : > { %v1086_v61 = vpop.xlane.xlu0 %1085 }
 0x43f   : > { %3066 = vrcp.f32 %v1086_v61 }
 0x440   : > { %1366 = vmatmul.f32.gmra.mxu3 %v1205_v40  ;;  %3068 = vpow2.f32 %v1083_v21 }
 0x441   : > { %v4010_v11 = vpop.eup %3062 }
 0x442   : > { %1097 = vadd.xlane.f32.xlu1 %v4010_v11  ;;  %1145 = vadd.xlane.f32.xlu0 %v4008_v31  ;;  %v3065_v16 = vpop.eup %3064 }
 0x443   : > { %v1206_v53 = vmul.f32 %v3065_v16, %v3877_v44 }
 0x445   : > { %v3067_v43 = vpop.eup %3066 }
 0x446   : > { %v940_v17 = vpop.xlane.xlu0 %939  ;;  %v1181_v60 = vmul.f32 %v3067_v43, %v3930_v23  ;;  %v4019_v58 = vpop.eup %3068 }
 0x447   : > { %v996_v4 = vsub.f32 %v3937_v8, %v940_v17  ;;  %v1090_v23 = vpop.xlane.xlu2 %1089 }
 0x448   : > { %1229 = vmatmul.f32.vlgmr.msra.gmra.mxu2 %v1181_v60  ;;  %1369 = vmatmul.f32.gmra.mxu3 %v1206_v53 }
 0x449   : > { %v1035_v41 = vmul.f32 1.442695, %v996_v4 }
 0x44a   : > { %1147 = vadd.xlane.f32.xlu1 %v4019_v58 }
 0x44b   : > { %3070 = vpow2.f32 %v1035_v41 }
 0x44e   : > { %v1088_v22 = vpop.xlane.xlu0 %1087 }
 0x44f   : > { %3072 = vrcp.f32 %v1088_v22 }
 0x450   : > { %3074 = vrcp.f32 %v1090_v23 }
 0x451   : > { %v4024_v63 = vpop.eup %3070 }
 0x452   : > { %1099 = vadd.xlane.f32.xlu2 %v4024_v63 }
 0x455   : > { %v3073_v44 = vpop.eup %3072 }
 0x456   : > { %v1182_v8 = vmul.f32 %v3073_v44, %v3940_v55  ;;  %v3075_v45 = vpop.eup %3074  ;;  %v1571_v44 = vld [vmem:[%s4621_s4 + $0x18] sm:$0xff] }
 0x457   : > { %v1183_v35 = vmul.f32 %v3075_v45, %v3914_v1  ;;  %1632 = vmatpush.msrb.mxu0 %v1571_v44  ;;  %2909 = vmatpush.msra.mxu3 %v1571_v44 }
 0x458   : > { %1232 = vmatmul.f32.gmra.mxu2 %v1182_v8 }
 0x45a   : > { %v1092_v25 = vpop.xlane.xlu2 %1091 }
 0x45b   : > { %3076 = vrcp.f32 %v1092_v25 }
 0x45d   : > { %v942_v10 = vpop.xlane.xlu0 %941 }
 0x45e   : > { %v997_v18 = vsub.f32 %v3956_v51, %v942_v10 }
 0x460   : > { %v1037_v3 = vmul.f32 1.442695, %v997_v18  ;;  %1235 = vmatmul.f32.gmra.mxu2 %v1183_v35  ;;  %v4032_v57 = vpop.f32.mrf.mxu3 }
 0x461   : > { %v3077_v26 = vpop.eup %3076 }
 0x462   : > { %3078 = vpow2.f32 %v1037_v3  ;;  %v1138_v34 = vpop.xlane.xlu1 %1137  ;;  %v1184_v38 = vmul.f32 %v3077_v26, %v3949_v14 }
 0x463   : > { %3080 = vrcp.f32 %v1138_v34 }
 0x465   : > { %v944_v55 = vpop.xlane.xlu0 %943 }
 0x466   : > { %v998_v32 = vsub.f32 %v3967_v19, %v944_v55 }
 0x468   : > { %v4036_v37 = vpop.eup %3078  ;;  %v1039_v0 = vmul.f32 1.442695, %v998_v32  ;;  %1238 = vmatmul.f32.gmra.mxu2 %v1184_v38  ;;  %v4038_v24 = vpop.f32.mrf.mxu3 }
 0x469   : > { %v3081_v51 = vpop.eup %3080  ;;  %1101 = vadd.xlane.f32.xlu0 %v4036_v37 }
 0x46a   : > { %3082 = vpow2.f32 %v1039_v0  ;;  %v1140_v1 = vpop.xlane.xlu1 %1139  ;;  %v1207_v52 = vmul.f32 %v3081_v51, %v3961_v9  ;;  %v1570_v51 = vld [vmem:[%s4621_s4 + $0x10] sm:$0xff] }
 0x46b   : > { %3084 = vrcp.f32 %v1140_v1  ;;  %1633 = vmatpush.msrb.mxu0 %v1570_v51  ;;  %2910 = vmatpush.msra.mxu3 %v1570_v51 }
 0x46c   : > { %1372 = vmatmul.f32.gmra.mxu3 %v1207_v52 }
 0x46d   : > { %v946_v61 = vpop.xlane.xlu0 %945 }
 0x46e   : > { %v999_v19 = vsub.f32 %v3977_v20, %v946_v61 }
 0x470   : > { %v4043_v40 = vpop.eup %3082  ;;  %v1041_v14 = vmul.f32 1.442695, %v999_v19  ;;  %v1343_v16 = vpop.f32.mrf.mxu3 }
 0x471   : > { %v3085_v21 = vpop.eup %3084  ;;  %1103 = vadd.xlane.f32.xlu2 %v4043_v40 }
 0x472   : > { %3086 = vpow2.f32 %v1041_v14  ;;  %v1208_v43 = vmul.f32 %v3085_v21, %v3972_v56 }
 0x474   : > { %1375 = vmatmul.f32.gmra.mxu3 %v1208_v43  ;;  %v1568_v43 = vld [vmem:[%s4621_s4] sm:$0xff] }
 0x478   : > { %v4047_v17 = vpop.eup %3086  ;;  %v1346_v60 = vpop.f32.mrf.mxu3 }
 0x479   : > { %1105 = vadd.xlane.f32.xlu1 %v4047_v17 }
 0x47d   : > { %1407 = vrot.lane.b32.xlu0 %v1343_v16, %s3313_s24  ;;  %v1569_v16 = vld [vmem:[%s4621_s4 + $0x8] sm:$0xff] }
 0x47e   : > { %1634 = vmatpush.msrb.mxu0 %v1569_v16  ;;  %2911 = vmatpush.msra.mxu3 %v1569_v16 }
 0x480   : > { %v1349_v9 = vpop.f32.mrf.mxu3  ;;  %1635 = vmatpush.msrb.mxu0 %v1568_v43  ;;  %2912 = vmatpush.msra.mxu3 %v1568_v43  ;;  %v1685_v43 = vld [vmem:[%s4622_s5] sm:$0xff] }
 0x481   : > { %1750 = vmatpush.msrb.mxu1 %v1685_v43 }
 0x482   : > { %2913 = vmatpush.msrb.mxu3 %v1685_v43 }
 0x488   : > { %v1352_v20 = vpop.f32.mrf.mxu3 }
 0x489   : > { %1409 = vrot.lane.b32.xlu2 %v1346_v60, %s3313_s24  ;;  %1413 = vrot.lane.b32.xlu0 %v1352_v20, %s3313_s24 }
 0x490   : > { %v1355_v53 = vpop.f32.mrf.mxu3 }
 0x491   : > { %1415 = vrot.lane.b32.xlu2 %v1355_v53, %s3313_s24 }
 0x492   : > { %1411 = vrot.lane.b32.xlu1 %v1349_v9, %s3313_s24 }
 0x495   : > { %v1094_v56 = vpop.xlane.xlu2 %1093 }
 0x496   : > { %3088 = vrcp.f32 %v1094_v56 }
 0x498   : > { %v1358_v4 = vpop.f32.mrf.mxu3 }
 0x499   : > { %1417 = vrot.lane.b32.xlu0 %v1358_v4, %s3313_s24 }
 0x49c   : > { %v3089_v41 = vpop.eup %3088 }
 0x49d   : > { %v1142_v22 = vpop.xlane.xlu1 %1141  ;;  %v1185_v23 = vmul.f32 %v3089_v41, %v3988_v30 }
 0x49e   : > { %3090 = vrcp.f32 %v1142_v22 }
 0x49f   : > { %1241 = vmatmul.f32.gmra.mxu2 %v1185_v23 }
 0x4a3   : > { %v1144_v8 = vpop.xlane.xlu2 %1143 }
 0x4a4   : > { %v3091_v25 = vpop.eup %3090  ;;  %3092 = vrcp.f32 %v1144_v8 }
 0x4a5   : > { %v1209_v45 = vmul.f32 %v3091_v25, %v3992_v59 }
 0x4a7   : > { %1378 = vmatmul.f32.gmra.mxu3 %v1209_v45 }
 0x4aa   : > { %v3093_v10 = vpop.eup %3092 }
 0x4ab   : > { %v1210_v35 = vmul.f32 %v3093_v10, %v3996_v12 }
 0x4ad   : > { %v1096_v18 = vpop.xlane.xlu0 %1095 }
 0x4ae   : > { %3094 = vrcp.f32 %v1096_v18 }
 0x4af   : > { %1381 = vmatmul.f32.gmra.mxu3 %v1210_v35 }
 0x4b3   : > { %v1361_v30 = vpop.f32.mrf.mxu3 }
 0x4b4   : > { %v3095_v3 = vpop.eup %3094  ;;  %1419 = vrot.lane.b32.xlu1 %v1361_v30, %s3313_s24 }
 0x4b5   : > { %v1146_v34 = vpop.xlane.xlu0 %1145  ;;  %v1098_v26 = vpop.xlane.xlu1 %1097  ;;  %v1186_v55 = vmul.f32 %v3095_v3, %v4003_v6 }
 0x4b6   : > { %3096 = vrcp.f32 %v1146_v34 }
 0x4b7   : > { %3098 = vrcp.f32 %v1098_v26  ;;  %1244 = vmatmul.f32.gmra.mxu2 %v1186_v55 }
 0x4bb   : > { %v1364_v32 = vpop.f32.mrf.mxu3 }
 0x4bc   : > { %v3097_v59 = vpop.eup %3096  ;;  %1421 = vrot.lane.b32.xlu2 %v1364_v32, %s3313_s24 }
 0x4bd   : > { %v3099_v38 = vpop.eup %3098  ;;  %v1148_v0 = vpop.xlane.xlu1 %1147  ;;  %v1211_v12 = vmul.f32 %v3097_v59, %v4008_v31 }
 0x4be   : > { %3100 = vrcp.f32 %v1148_v0  ;;  %v1187_v1 = vmul.f32 %v3099_v38, %v4010_v11 }
 0x4bf   : > { %1384 = vmatmul.f32.gmra.mxu3 %v1211_v12 }
 0x4c0   : > { %1247 = vmatmul.f32.gmra.mxu2 %v1187_v1 }
 0x4c3   : > { %v1367_v6 = vpop.f32.mrf.mxu3 }
 0x4c4   : > { %v3101_v52 = vpop.eup %3100  ;;  %1423 = vrot.lane.b32.xlu0 %v1367_v6, %s3313_s24 }
 0x4c5   : > { %v1100_v61 = vpop.xlane.xlu2 %1099  ;;  %v1212_v19 = vmul.f32 %v3101_v52, %v4019_v58 }
 0x4c6   : > { %3102 = vrcp.f32 %v1100_v61 }
 0x4c7   : > { %1387 = vmatmul.f32.gmra.mxu3 %v1212_v19 }
 0x4cb   : > { %v1370_v31 = vpop.f32.mrf.mxu3  ;;  %v1230_v20 = vpop.f32.mrf.mxu2 }
 0x4cc   : > { %v3103_v14 = vpop.eup %3102  ;;  %1425 = vrot.lane.b32.xlu1 %v1370_v31, %s3313_s24 }
 0x4cd   : > { %v1188_v21 = vmul.f32 %v3103_v14, %v4024_v63 }
 0x4cf   : > { %1250 = vmatmul.f32.gmra.mxu2 %v1188_v21 }
 0x4db   : > { %v1233_v41 = vpop.f32.mrf.mxu2 }
 0x4dc   : > { %v1102_v11 = vpop.xlane.xlu0 %1101 }
 0x4dd   : > { %3104 = vrcp.f32 %v1102_v11 }
 0x4e3   : > { %v3105_v58 = vpop.eup %3104  ;;  %v1236_v30 = vpop.f32.mrf.mxu2 }
 0x4e4   : > { %v1104_v60 = vpop.xlane.xlu2 %1103  ;;  %v1189_v9 = vmul.f32 %v3105_v58, %v4036_v37 }
 0x4e5   : > { %3106 = vrcp.f32 %v1104_v60 }
 0x4e6   : > { %1253 = vmatmul.f32.gmra.mxu2 %v1189_v9 }
 0x4eb   : > { %v3107_v63 = vpop.eup %3106  ;;  %v1239_v59 = vpop.f32.mrf.mxu2 }
 0x4ec   : > { %v1410_v53 = vpop.permute.xlu2 %1409  ;;  %v1106_v56 = vpop.xlane.xlu1 %1105  ;;  %v1190_v4 = vmul.f32 %v3107_v63, %v4043_v40 }
 0x4ed   : > { %3108 = vrcp.f32 %v1106_v56  ;;  %v1457_v22 = vsel %vm1455_vm15, %v1233_v41, %v1410_v53 }
 0x4ee   : > { %1256 = vmatmul.f32.gmra.mxu2 %v1190_v4  ;;  %v1489_v8 = vmin.f32 %v1457_v22, 0.0  ;;  %vm1473_vm10 = vcmp.gt.f32.partialorder %v1457_v22, 0.0 }
 0x4ef   : > { %v1408_v23 = vpop.permute.xlu0 %1407  ;;  %v1373_v44 = vpop.f32.mrf.mxu3 }
 0x4f0   : > { %v1456_v37 = vsel %vm1455_vm15, %v1230_v20, %v1408_v23  ;;  %1427 = vrot.lane.b32.xlu2 %v1373_v44, %s3313_s24  ;;  %v1506_v35 = vmul.f32 1.442695, %v1489_v8 }
 0x4f1   : > { %v1488_v25 = vmin.f32 %v1456_v37, 0.0  ;;  %vm1472_vm12 = vcmp.gt.f32.partialorder %v1456_v37, 0.0 }
 0x4f3   : > { %v3109_v45 = vpop.eup %3108  ;;  %v1504_v10 = vmul.f32 1.442695, %v1488_v25 }
 0x4f4   : > { %v1191_v18 = vmul.f32 %v3109_v45, %v4047_v17  ;;  %v1416_v58 = vpop.permute.xlu2 %1415 }
 0x4f5   : > { %3110 = vpow2.f32 %v1504_v10 }
 0x4f6   : > { %1259 = vmatmul.f32.gmra.mxu2 %v1191_v18  ;;  %3112 = vpow2.f32 %v1506_v35 }
 0x4f7   : > { %v1376_v40 = vpop.f32.mrf.mxu3 }
 0x4f8   : > { %1429 = vrot.lane.b32.xlu0 %v1376_v40, %s3313_s24 }
 0x4fb   : > { %v3111_v3 = vpop.eup %3110  ;;  %v1414_v32 = vpop.permute.xlu0 %1413 }
 0x4fc   : > { %v2824_v34 = vadd.f32 -1.0, %v3111_v3  ;;  %v3113_v55 = vpop.eup %3112  ;;  %v1459_v17 = vsel %vm1455_vm15, %v1239_v59, %v1414_v32 }
 0x4fd   : > { %v2825_v38 = vadd.f32 -1.0, %v3113_v55  ;;  %v1491_v51 = vmin.f32 %v1459_v17, 0.0  ;;  %vm1475_vm13 = vcmp.gt.f32.partialorder %v1459_v17, 0.0 }
 0x4fe   : > { %v1552_v26 = vsel %vm1472_vm12, %v1456_v37, %v2824_v34 }
 0x4ff   : > { %2840 = vmatmul.msk.f32.vlgmr.msrb.gmra.mxu0 %vm324_vm0, %v1552_v26  ;;  %v1553_v6 = vsel %vm1473_vm10, %v1457_v22, %v2825_v38  ;;  %v1510_v61 = vmul.f32 1.442695, %v1491_v51 }
 0x504   : > { %v1412_v0 = vpop.permute.xlu1 %1411 }
 0x505   : > { %v1458_v12 = vsel %vm1455_vm15, %v1236_v30, %v1412_v0 }
 0x506   : > { %v1490_v1 = vmin.f32 %v1458_v12, 0.0  ;;  %vm1474_vm12 = vcmp.gt.f32.partialorder %v1458_v12, 0.0 }
 0x507   : > { %2841 = vmatmul.msk.f32.gmra.mxu0 %vm324_vm0, %v1553_v6 }
 0x508   : > { %v1508_v52 = vmul.f32 1.442695, %v1490_v1 }
 0x50a   : > { %3114 = vpow2.f32 %v1508_v52 }
 0x50b   : > { %3116 = vpow2.f32 %v1510_v61  ;;  %v1418_v22 = vpop.permute.xlu0 %1417 }
 0x510   : > { %v3115_v19 = vpop.eup %3114 }
 0x511   : > { %v2826_v31 = vadd.f32 -1.0, %v3115_v19  ;;  %v3117_v21 = vpop.eup %3116 }
 0x512   : > { %v2827_v11 = vadd.f32 -1.0, %v3117_v21 }
 0x513   : > { %v1554_v14 = vsel %vm1474_vm12, %v1458_v12, %v2826_v31 }
 0x514   : > { %2842 = vmatmul.msk.f32.gmra.mxu0 %vm324_vm0, %v1554_v14  ;;  %v1555_v16 = vsel %vm1475_vm13, %v1459_v17, %v2827_v11 }
 0x516   : > { %v1422_v38 = vpop.permute.xlu2 %1421 }
 0x51c   : > { %2843 = vmatmul.msk.f32.gmra.mxu0 %vm324_vm0, %v1555_v16 }
 0x522   : > { %v1242_v60 = vpop.f32.mrf.mxu2 }
 0x523   : > { %v1460_v9 = vsel %vm1455_vm15, %v1242_v60, %v1416_v58 }
 0x524   : > { %v1492_v20 = vmin.f32 %v1460_v9, 0.0  ;;  %vm1476_vm13 = vcmp.gt.f32.partialorder %v1460_v9, 0.0 }
 0x526   : > { %v1512_v63 = vmul.f32 1.442695, %v1492_v20  ;;  %v1420_v10 = vpop.permute.xlu1 %1419 }
 0x528   : > { %3118 = vpow2.f32 %v1512_v63 }
 0x52a   : > { %v1379_v53 = vpop.f32.mrf.mxu3 }
 0x52b   : > { %1431 = vrot.lane.b32.xlu2 %v1379_v53, %s3313_s24 }
 0x52e   : > { %v3119_v56 = vpop.eup %3118 }
 0x52f   : > { %v2828_v4 = vadd.f32 -1.0, %v3119_v56 }
 0x531   : > { %v1556_v41 = vsel %vm1476_vm13, %v1460_v9, %v2828_v4 }
 0x532   : > { %2844 = vmatmul.msk.f32.gmra.mxu0 %vm324_vm0, %v1556_v41  ;;  %v1382_v23 = vpop.f32.mrf.mxu3 }
 0x536   : > { %v1424_v19 = vpop.permute.xlu0 %1423 }
 0x53a   : > { %v1245_v44 = vpop.f32.mrf.mxu2 }
 0x53b   : > { %v1461_v37 = vsel %vm1455_vm15, %v1245_v44, %v1418_v22 }
 0x53c   : > { %v1493_v8 = vmin.f32 %v1461_v37, 0.0  ;;  %vm1477_vm10 = vcmp.gt.f32.partialorder %v1461_v37, 0.0 }
 0x53e   : > { %v1514_v25 = vmul.f32 1.442695, %v1493_v8  ;;  %v1426_v16 = vpop.permute.xlu1 %1425 }
 0x540   : > { %3120 = vpow2.f32 %v1514_v25 }
 0x542   : > { %v1385_v45 = vpop.f32.mrf.mxu3 }
 0x543   : > { %v1248_v18 = vpop.f32.mrf.mxu2  ;;  %1435 = vrot.lane.b32.xlu1 %v1385_v45, %s3313_s24 }
 0x544   : > { %v1462_v35 = vsel %vm1455_vm15, %v1248_v18, %v1420_v10 }
 0x545   : > { %v1494_v40 = vmin.f32 %v1462_v35, 0.0  ;;  %vm1478_vm12 = vcmp.gt.f32.partialorder %v1462_v35, 0.0 }
 0x546   : > { %v3121_v30 = vpop.eup %3120 }
 0x547   : > { %v1516_v3 = vmul.f32 1.442695, %v1494_v40  ;;  %v2829_v34 = vadd.f32 -1.0, %v3121_v30 }
 0x549   : > { %3122 = vpow2.f32 %v1516_v3  ;;  %v1557_v26 = vsel %vm1477_vm10, %v1461_v37, %v2829_v34 }
 0x54a   : > { %v1388_v55 = vpop.f32.mrf.mxu3  ;;  %2845 = vmatmul.msk.f32.gmra.mxu0 %vm324_vm0, %v1557_v26  ;;  %v1428_v41 = vpop.permute.xlu2 %1427 }
 0x54b   : > { %1433 = vrot.lane.b32.xlu1 %v1382_v23, %s3313_s24  ;;  %1437 = vrot.lane.b32.xlu0 %v1388_v55, %s3313_s24 }
 0x54f   : > { %v3123_v32 = vpop.eup %3122 }
 0x550   : > { %v2830_v59 = vadd.f32 -1.0, %v3123_v32 }
 0x552   : > { %v1251_v17 = vpop.f32.mrf.mxu2  ;;  %v1558_v0 = vsel %vm1478_vm12, %v1462_v35, %v2830_v59  ;;  %vm1686_vm12 = vcmask 64512  }
 0x553   : > { %v1463_v12 = vsel %vm1455_vm15, %v1251_v17, %v1422_v38  ;;  %2846 = vmatmul.msk.f32.gmra.mxu0 %vm324_vm0, %v1558_v0 }
 0x554   : > { %v1495_v51 = vmin.f32 %v1463_v12, 0.0  ;;  %vm1479_vm13 = vcmp.gt.f32.partialorder %v1463_v12, 0.0 }
 0x556   : > { %v1518_v1 = vmul.f32 1.442695, %v1495_v51 }
 0x558   : > { %3124 = vpow2.f32 %v1518_v1 }
 0x55e   : > { %v3125_v6 = vpop.eup %3124 }
 0x55f   : > { %v2831_v52 = vadd.f32 -1.0, %v3125_v6 }
 0x561   : > { %v1559_v61 = vsel %vm1479_vm13, %v1463_v12, %v2831_v52 }
 0x562   : > { %2847 = vmatmul.msk.f32.gmra.mxu0 %vm324_vm0, %v1559_v61 }
 0x569   : > { %v1254_v31 = vpop.f32.mrf.mxu2 }
 0x56a   : > { %v1464_v14 = vsel %vm1455_vm15, %v1254_v31, %v1424_v19  ;;  %v1430_v20 = vpop.permute.xlu0 %1429 }
 0x56b   : > { %v1496_v21 = vmin.f32 %v1464_v14, 0.0  ;;  %vm1480_vm10 = vcmp.gt.f32.partialorder %v1464_v14, 0.0  ;;  %v1467_v56 = vsel %vm1455_vm15, %v4017_v28, %v1430_v20 }
 0x56c   : > { %v1499_v44 = vmin.f32 %v1467_v56, 0.0 }
 0x56d   : > { %v1520_v11 = vmul.f32 1.442695, %v1496_v21 }
 0x56e   : > { %v1526_v18 = vmul.f32 1.442695, %v1499_v44 }
 0x56f   : > { %3126 = vpow2.f32 %v1520_v11 }
 0x571   : > { %v1257_v43 = vpop.f32.mrf.mxu2 }
 0x572   : > { %v1465_v58 = vsel %vm1455_vm15, %v1257_v43, %v1426_v16 }
 0x573   : > { %v1497_v60 = vmin.f32 %v1465_v58, 0.0  ;;  %vm1481_vm13 = vcmp.gt.f32.partialorder %v1465_v58, 0.0 }
 0x575   : > { %v3127_v9 = vpop.eup %3126  ;;  %v1522_v63 = vmul.f32 1.442695, %v1497_v60 }
 0x576   : > { %v2832_v53 = vadd.f32 -1.0, %v3127_v9 }
 0x577   : > { %3128 = vpow2.f32 %v1522_v63 }
 0x578   : > { %v1560_v4 = vsel %vm1480_vm10, %v1464_v14, %v2832_v53 }
 0x579   : > { %v1260_v22 = vpop.f32.mrf.mxu2  ;;  %2848 = vmatmul.msk.f32.gmra.mxu0 %vm324_vm0, %v1560_v4 }
 0x57a   : > { %v1466_v23 = vsel %vm1455_vm15, %v1260_v22, %v1428_v41 }
 0x57b   : > { %v1498_v37 = vmin.f32 %v1466_v23, 0.0  ;;  %vm1482_vm10 = vcmp.gt.f32.partialorder %v1466_v23, 0.0 }
 0x57c   : > { %v4114_v8 = vpop.f32.mrf.mxu0 }
 0x57d   : > { %v3129_v25 = vpop.eup %3128  ;;  %v1524_v45 = vmul.f32 1.442695, %v1498_v37  ;;  %2856 = vmatmul.msk.f32.vlgmr.msrb.gmra.mxu1 %vm1686_vm12, %v4114_v8 }
 0x57e   : > { %v2833_v10 = vadd.f32 -1.0, %v3129_v25 }
 0x57f   : > { %3130 = vpow2.f32 %v1524_v45 }
 0x580   : > { %v1561_v28 = vsel %vm1481_vm13, %v1465_v58, %v2833_v10  ;;  %3132 = vpow2.f32 %v1526_v18  ;;  %vm1483_vm13 = vcmp.gt.f32.partialorder %v1467_v56, 0.0 }
 0x581   : > { %2849 = vmatmul.msk.f32.gmra.mxu0 %vm324_vm0, %v1561_v28 }
 0x584   : > { %v4119_v35 = vpop.f32.mrf.mxu0 }
 0x585   : > { %v3131_v40 = vpop.eup %3130  ;;  %2857 = vmatmul.msk.f32.gmra.mxu1 %vm1686_vm12, %v4119_v35  ;;  %v1432_v30 = vpop.permute.xlu2 %1431 }
 0x586   : > { %v2834_v3 = vadd.f32 -1.0, %v3131_v40  ;;  %v1468_v34 = vsel %vm1455_vm15, %v4022_v33, %v1432_v30  ;;  %v3133_v32 = vpop.eup %3132 }
 0x587   : > { %v1500_v26 = vmin.f32 %v1468_v34, 0.0  ;;  %v2835_v38 = vadd.f32 -1.0, %v3133_v32  ;;  %vm1484_vm6 = vcmp.gt.f32.partialorder %v1468_v34, 0.0 }
 0x588   : > { %v1562_v55 = vsel %vm1482_vm10, %v1466_v23, %v2834_v3 }
 0x589   : > { %v1528_v59 = vmul.f32 1.442695, %v1500_v26  ;;  %2850 = vmatmul.msk.f32.gmra.mxu0 %vm324_vm0, %v1562_v55  ;;  %v1563_v17 = vsel %vm1483_vm13, %v1467_v56, %v2835_v38 }
 0x58b   : > { %3134 = vpow2.f32 %v1528_v59 }
 0x591   : > { %v3135_v0 = vpop.eup %3134  ;;  %v4126_v12 = vpop.f32.mrf.mxu0  ;;  %2851 = vmatmul.msk.f32.gmra.mxu0 %vm324_vm0, %v1563_v17 }
 0x592   : > { %2858 = vmatmul.msk.f32.gmra.mxu1 %vm1686_vm12, %v4126_v12  ;;  %v2836_v33 = vadd.f32 -1.0, %v3135_v0 }
 0x594   : > { %v1564_v51 = vsel %vm1484_vm6, %v1468_v34, %v2836_v33 }
 0x599   : > { %v4131_v1 = vpop.f32.mrf.mxu0  ;;  %2852 = vmatmul.msk.f32.gmra.mxu0 %vm324_vm0, %v1564_v51 }
 0x59a   : > { %2859 = vmatmul.msk.f32.gmra.mxu1 %vm1686_vm12, %v4131_v1 }
 0x5af   : > { %v4136_v6 = vpop.f32.mrf.mxu0 }
 0x5b0   : > { %2860 = vmatmul.msk.f32.gmra.mxu1 %vm1686_vm12, %v4136_v6 }
 0x5b5   : > { %v1436_v52 = vpop.permute.xlu1 %1435 }
 0x5b6   : > { %v1470_v61 = vsel %vm1455_vm15, %v4032_v57, %v1436_v52 }
 0x5b7   : > { %v1502_v19 = vmin.f32 %v1470_v61, 0.0  ;;  %vm1486_vm6 = vcmp.gt.f32.partialorder %v1470_v61, 0.0 }
 0x5b9   : > { %v1532_v31 = vmul.f32 1.442695, %v1502_v19 }
 0x5bb   : > { %3136 = vpow2.f32 %v1532_v31 }
 0x5bd   : > { %v1438_v14 = vpop.permute.xlu0 %1437  ;;  %v1434_v21 = vpop.permute.xlu1 %1433 }
 0x5be   : > { %v1471_v11 = vsel %vm1455_vm15, %v4038_v24, %v1438_v14  ;;  %v1469_v16 = vsel %vm1455_vm15, %v4028_v48, %v1434_v21 }
 0x5bf   : > { %v1503_v43 = vmin.f32 %v1471_v11, 0.0  ;;  %v1501_v58 = vmin.f32 %v1469_v16, 0.0  ;;  %vm1487_vm15 = vcmp.gt.f32.partialorder %v1471_v11, 0.0  ;;  %vm1485_vm10 = vcmp.gt.f32.partialorder %v1469_v16, 0.0 }
 0x5c1   : > { %v3137_v60 = vpop.eup %3136  ;;  %v1534_v9 = vmul.f32 1.442695, %v1503_v43  ;;  %v1530_v20 = vmul.f32 1.442695, %v1501_v58 }
 0x5c2   : > { %v2838_v63 = vadd.f32 -1.0, %v3137_v60 }
 0x5c3   : > { %3138 = vpow2.f32 %v1534_v9 }
 0x5c4   : > { %v1566_v57 = vsel %vm1486_vm6, %v1470_v61, %v2838_v63  ;;  %3140 = vpow2.f32 %v1530_v20  ;;  %vm4630_vm6 = vcmp.gt.f32.partialorder %v3577_v42, 0.0 }
 0x5c5   : > { %2854 = vmatmul.msk.f32.vlgmr.msra.gmra.mxu3 %vm324_vm0, %v1566_v57 }
 0x5c7   : > { %v4147_v53 = vpop.f32.mrf.mxu0 }
 0x5c8   : > { %2861 = vmatmul.msk.f32.gmra.mxu1 %vm1686_vm12, %v4147_v53 }
 0x5c9   : > { %v3139_v24 = vpop.eup %3138 }
 0x5ca   : > { %v3141_v56 = vpop.eup %3140  ;;  %v2839_v48 = vadd.f32 -1.0, %v3139_v24 }
 0x5cb   : > { %v2837_v4 = vadd.f32 -1.0, %v3141_v56 }
 0x5cc   : > { %v1567_v41 = vsel %vm1487_vm15, %v1471_v11, %v2839_v48 }
 0x5cd   : > { %v1565_v22 = vsel %vm1485_vm10, %v1469_v16, %v2837_v4  ;;  %2855 = vmatmul.msk.f32.gmra.mxu3 %vm324_vm0, %v1567_v41 }
 0x5ce   : > { %2853 = vmatmul.msk.f32.gmra.mxu0 %vm324_vm0, %v1565_v22 }
 0x5d0   : > { %v1655_v23 = vpop.f32.mrf.mxu0 }
 0x5d1   : > { %2862 = vmatmul.msk.f32.gmra.mxu1 %vm1686_vm12, %v1655_v23 }
 0x5df   : > { %v1658_v44 = vpop.f32.mrf.mxu0 }
 0x5e0   : > { %2863 = vmatmul.msk.f32.gmra.mxu1 %vm1686_vm12, %v1658_v44 }
 0x5f6   : > { %v1661_v37 = vpop.f32.mrf.mxu0 }
 0x5f7   : > { %2864 = vmatmul.msk.f32.gmra.mxu1 %vm1686_vm12, %v1661_v37 }
 0x5fa   : > { %v1752_v25 = vpop.f32.mrf.mxu1 }
 0x5fb   : > { %1834 = vperm.xlu2 %2981, %v1752_v25  }
 0x5fe   : > { %v1664_v45 = vpop.f32.mrf.mxu0 }
 0x5ff   : > { %2865 = vmatmul.msk.f32.gmra.mxu1 %vm1686_vm12, %v1664_v45 }
 0x602   : > { %v1755_v10 = vpop.f32.mrf.mxu1 }
 0x603   : > { %1839 = vperm.xlu0 %2979, %v1755_v10  }
 0x606   : > { %v1667_v18 = vpop.f32.mrf.mxu0 }
 0x607   : > { %2866 = vmatmul.msk.f32.gmra.mxu1 %vm1686_vm12, %v1667_v18 }
 0x60e   : > { %v1670_v28 = vpop.f32.mrf.mxu0 }
 0x60f   : > { %v1758_v40 = vpop.f32.mrf.mxu1  ;;  %2867 = vmatmul.msk.f32.gmra.mxu1 %vm1686_vm12, %v1670_v28 }
 0x610   : > { %1844 = vperm.xlu1 %2980, %v1758_v40  }
 0x616   : > { %v1673_v30 = vpop.f32.mrf.mxu0 }
 0x617   : > { %v1761_v3 = vpop.f32.mrf.mxu1  ;;  %2868 = vmatmul.msk.f32.gmra.mxu1 %vm1686_vm12, %v1673_v30 }
 0x618   : > { %1849 = vperm.xlu1 %2980, %v1761_v3  }
 0x621   : > { %1800 = vxpose.xlu2.b32.start [1/16] (narrow) %v1752_v25, 8 }
 0x629   : > { %1801 = vxpose.xlu2.b32.cont [2/16] (narrow) %v1755_v10, 8 }
 0x62d   : > { %v1764_v34 = vpop.f32.mrf.mxu1 }
 0x62e   : > { %1854 = vperm.xlu0 %2979, %v1764_v34  }
 0x631   : > { %1802 = vxpose.xlu2.b32.cont [3/16] (narrow) %v1758_v40, 8 }
 0x639   : > { %1803 = vxpose.xlu2.b32.cont [4/16] (narrow) %v1761_v3, 8 }
 0x641   : > { %1804 = vxpose.xlu2.b32.cont [5/16] (narrow) %v1764_v34, 8 }
 0x645   : > { %v1767_v26 = vpop.f32.mrf.mxu1 }
 0x646   : > { %1859 = vperm.xlu1 %2980, %v1767_v26  }
 0x648   : > { %v1679_v55 = vpop.f32.mrf.mxu3 }
 0x649   : > { %1805 = vxpose.xlu2.b32.cont [6/16] (narrow) %v1767_v26, 8  ;;  %2870 = vmatmul.msk.f32.vlgmr.msrb.gmra.mxu3 %vm1686_vm12, %v1679_v55 }
 0x64b   : > { %v1676_v32 = vpop.f32.mrf.mxu0 }
 0x64c   : > { %2869 = vmatmul.msk.f32.gmra.mxu1 %vm1686_vm12, %v1676_v32 }
 0x64e   : > { %v1770_v59 = vpop.f32.mrf.mxu1 }
 0x64f   : > { %1864 = vperm.xlu1 %2980, %v1770_v59  }
 0x650   : > { %v1682_v38 = vpop.f32.mrf.mxu3 }
 0x651   : > { %1806 = vxpose.xlu2.b32.cont [7/16] (narrow) %v1770_v59, 8  ;;  %2871 = vmatmul.msk.f32.gmra.mxu3 %vm1686_vm12, %v1682_v38 }
 0x652   : > { %2345 = vmatpush.msrb.mxu2 %v1682_v38 }
 0x654   : > { %2346 = vmatpush.msrb.mxu2 %v1679_v55 }
 0x656   : > { %2347 = vmatpush.msrb.mxu2 %v1676_v32 }
 0x658   : > { %2348 = vmatpush.msrb.mxu2 %v1673_v30 }
 0x65a   : > { %2349 = vmatpush.msrb.mxu2 %v1670_v28 }
 0x65c   : > { %2350 = vmatpush.msrb.mxu2 %v1667_v18 }
 0x65d   : > { %v1773_v17 = vpop.f32.mrf.mxu1 }
 0x65e   : > { %2351 = vmatpush.msrb.mxu2 %v1664_v45  ;;  %1807 = vxpose.xlu2.b32.cont [8/16] (narrow) %v1773_v17, 8 }
 0x65f   : > { %1869 = vperm.xlu0 %2979, %v1773_v17  }
 0x660   : > { %2352 = vmatpush.msrb.mxu2 %v1661_v37 }
 0x662   : > { %2353 = vmatpush.msrb.mxu2 %v1658_v44 }
 0x664   : > { %2354 = vmatpush.msrb.mxu2 %v1655_v23 }
 0x666   : > { %2355 = vmatpush.msrb.mxu2 %v4147_v53 }
 0x668   : > { %2356 = vmatpush.msrb.mxu2 %v4136_v6 }
 0x66a   : > { %2357 = vmatpush.msrb.mxu2 %v4131_v1 }
 0x66c   : > { %2358 = vmatpush.msrb.mxu2 %v4126_v12 }
 0x66e   : > { %2359 = vmatpush.msrb.mxu2 %v4119_v35 }
 0x670   : > { %2360 = vmatpush.msrb.mxu2 %v4114_v8  ;;  %v1835_v8 = vpop.permute.xlu2 %1834 }
 0x674   : > { %v1776_v0 = vpop.f32.mrf.mxu1 }
 0x675   : > { %1808 = vxpose.xlu2.b32.cont [9/16] (narrow) %v1776_v0, 8  ;;  %1874 = vperm.xlu1 %2980, %v1776_v0   ;;  %v1840_v14 = vpop.permute.xlu0 %1839 }
 0x67c   : > { %v1779_v33 = vpop.f32.mrf.mxu1 }
 0x67d   : > { %1809 = vxpose.xlu2.b32.cont [10/16] (narrow) %v1779_v33, 8  ;;  %1879 = vperm.xlu1 %2980, %v1779_v33  }
 0x682   : > { %v1845_v61 = vpop.permute.xlu1 %1844 }
 0x684   : > { %v1782_v51 = vpop.f32.mrf.mxu1 }
 0x685   : > { %1810 = vxpose.xlu2.b32.cont [11/16] (narrow) %v1782_v51, 8  ;;  %1884 = vperm.xlu0 %2979, %v1782_v51  }
 0x68a   : > { %v1850_v16 = vpop.permute.xlu1 %1849 }
 0x68c   : > { %v1785_v52 = vpop.f32.mrf.mxu1 }
 0x68d   : > { %1811 = vxpose.xlu2.b32.cont [12/16] (narrow) %v1785_v52, 8  ;;  %1889 = vperm.xlu1 %2980, %v1785_v52  }
 0x694   : > { %v1788_v6 = vpop.f32.mrf.mxu1 }
 0x695   : > { %1812 = vxpose.xlu2.b32.cont [13/16] (narrow) %v1788_v6, 8 }
 0x6a0   : > { %v1855_v48 = vpop.permute.xlu0 %1854 }
 0x6b8   : > { %v1860_v4 = vpop.permute.xlu1 %1859 }
 0x6c1   : > { %v1865_v39 = vpop.permute.xlu1 %1864 }
 0x6c9   : > { %v1791_v1 = vpop.f32.mrf.mxu1 }
 0x6ca   : > { %1813 = vxpose.xlu2.b32.cont [14/16] (narrow) %v1791_v1, 8 }
 0x6cc   : > { %v1794_v12 = vpop.f32.mrf.mxu3 }
 0x6d1   : > { %v1870_v32 = vpop.permute.xlu0 %1869 }
 0x6d2   : > { %1814 = vxpose.xlu2.b32.cont [15/16] (narrow) %v1794_v12, 8 }
 0x6d4   : > { %v4169_v35 = vpop.f32.mrf.mxu3 }
 0x6da   : > { %1815 = vxpose.xlu2.b32.end [16/16] (narrow) %v4169_v35, 8 }
 0x6e7   : > { %v1875_v28 = vpop.permute.xlu1 %1874 }
 0x6ef   : > { %v1880_v3 = vpop.permute.xlu1 %1879 }
 0x6fb   : > { %v1816_v19 = vpop.trf.xlu2 }
 0x6fc   : > { %v4172_v31 = vperm.slane %v1816_v19, 1 }
 0x6fe   : > { %v1914_v21 = vadd.f32 %v4172_v31, %v1840_v14  ;;  %v1913_v11 = vadd.f32 %v4172_v31, %v1835_v8  ;;  %v1915_v58 = vadd.f32 %v4172_v31, %v1845_v61  ;;  %v1916_v9 = vadd.f32 %v4172_v31, %v1850_v16 }
 0x6ff   : > { %v1917_v22 = vadd.f32 %v4172_v31, %v1855_v48  ;;  %v1918_v2 = vadd.f32 %v4172_v31, %v1860_v4  ;;  %v1919_v40 = vadd.f32 %v4172_v31, %v1865_v39  ;;  %v1922_v26 = vadd.f32 %v4172_v31, %v1880_v3 }
 0x700   : > { %vm1930_vm0 = vcmp.gt.f32.partialorder %v1914_v21, 0.0  ;;  %v1946_v43 = vmul.f32 0.2, %v1914_v21  ;;  %vm1929_vm13 = vcmp.gt.f32.partialorder %v1913_v11, 0.0  ;;  %v1945_v60 = vmul.f32 0.2, %v1913_v11 }
 0x701   : > { %v1947_v24 = vmul.f32 0.2, %v1915_v58  ;;  %vm1931_vm15 = vcmp.gt.f32.partialorder %v1915_v58, 0.0  ;;  %v1948_v56 = vmul.f32 0.2, %v1916_v9  ;;  %vm1932_vm10 = vcmp.gt.f32.partialorder %v1916_v9, 0.0 }
 0x702   : > { %v1962_v20 = vsel %vm1930_vm0, %v1914_v21, %v1946_v43  ;;  %v1961_v57 = vsel %vm1929_vm13, %v1913_v11, %v1945_v60  ;;  %v1949_v37 = vmul.f32 0.2, %v1917_v22  ;;  %vm1933_vm0 = vcmp.gt.f32.partialorder %v1917_v22, 0.0 }
 0x703   : > { %v4180_v63 = vsel %vm305_vm8, %v1962_v20, -9e+15  ;;  %v1977_v53 = vsel %vm4630_vm6, %v1961_v57, -9e+15  ;;  %v1963_v41 = vsel %vm1931_vm15, %v1915_v58, %v1947_v24  ;;  %v1964_v23 = vsel %vm1932_vm10, %v1916_v9, %v1948_v56 }
 0x704   : > { %1995 = vmax.xlane.f32.xlu1 %v4180_v63  ;;  %1993 = vmax.xlane.f32.xlu0 %v1977_v53  ;;  %vm4631_vm8 = vcmp.gt.f32.partialorder %v3622_v15, 0.0  ;;  %v4194_v42 = vsel %vm307_vm1, %v1964_v23, -9e+15  ;;  %v1950_v25 = vmul.f32 0.2, %v1918_v2  ;;  %vm1934_vm13 = vcmp.gt.f32.partialorder %v1918_v2, 0.0 }
 0x705   : > { %v4189_v44 = vsel %vm4631_vm8, %v1963_v41, -9e+15  ;;  %v1965_v45 = vsel %vm1933_vm0, %v1917_v22, %v1949_v37  ;;  %v1951_v30 = vmul.f32 0.2, %v1919_v40  ;;  %vm1935_vm1 = vcmp.gt.f32.partialorder %v1919_v40, 0.0 }
 0x706   : > { %v1966_v10 = vsel %vm1934_vm13, %v1918_v2, %v1950_v25  ;;  %v1981_v18 = vsel %vm308_vm2, %v1965_v45, -9e+15  ;;  %v1954_v7 = vmul.f32 0.2, %v1922_v26  ;;  %vm1938_vm2 = vcmp.gt.f32.partialorder %v1922_v26, 0.0 }
 0x707   : > { %v1982_v15 = vsel %vm309_vm3, %v1966_v10, -9e+15  ;;  %v1967_v34 = vsel %vm1935_vm1, %v1919_v40, %v1951_v30  ;;  %v1920_v38 = vadd.f32 %v4172_v31, %v1870_v32  ;;  %v1921_v62 = vadd.f32 %v4172_v31, %v1875_v28 }
 0x708   : > { %v4205_v29 = vsel %vm310_vm7, %v1967_v34, -9e+15  ;;  %v1970_v55 = vsel %vm1938_vm2, %v1922_v26, %v1954_v7  ;;  %vm4633_vm10 = vcmp.gt.f32.partialorder %v3663_v46, 0.0  ;;  %vm4635_vm0 = vcmp.gt.f32.partialorder %v3758_v50, 0.0 }
 0x709   : > { %v4210_v59 = vsel %vm313_vm5, %v1970_v55, -9e+15  ;;  %v1952_v17 = vmul.f32 0.2, %v1920_v38  ;;  %vm1936_vm3 = vcmp.gt.f32.partialorder %v1920_v38, 0.0  ;;  %vm1937_vm7 = vcmp.gt.f32.partialorder %v1921_v62, 0.0 }
 0x70a   : > { %v1953_v51 = vmul.f32 0.2, %v1921_v62 }
 0x70b   : > { %v1968_v0 = vsel %vm1936_vm3, %v1920_v38, %v1952_v17 }
 0x70c   : > { %1997 = vmax.xlane.f32.xlu1 %v4189_v44  ;;  %1999 = vmax.xlane.f32.xlu0 %v4194_v42  ;;  %v4217_v33 = vsel %vm311_vm9, %v1968_v0, -9e+15  ;;  %v1969_v36 = vsel %vm1937_vm7, %v1921_v62, %v1953_v51  ;;  %vm4632_vm9 = vcmp.gt.f32.partialorder %v3639_v27, 0.0 }
 0x70d   : > { %v4222_v52 = vsel %vm312_vm11, %v1969_v36, -9e+15 }
 0x714   : > { %2001 = vmax.xlane.f32.xlu1 %v1981_v18  ;;  %2003 = vmax.xlane.f32.xlu0 %v1982_v15 }
 0x728   : > { %1899 = vperm.xlu0 %2979, %v1791_v1   ;;  %v1885_v1 = vpop.permute.xlu0 %1884 }
 0x729   : > { %v1923_v2 = vadd.f32 %v4172_v31, %v1885_v1 }
 0x72b   : > { %v1955_v25 = vmul.f32 0.2, %v1923_v2  ;;  %vm1939_vm5 = vcmp.gt.f32.partialorder %v1923_v2, 0.0 }
 0x72d   : > { %1894 = vperm.xlu1 %2980, %v1788_v6   ;;  %v1890_v6 = vpop.permute.xlu1 %1889 }
 0x72e   : > { %v1924_v4 = vadd.f32 %v4172_v31, %v1890_v6 }
 0x730   : > { %v1956_v23 = vmul.f32 0.2, %v1924_v4  ;;  %vm1940_vm11 = vcmp.gt.f32.partialorder %v1924_v4, 0.0 }
 0x732   : > { %v1972_v37 = vsel %vm1940_vm11, %v1924_v4, %v1956_v23 }
 0x733   : > { %v4252_v45 = vsel %vm4632_vm9, %v1972_v37, -9e+15 }
 0x735   : > { %1904 = vperm.xlu1 %2980, %v1794_v12  }
 0x74b   : > { %2005 = vmax.xlane.f32.xlu2 %v4205_v29 }
 0x752   : > { %2011 = vmax.xlane.f32.xlu0 %v4210_v59 }
 0x75f   : > { %2007 = vmax.xlane.f32.xlu1 %v4217_v33 }
 0x767   : > { %2009 = vmax.xlane.f32.xlu1 %v4222_v52 }
 0x777   : > { %v1996_v12 = vpop.xlane.xlu1 %1995  ;;  %v1994_v8 = vpop.xlane.xlu0 %1993 }
 0x778   : > { %v2025_v61 = vsub.f32 %v1977_v53, %v1994_v8  ;;  %v2026_v47 = vsub.f32 %v4180_v63, %v1996_v12 }
 0x77a   : > { %v2041_v19 = vmul.f32 1.442695, %v2025_v61  ;;  %v2043_v11 = vmul.f32 1.442695, %v2026_v47 }
 0x77c   : > { %3142 = vpow2.f32 %v2041_v19 }
 0x77d   : > { %3144 = vpow2.f32 %v2043_v11 }
 0x77f   : > { %v1998_v14 = vpop.xlane.xlu1 %1997  ;;  %v2000_v21 = vpop.xlane.xlu0 %1999 }
 0x780   : > { %1909 = vperm.xlu1 %2980, %v4169_v35   ;;  %v2027_v13 = vsub.f32 %v4189_v44, %v1998_v14  ;;  %v2028_v35 = vsub.f32 %v4194_v42, %v2000_v21 }
 0x782   : > { %v4227_v16 = vpop.eup %3142  ;;  %v2045_v60 = vmul.f32 1.442695, %v2027_v13  ;;  %v2047_v24 = vmul.f32 1.442695, %v2028_v35 }
 0x783   : > { %2073 = vadd.xlane.f32.xlu0 %v4227_v16  ;;  %v4231_v57 = vpop.eup %3144 }
 0x787   : > { %v2002_v43 = vpop.xlane.xlu1 %2001  ;;  %v2004_v9 = vpop.xlane.xlu0 %2003 }
 0x788   : > { %v2029_v58 = vsub.f32 %v1981_v18, %v2002_v43  ;;  %v2030_v63 = vsub.f32 %v1982_v15, %v2004_v9  ;;  %v1971_v15 = vsel %vm1939_vm5, %v1923_v2, %v1955_v25 }
 0x789   : > { %v4258_v40 = vsel %vm314_vm4, %v1971_v15, -9e+15 }
 0x78a   : > { %v2049_v20 = vmul.f32 1.442695, %v2029_v58  ;;  %v2051_v53 = vmul.f32 1.442695, %v2030_v63 }
 0x78b   : > { %2075 = vadd.xlane.f32.xlu0 %v4231_v57 }
 0x78c   : > { %3146 = vpow2.f32 %v2049_v20 }
 0x78d   : > { %3148 = vpow2.f32 %v2045_v60 }
 0x78e   : > { %3150 = vpow2.f32 %v2051_v53 }
 0x78f   : > { %3152 = vpow2.f32 %v2047_v24 }
 0x792   : > { %v4235_v56 = vpop.eup %3146 }
 0x793   : > { %v4237_v48 = vpop.eup %3148  ;;  %2081 = vadd.xlane.f32.xlu2 %v4235_v56 }
 0x794   : > { %2077 = vadd.xlane.f32.xlu0 %v4237_v48  ;;  %v4242_v41 = vpop.eup %3150 }
 0x795   : > { %v4244_v22 = vpop.eup %3152 }
 0x79a   : > { %v1900_v18 = vpop.permute.xlu0 %1899 }
 0x79b   : > { %2083 = vadd.xlane.f32.xlu2 %v4242_v41  ;;  %v1926_v39 = vadd.f32 %v4172_v31, %v1900_v18 }
 0x79c   : > { %2079 = vadd.xlane.f32.xlu0 %v4244_v22 }
 0x79d   : > { %v1958_v30 = vmul.f32 0.2, %v1926_v39  ;;  %vm1942_vm15 = vcmp.gt.f32.partialorder %v1926_v39, 0.0 }
 0x79f   : > { %v1895_v44 = vpop.permute.xlu1 %1894  ;;  %v1974_v26 = vsel %vm1942_vm15, %v1926_v39, %v1958_v30 }
 0x7a0   : > { %v1925_v42 = vadd.f32 %v4172_v31, %v1895_v44  ;;  %v4269_v7 = vsel %vm4633_vm10, %v1974_v26, -9e+15 }
 0x7a2   : > { %v1957_v10 = vmul.f32 0.2, %v1925_v42  ;;  %vm1941_vm6 = vcmp.gt.f32.partialorder %v1925_v42, 0.0 }
 0x7a4   : > { %2015 = vmax.xlane.f32.xlu0 %v4252_v45  ;;  %v1973_v28 = vsel %vm1941_vm6, %v1925_v42, %v1957_v10 }
 0x7a5   : > { %v4263_v27 = vsel %vm316_vm14, %v1973_v28, -9e+15  ;;  %vm4634_vm14 = vcmp.gt.f32.partialorder %v3741_v49, 0.0 }
 0x7a7   : > { %v1905_v3 = vpop.permute.xlu1 %1904 }
 0x7a8   : > { %v1927_v34 = vadd.f32 %v4172_v31, %v1905_v3 }
 0x7aa   : > { %2013 = vmax.xlane.f32.xlu1 %v4258_v40  ;;  %v1959_v54 = vmul.f32 0.2, %v1927_v34  ;;  %vm1943_vm4 = vcmp.gt.f32.partialorder %v1927_v34, 0.0 }
 0x7ac   : > { %2017 = vmax.xlane.f32.xlu0 %v4263_v27  ;;  %v1975_v55 = vsel %vm1943_vm4, %v1927_v34, %v1959_v54 }
 0x7ad   : > { %v4274_v5 = vsel %vm4634_vm14, %v1975_v55, -9e+15 }
 0x7b4   : > { %2019 = vmax.xlane.f32.xlu0 %v4269_v7 }
 0x7bc   : > { %2021 = vmax.xlane.f32.xlu0 %v4274_v5 }
 0x7be   : > { %v2006_v32 = vpop.xlane.xlu2 %2005 }
 0x7bf   : > { %v2031_v38 = vsub.f32 %v4205_v29, %v2006_v32 }
 0x7c1   : > { %v2053_v17 = vmul.f32 1.442695, %v2031_v38 }
 0x7c3   : > { %3154 = vpow2.f32 %v2053_v17 }
 0x7c5   : > { %v2012_v0 = vpop.xlane.xlu0 %2011 }
 0x7c6   : > { %v2034_v46 = vsub.f32 %v4210_v59, %v2012_v0 }
 0x7c8   : > { %v2059_v51 = vmul.f32 1.442695, %v2034_v46 }
 0x7c9   : > { %v4279_v62 = vpop.eup %3154 }
 0x7ca   : > { %2085 = vadd.xlane.f32.xlu2 %v4279_v62  ;;  %3156 = vpow2.f32 %v2059_v51 }
 0x7d0   : > { %v4282_v36 = vpop.eup %3156 }
 0x7d1   : > { %2091 = vadd.xlane.f32.xlu1 %v4282_v36 }
 0x7d2   : > { %v2008_v49 = vpop.xlane.xlu1 %2007 }
 0x7d3   : > { %v2032_v6 = vsub.f32 %v4217_v33, %v2008_v49 }
 0x7d5   : > { %v2055_v1 = vmul.f32 1.442695, %v2032_v6 }
 0x7d7   : > { %3158 = vpow2.f32 %v2055_v1 }
 0x7da   : > { %v2010_v29 = vpop.xlane.xlu1 %2009 }
 0x7db   : > { %v2033_v12 = vsub.f32 %v4222_v52, %v2010_v29 }
 0x7dd   : > { %v4287_v8 = vpop.eup %3158  ;;  %v2057_v59 = vmul.f32 1.442695, %v2033_v12 }
 0x7de   : > { %2087 = vadd.xlane.f32.xlu2 %v4287_v8 }
 0x7df   : > { %3160 = vpow2.f32 %v2057_v59 }
 0x7e5   : > { %v4290_v61 = vpop.eup %3160 }
 0x7e6   : > { %2089 = vadd.xlane.f32.xlu2 %v4290_v61 }
 0x7f2   : > { %v1910_v19 = vpop.permute.xlu1 %1909 }
 0x7f3   : > { %v1928_v47 = vadd.f32 %v4172_v31, %v1910_v19 }
 0x7f5   : > { %v1960_v14 = vmul.f32 0.2, %v1928_v47  ;;  %vm1944_vm8 = vcmp.gt.f32.partialorder %v1928_v47, 0.0 }
 0x7f6   : > { %v2074_v33 = vpop.xlane.xlu0 %2073 }
 0x7f7   : > { %v1976_v21 = vsel %vm1944_vm8, %v1928_v47, %v1960_v14  ;;  %3162 = vrcp.f32 %v2074_v33  ;;  %v2116_v60 = vand.u32 2147483648, %v2074_v33  ;;  %v2114_v31 = vand.u32 2147483647, %v2074_v33 }
 0x7f8   : > { %v4296_v52 = vsel %vm4635_vm0, %v1976_v21, -9e+15  ;;  %vm2110_vm1 = vweird.f32 %v2074_v33 }
 0x7f9   : > { %2023 = vmax.xlane.f32.xlu0 %v4296_v52  ;;  %v2117_v35 = vor.u32 1.1754944e-38, %v2116_v60  ;;  %vm2115_vm3 = vcmp.eq.f32.partialorder %v2114_v31, 8.507059e+37 }
 0x7fd   : > { %v3163_v11 = vpop.eup %3162 }
 0x7fe   : > { %v2106_v13 = vmul.f32 %v3163_v11, %v2074_v33  ;;  %v2076_v43 = vpop.xlane.xlu0 %2075  ;;  %vm2111_vm13 = vweird.f32 %v3163_v11 }
 0x7ff   : > { %3164 = vrcp.f32 %v2076_v43  ;;  %vm2112_vm2 = vmor %vm2110_vm1, %vm2111_vm13  ;;  %v2131_v42 = vand.u32 2147483648, %v2076_v43  ;;  %v2129_v25 = vand.u32 2147483647, %v2076_v43  ;;  %vm2125_vm11 = vweird.f32 %v2076_v43 }
 0x800   : > { %v2107_v58 = vsub.f32 1.0, %v2106_v13 }
 0x801   : > { %v2132_v15 = vor.u32 1.1754944e-38, %v2131_v42  ;;  %vm2130_vm5 = vcmp.eq.f32.partialorder %v2129_v25, 8.507059e+37 }
 0x802   : > { %v2108_v9 = vmul.f32 %v3163_v11, %v2107_v58 }
 0x804   : > { %v2109_v20 = vadd.f32 %v3163_v11, %v2108_v9 }
 0x805   : > { %v3165_v63 = vpop.eup %3164 }
 0x806   : > { %v4299_v53 = vpop.xlane.xlu2 %2081  ;;  %v2121_v50 = vmul.f32 %v3165_v63, %v2076_v43  ;;  %v2113_v4 = vsel %vm2112_vm2, %v3163_v11, %v2109_v20  ;;  %vm2126_vm7 = vweird.f32 %v3165_v63 }
 0x807   : > { %v2078_v24 = vpop.xlane.xlu0 %2077  ;;  %v2118_v23 = vsel %vm2115_vm3, %v2117_v35, %v2113_v4  ;;  %vm2127_vm9 = vmor %vm2125_vm11, %vm2126_vm7  ;;  %v2176_v4 = vand.u32 2147483648, %v4299_v53  ;;  %vm2170_vm2 = vweird.f32 %v4299_v53 }
 0x808   : > { %3166 = vrcp.f32 %v2078_v24  ;;  %v2122_v2 = vsub.f32 1.0, %v2121_v50  ;;  %v2119_v44 = vmul.f32 %v4227_v16, %v2118_v23  ;;  %v2146_v55 = vand.u32 2147483648, %v2078_v24 }
 0x809   : > { %3168 = vrcp.f32 %v4299_v53  ;;  %v2144_v17 = vand.u32 2147483647, %v2078_v24  ;;  %vm2140_vm15 = vweird.f32 %v2078_v24 }
 0x80a   : > { %v2123_v37 = vmul.f32 %v3165_v63, %v2122_v2  ;;  %2361 = vmatmul.f32.vlgmr.msrb.gmra.mxu2 %v2119_v44  ;;  %v2147_v51 = vor.u32 1.1754944e-38, %v2146_v55 }
 0x80b   : > { %vm2145_vm4 = vcmp.eq.f32.partialorder %v2144_v17, 8.507059e+37 }
 0x80c   : > { %v2124_v10 = vadd.f32 %v3165_v63, %v2123_v37 }
 0x80e   : > { %v3167_v18 = vpop.eup %3166  ;;  %v4303_v30 = vpop.xlane.xlu2 %2083  ;;  %v2128_v3 = vsel %vm2127_vm9, %v3165_v63, %v2124_v10 }
 0x80f   : > { %v2136_v39 = vmul.f32 %v3167_v18, %v2078_v24  ;;  %v2080_v28 = vpop.xlane.xlu0 %2079  ;;  %v4305_v34 = vpop.eup %3168  ;;  %v2133_v16 = vsel %vm2130_vm5, %v2132_v15, %v2128_v3  ;;  %vm2141_vm6 = vweird.f32 %v3167_v18  ;;  %v2191_v15 = vand.u32 2147483648, %v4303_v30 }
 0x810   : > { %3170 = vrcp.f32 %v2080_v28  ;;  %v2134_v54 = vmul.f32 %v4231_v57, %v2133_v16  ;;  %v2166_v38 = vmul.f32 %v4305_v34, %v4299_v53  ;;  %vm2142_vm10 = vmor %vm2140_vm15, %vm2141_vm6  ;;  %v2159_v33 = vand.u32 2147483647, %v2080_v28 }
 0x811   : > { %v2137_v26 = vsub.f32 1.0, %v2136_v39  ;;  %3172 = vrcp.f32 %v4303_v30  ;;  %v2161_v21 = vand.u32 2147483648, %v2080_v28  ;;  %vm2155_vm8 = vweird.f32 %v2080_v28 }
 0x812   : > { %2364 = vmatmul.f32.gmra.mxu2 %v2134_v54  ;;  %v2167_v49 = vsub.f32 1.0, %v2166_v38  ;;  %vm2171_vm13 = vweird.f32 %v4305_v34  ;;  %vm2160_vm1 = vcmp.eq.f32.partialorder %v2159_v33, 8.507059e+37  ;;  %vm2185_vm9 = vweird.f32 %v4303_v30 }
 0x813   : > { %v2138_v32 = vmul.f32 %v3167_v18, %v2137_v26  ;;  %v2162_v9 = vor.u32 1.1754944e-38, %v2161_v21  ;;  %vm2172_vm3 = vmor %vm2170_vm2, %vm2171_vm13 }
 0x814   : > { %v2168_v11 = vmul.f32 %v4305_v34, %v2167_v49 }
 0x815   : > { %v2139_v0 = vadd.f32 %v3167_v18, %v2138_v32 }
 0x816   : > { %v3171_v46 = vpop.eup %3170  ;;  %v2169_v63 = vadd.f32 %v4305_v34, %v2168_v11 }
 0x817   : > { %v2151_v6 = vmul.f32 %v3171_v46, %v2080_v28  ;;  %v2016_v1 = vpop.xlane.xlu0 %2015  ;;  %v2143_v29 = vsel %vm2142_vm10, %v3167_v18, %v2139_v0  ;;  %v4311_v57 = vpop.eup %3172  ;;  %vm2156_vm14 = vweird.f32 %v3171_v46  ;;  %v2189_v28 = vand.u32 2147483647, %v4303_v30 }
 0x818   : > { %v2036_v12 = vsub.f32 %v4252_v45, %v2016_v1  ;;  %v2148_v59 = vsel %vm2145_vm4, %v2147_v51, %v2143_v29  ;;  %v2181_v43 = vmul.f32 %v4311_v57, %v4303_v30  ;;  %vm2157_vm0 = vmor %vm2155_vm8, %vm2156_vm14  ;;  %vm2186_vm11 = vweird.f32 %v4311_v57 }
 0x819   : > { %v2152_v19 = vsub.f32 1.0, %v2151_v6  ;;  %v2149_v47 = vmul.f32 %v4237_v48, %v2148_v59  ;;  %vm2187_vm5 = vmor %vm2185_vm9, %vm2186_vm11  ;;  %vm2190_vm6 = vcmp.eq.f32.partialorder %v2189_v28, 8.507059e+37 }
 0x81a   : > { %v2063_v14 = vmul.f32 1.442695, %v2036_v12  ;;  %v2182_v48 = vsub.f32 1.0, %v2181_v43 }
 0x81b   : > { %v2153_v13 = vmul.f32 %v3171_v46, %v2152_v19  ;;  %2367 = vmatmul.f32.gmra.mxu2 %v2149_v47 }
 0x81c   : > { %3174 = vpow2.f32 %v2063_v14  ;;  %v2183_v42 = vmul.f32 %v4311_v57, %v2182_v48 }
 0x81d   : > { %v2014_v58 = vpop.xlane.xlu1 %2013  ;;  %v2154_v60 = vadd.f32 %v3171_v46, %v2153_v13 }
 0x81e   : > { %v2035_v45 = vsub.f32 %v4258_v40, %v2014_v58  ;;  %v2174_v40 = vand.u32 2147483647, %v4299_v53  ;;  %v2184_v53 = vadd.f32 %v4311_v57, %v2183_v42 }
 0x81f   : > { %v2018_v31 = vpop.xlane.xlu0 %2017  ;;  %v2158_v20 = vsel %vm2157_vm0, %v3171_v46, %v2154_v60 }
 0x820   : > { %v2061_v35 = vmul.f32 1.442695, %v2035_v45  ;;  %v2037_v50 = vsub.f32 %v4263_v27, %v2018_v31  ;;  %v2163_v24 = vsel %vm2160_vm1, %v2162_v9, %v2158_v20  ;;  %v2173_v27 = vsel %vm2172_vm3, %v4305_v34, %v2169_v63 }
 0x821   : > { %v2164_v23 = vmul.f32 %v4244_v22, %v2163_v24  ;;  %v2177_v22 = vor.u32 1.1754944e-38, %v2176_v4  ;;  %vm2175_vm7 = vcmp.eq.f32.partialorder %v2174_v40, 8.507059e+37  ;;  %v2188_v16 = vsel %vm2187_vm5, %v4311_v57, %v2184_v53 }
 0x822   : > { %v4326_v2 = vpop.eup %3174  ;;  %3176 = vpow2.f32 %v2061_v35  ;;  %v2065_v44 = vmul.f32 1.442695, %v2037_v50 }
 0x823   : > { %2370 = vmatmul.f32.gmra.mxu2 %v2164_v23  ;;  %2095 = vadd.xlane.f32.xlu0 %v4326_v2  ;;  %v2178_v37 = vsel %vm2175_vm7, %v2177_v22, %v2173_v27 }
 0x824   : > { %3178 = vpow2.f32 %v2065_v44  ;;  %v2179_v39 = vmul.f32 %v4235_v56, %v2178_v37 }
 0x827   : > { %v2020_v25 = vpop.xlane.xlu0 %2019 }
 0x828   : > { %v4335_v10 = vpop.eup %3176  ;;  %v2038_v18 = vsub.f32 %v4269_v7, %v2020_v25  ;;  %v2192_v7 = vor.u32 1.1754944e-38, %v2191_v15 }
 0x829   : > { %2093 = vadd.xlane.f32.xlu2 %v4335_v10 }
 0x82a   : > { %v4343_v3 = vpop.eup %3178  ;;  %v2067_v34 = vmul.f32 1.442695, %v2038_v18  ;;  %v2193_v26 = vsel %vm2190_vm6, %v2192_v7, %v2188_v16 }
 0x82b   : > { %2373 = vmatmul.f32.gmra.mxu2 %v2179_v39  ;;  %2097 = vadd.xlane.f32.xlu1 %v4343_v3  ;;  %v2194_v55 = vmul.f32 %v4242_v41, %v2193_v26 }
 0x82c   : > { %3180 = vpow2.f32 %v2067_v34 }
 0x82f   : > { %v2022_v54 = vpop.xlane.xlu0 %2021 }
 0x830   : > { %v2039_v56 = vsub.f32 %v4274_v5, %v2022_v54 }
 0x832   : > { %v4349_v32 = vpop.eup %3180  ;;  %v2069_v30 = vmul.f32 1.442695, %v2039_v56 }
 0x833   : > { %2376 = vmatmul.f32.gmra.mxu2 %v2194_v55  ;;  %2099 = vadd.xlane.f32.xlu2 %v4349_v32 }
 0x834   : > { %3182 = vpow2.f32 %v2069_v30 }
 0x83a   : > { %v4352_v38 = vpop.eup %3182 }
 0x83b   : > { %2101 = vadd.xlane.f32.xlu0 %v4352_v38 }
 0x83d   : > { %v2086_v17 = vpop.xlane.xlu2 %2085 }
 0x83e   : > { %3184 = vrcp.f32 %v2086_v17  ;;  %v2206_v49 = vand.u32 2147483648, %v2086_v17  ;;  %v2204_v41 = vand.u32 2147483647, %v2086_v17  ;;  %vm2200_vm10 = vweird.f32 %v2086_v17 }
 0x840   : > { %v2207_v1 = vor.u32 1.1754944e-38, %v2206_v49  ;;  %vm2205_vm14 = vcmp.eq.f32.partialorder %v2204_v41, 8.507059e+37 }
 0x844   : > { %v3185_v0 = vpop.eup %3184  ;;  %v2092_v59 = vpop.xlane.xlu1 %2091 }
 0x845   : > { %v2196_v46 = vmul.f32 %v3185_v0, %v2086_v17  ;;  %vm2201_vm15 = vweird.f32 %v3185_v0  ;;  %v2251_v25 = vand.u32 2147483648, %v2092_v59  ;;  %vm2245_vm5 = vweird.f32 %v2092_v59 }
 0x846   : > { %vm2202_vm4 = vmor %vm2200_vm10, %vm2201_vm15 }
 0x847   : > { %v2197_v51 = vsub.f32 1.0, %v2196_v46  ;;  %v2252_v28 = vor.u32 1.1754944e-38, %v2251_v25 }
 0x849   : > { %v2198_v5 = vmul.f32 %v3185_v0, %v2197_v51 }
 0x84b   : > { %v2199_v6 = vadd.f32 %v3185_v0, %v2198_v5 }
 0x84d   : > { %v2203_v29 = vsel %vm2202_vm4, %v3185_v0, %v2199_v6 }
 0x84e   : > { %v2208_v57 = vsel %vm2205_vm14, %v2207_v1, %v2203_v29 }
 0x84f   : > { %v2209_v12 = vmul.f32 %v4279_v62, %v2208_v57 }
 0x851   : > { %2379 = vmatmul.f32.gmra.mxu2 %v2209_v12  ;;  %v2088_v19 = vpop.xlane.xlu2 %2087 }
 0x852   : > { %3186 = vrcp.f32 %v2088_v19  ;;  %v2221_v13 = vand.u32 2147483648, %v2088_v19  ;;  %v2219_v60 = vand.u32 2147483647, %v2088_v19  ;;  %vm2215_vm0 = vweird.f32 %v2088_v19 }
 0x853   : > { %3188 = vrcp.f32 %v2092_v59 }
 0x854   : > { %v2222_v62 = vor.u32 1.1754944e-38, %v2221_v13  ;;  %vm2220_vm1 = vcmp.eq.f32.partialorder %v2219_v60, 8.507059e+37 }
 0x858   : > { %v3187_v47 = vpop.eup %3186 }
 0x859   : > { %v2211_v14 = vmul.f32 %v3187_v47, %v2088_v19  ;;  %v2090_v33 = vpop.xlane.xlu2 %2089  ;;  %v3189_v21 = vpop.eup %3188  ;;  %vm2216_vm8 = vweird.f32 %v3187_v47 }
 0x85a   : > { %3190 = vrcp.f32 %v2090_v33  ;;  %v2241_v43 = vmul.f32 %v3189_v21, %v2092_v59  ;;  %vm2217_vm13 = vmor %vm2215_vm0, %vm2216_vm8  ;;  %v2236_v24 = vand.u32 2147483648, %v2090_v33  ;;  %v2234_v40 = vand.u32 2147483647, %v2090_v33 }
 0x85b   : > { %v2212_v11 = vsub.f32 1.0, %v2211_v14  ;;  %vm2230_vm3 = vweird.f32 %v2090_v33  ;;  %vm2246_vm9 = vweird.f32 %v3189_v21 }
 0x85c   : > { %v2242_v48 = vsub.f32 1.0, %v2241_v43  ;;  %v2237_v42 = vor.u32 1.1754944e-38, %v2236_v24  ;;  %vm2235_vm11 = vcmp.eq.f32.partialorder %v2234_v40, 8.507059e+37  ;;  %vm2247_vm6 = vmor %vm2245_vm5, %vm2246_vm9 }
 0x85d   : > { %v2213_v58 = vmul.f32 %v3187_v47, %v2212_v11 }
 0x85e   : > { %v2243_v4 = vmul.f32 %v3189_v21, %v2242_v48 }
 0x85f   : > { %v2214_v45 = vadd.f32 %v3187_v47, %v2213_v58 }
 0x860   : > { %v3191_v9 = vpop.eup %3190  ;;  %v2244_v22 = vadd.f32 %v3189_v21, %v2243_v4 }
 0x861   : > { %v2226_v31 = vmul.f32 %v3191_v9, %v2090_v33  ;;  %v2218_v20 = vsel %vm2217_vm13, %v3187_v47, %v2214_v45  ;;  %vm2231_vm2 = vweird.f32 %v3191_v9 }
 0x862   : > { %v2223_v63 = vsel %vm2220_vm1, %v2222_v62, %v2218_v20  ;;  %vm2232_vm7 = vmor %vm2230_vm3, %vm2231_vm2  ;;  %v2248_v39 = vsel %vm2247_vm6, %v3189_v21, %v2244_v22 }
 0x863   : > { %v2227_v35 = vsub.f32 1.0, %v2226_v31  ;;  %v2224_v50 = vmul.f32 %v4287_v8, %v2223_v63  ;;  %v2249_v8 = vand.u32 2147483647, %v2092_v59 }
 0x865   : > { %v2228_v23 = vmul.f32 %v3191_v9, %v2227_v35  ;;  %2382 = vmatmul.f32.gmra.mxu2 %v2224_v50  ;;  %vm2250_vm15 = vcmp.eq.f32.partialorder %v2249_v8, 8.507059e+37 }
 0x866   : > { %v2253_v16 = vsel %vm2250_vm15, %v2252_v28, %v2248_v39 }
 0x867   : > { %v2229_v44 = vadd.f32 %v3191_v9, %v2228_v23  ;;  %v2254_v7 = vmul.f32 %v4282_v36, %v2253_v16 }
 0x869   : > { %v2233_v27 = vsel %vm2232_vm7, %v3191_v9, %v2229_v44 }
 0x86a   : > { %v2238_v37 = vsel %vm2235_vm11, %v2237_v42, %v2233_v27 }
 0x86b   : > { %v2239_v53 = vmul.f32 %v4290_v61, %v2238_v37 }
 0x86c   : > { %v2024_v18 = vpop.xlane.xlu0 %2023 }
 0x86d   : > { %v2040_v15 = vsub.f32 %v4296_v52, %v2024_v18  ;;  %2385 = vmatmul.f32.gmra.mxu2 %v2239_v53 }
 0x86f   : > { %v2071_v34 = vmul.f32 1.442695, %v2040_v15 }
 0x871   : > { %3192 = vpow2.f32 %v2071_v34 }
 0x875   : > { %2388 = vmatmul.f32.gmra.mxu2 %v2254_v7 }
 0x877   : > { %v4360_v26 = vpop.eup %3192 }
 0x878   : > { %2103 = vadd.xlane.f32.xlu1 %v4360_v26 }
 0x88d   : > { %v2362_v61 = vpop.f32.mrf.mxu2 }
 0x88e   : > { %v2426_v54 = vmin.f32 %v2362_v61, 0.0  ;;  %vm2410_vm10 = vcmp.gt.f32.partialorder %v2362_v61, 0.0 }
 0x890   : > { %v2442_v56 = vmul.f32 1.442695, %v2426_v54 }
 0x892   : > { %3194 = vpow2.f32 %v2442_v56 }
 0x895   : > { %v2365_v55 = vpop.f32.mrf.mxu2 }
 0x896   : > { %v4363_v52 = vpop.xlane.xlu0 %2095  ;;  %v2427_v30 = vmin.f32 %v2365_v55, 0.0  ;;  %vm2411_vm4 = vcmp.gt.f32.partialorder %v2365_v55, 0.0 }
 0x897   : > { %3196 = vrcp.f32 %v4363_v52  ;;  %v2281_v37 = vand.u32 2147483648, %v4363_v52  ;;  %vm2275_vm3 = vweird.f32 %v4363_v52  ;;  %v2279_v18 = vand.u32 2147483647, %v4363_v52 }
 0x898   : > { %v3195_v17 = vpop.eup %3194  ;;  %v2444_v0 = vmul.f32 1.442695, %v2427_v30 }
 0x899   : > { %v2872_v46 = vadd.f32 -1.0, %v3195_v17  ;;  %v2282_v7 = vor.u32 1.1754944e-38, %v2281_v37  ;;  %vm2280_vm11 = vcmp.eq.f32.partialorder %v2279_v18, 8.507059e+37 }
 0x89a   : > { %3198 = vpow2.f32 %v2444_v0 }
 0x89b   : > { %v4366_v51 = vsel %vm2410_vm10, %v2362_v61, %v2872_v46 }
 0x89c   : > { %v2094_v36 = vpop.xlane.xlu2 %2093  ;;  %v2506_v5 = vsel %vm1686_vm12, %v4366_v51, -inf }
 0x89d   : > { %v4368_v49 = vpop.eup %3196  ;;  %3200 = vrcp.f32 %v2094_v36  ;;  %2507 = vmax.xlane.f32.xlu2 %v2506_v5  ;;  %v2264_v45 = vand.u32 2147483647, %v2094_v36  ;;  %v2266_v9 = vand.u32 2147483648, %v2094_v36  ;;  %vm2260_vm8 = vweird.f32 %v2094_v36 }
 0x89e   : > { %v2368_v41 = vpop.f32.mrf.mxu2  ;;  %v4372_v6 = vpop.xlane.xlu1 %2097  ;;  %v2271_v29 = vmul.f32 %v4368_v49, %v4363_v52  ;;  %vm2276_vm0 = vweird.f32 %v4368_v49 }
 0x89f   : > { %v2428_v1 = vmin.f32 %v2368_v41, 0.0  ;;  %3202 = vrcp.f32 %v4372_v6  ;;  %vm2412_vm13 = vcmp.gt.f32.partialorder %v2368_v41, 0.0  ;;  %vm2265_vm2 = vcmp.eq.f32.partialorder %v2264_v45, 8.507059e+37  ;;  %vm2277_vm7 = vmor %vm2275_vm3, %vm2276_vm0 }
 0x8a0   : > { %v3199_v57 = vpop.eup %3198  ;;  %v2272_v47 = vsub.f32 1.0, %v2271_v29  ;;  %v2267_v24 = vor.u32 1.1754944e-38, %v2266_v9  ;;  %v2296_v0 = vand.u32 2147483648, %v4372_v6  ;;  %vm2290_vm6 = vweird.f32 %v4372_v6 }
 0x8a1   : > { %v2446_v12 = vmul.f32 1.442695, %v2428_v1  ;;  %v2873_v59 = vadd.f32 -1.0, %v3199_v57 }
 0x8a2   : > { %v2273_v62 = vmul.f32 %v4368_v49, %v2272_v47 }
 0x8a3   : > { %v3201_v19 = vpop.eup %3200  ;;  %3204 = vpow2.f32 %v2446_v12  ;;  %v4377_v33 = vsel %vm2411_vm4, %v2365_v55, %v2873_v59  ;;  %v2297_v59 = vor.u32 1.1754944e-38, %v2296_v0 }
 0x8a4   : > { %v2256_v14 = vmul.f32 %v3201_v19, %v2094_v36  ;;  %v2509_v11 = vsel %vm1686_vm12, %v4377_v33, -inf  ;;  %vm2261_vm14 = vweird.f32 %v3201_v19  ;;  %v2274_v44 = vadd.f32 %v4368_v49, %v2273_v62 }
 0x8a5   : > { %v4379_v21 = vpop.eup %3202  ;;  %2510 = vmax.xlane.f32.xlu0 %v2509_v11  ;;  %vm2262_vm1 = vmor %vm2260_vm8, %vm2261_vm14 }
 0x8a6   : > { %v2257_v13 = vsub.f32 1.0, %v2256_v14  ;;  %v2371_v43 = vpop.f32.mrf.mxu2  ;;  %v4383_v58 = vpop.xlane.xlu2 %2099  ;;  %v2286_v31 = vmul.f32 %v4379_v21, %v4372_v6  ;;  %v2278_v34 = vsel %vm2277_vm7, %v4368_v49, %v2274_v44  ;;  %vm2291_vm5 = vweird.f32 %v4379_v21 }
 0x8a7   : > { %v2429_v60 = vmin.f32 %v2371_v43, 0.0  ;;  %3206 = vrcp.f32 %v4383_v58  ;;  %vm2413_vm9 = vcmp.gt.f32.partialorder %v2371_v43, 0.0  ;;  %v2283_v54 = vsel %vm2280_vm11, %v2282_v7, %v2278_v34  ;;  %vm2292_vm15 = vmor %vm2290_vm6, %vm2291_vm5 }
 0x8a8   : > { %v2258_v48 = vmul.f32 %v3201_v19, %v2257_v13  ;;  %v2287_v4 = vsub.f32 1.0, %v2286_v31  ;;  %v2284_v36 = vmul.f32 %v4326_v2, %v2283_v54  ;;  %v2294_v49 = vand.u32 2147483647, %v4372_v6 }
 0x8a9   : > { %v3205_v20 = vpop.eup %3204  ;;  %v2448_v63 = vmul.f32 1.442695, %v2429_v60  ;;  %v2311_v11 = vand.u32 2147483648, %v4383_v58  ;;  %vm2305_vm8 = vweird.f32 %v4383_v58 }
 0x8aa   : > { %v2874_v35 = vadd.f32 -1.0, %v3205_v20  ;;  %v2259_v50 = vadd.f32 %v3201_v19, %v2258_v48  ;;  %v2288_v39 = vmul.f32 %v4379_v21, %v2287_v4  ;;  %vm2295_vm10 = vcmp.eq.f32.partialorder %v2294_v49, 8.507059e+37 }
 0x8ab   : > { %3208 = vpow2.f32 %v2448_v63  ;;  %v2312_v62 = vor.u32 1.1754944e-38, %v2311_v11 }
 0x8ac   : > { %v4390_v23 = vsel %vm2412_vm13, %v2368_v41, %v2874_v35  ;;  %v2263_v40 = vsel %vm2262_vm1, %v3201_v19, %v2259_v50  ;;  %v2289_v52 = vadd.f32 %v4379_v21, %v2288_v39 }
 0x8ad   : > { %v4393_v42 = vpop.eup %3206  ;;  %v2512_v27 = vsel %vm1686_vm12, %v4390_v23, -inf  ;;  %v2268_v22 = vsel %vm2265_vm2, %v2267_v24, %v2263_v40 }
 0x8ae   : > { %v2374_v25 = vpop.f32.mrf.mxu2  ;;  %2513 = vmax.xlane.f32.xlu1 %v2512_v27  ;;  %v4398_v53 = vpop.xlane.xlu0 %2101  ;;  %v2269_v8 = vmul.f32 %v4335_v10, %v2268_v22  ;;  %v2301_v28 = vmul.f32 %v4393_v42, %v4383_v58  ;;  %v2293_v29 = vsel %vm2292_vm15, %v4379_v21, %v2289_v52  ;;  %vm2306_vm14 = vweird.f32 %v4393_v42 }
 0x8af   : > { %v2430_v15 = vmin.f32 %v2374_v25, 0.0  ;;  %3210 = vrcp.f32 %v4398_v53  ;;  %vm2414_vm4 = vcmp.gt.f32.partialorder %v2374_v25, 0.0  ;;  %v2298_v2 = vsel %vm2295_vm10, %v2297_v59, %v2293_v29  ;;  %vm2307_vm0 = vmor %vm2305_vm8, %vm2306_vm14 }
 0x8b0   : > { %2391 = vmatmul.f32.gmra.mxu2 %v2269_v8  ;;  %v2302_v56 = vsub.f32 1.0, %v2301_v28  ;;  %v2299_v13 = vmul.f32 %v4343_v3, %v2298_v2  ;;  %v2326_v35 = vand.u32 2147483648, %v4398_v53  ;;  %vm2320_vm3 = vweird.f32 %v4398_v53 }
 0x8b1   : > { %v3209_v16 = vpop.eup %3208  ;;  %v2450_v10 = vmul.f32 1.442695, %v2430_v15  ;;  %v2324_v50 = vand.u32 2147483647, %v4398_v53 }
 0x8b2   : > { %v2875_v61 = vadd.f32 -1.0, %v3209_v16  ;;  %v2303_v41 = vmul.f32 %v4393_v42, %v2302_v56  ;;  %v2327_v4 = vor.u32 1.1754944e-38, %v2326_v35 }
 0x8b3   : > { %3212 = vpow2.f32 %v2450_v10  ;;  %vm2325_vm11 = vcmp.eq.f32.partialorder %v2324_v50, 8.507059e+37 }
 0x8b4   : > { %v4410_v55 = vsel %vm2413_vm9, %v2371_v43, %v2875_v61  ;;  %v2304_v6 = vadd.f32 %v4393_v42, %v2303_v41  ;;  %v2309_v43 = vand.u32 2147483647, %v4383_v58 }
 0x8b5   : > { %v3211_v30 = vpop.eup %3210  ;;  %v2515_v17 = vsel %vm1686_vm12, %v4410_v55, -inf }
 0x8b6   : > { %v2377_v46 = vpop.f32.mrf.mxu2  ;;  %2516 = vmax.xlane.f32.xlu2 %v2515_v17  ;;  %v2316_v1 = vmul.f32 %v3211_v30, %v4398_v53  ;;  %v2308_v45 = vsel %vm2307_vm0, %v4393_v42, %v2304_v6  ;;  %vm2310_vm13 = vcmp.eq.f32.partialorder %v2309_v43, 8.507059e+37  ;;  %vm2321_vm2 = vweird.f32 %v3211_v30 }
 0x8b7   : > { %v2431_v5 = vmin.f32 %v2377_v46, 0.0  ;;  %vm2415_vm1 = vcmp.gt.f32.partialorder %v2377_v46, 0.0  ;;  %v2313_v31 = vsel %vm2310_vm13, %v2312_v62, %v2308_v45  ;;  %vm2322_vm7 = vmor %vm2320_vm3, %vm2321_vm2 }
 0x8b8   : > { %2394 = vmatmul.f32.gmra.mxu2 %v2284_v36  ;;  %v2317_v47 = vsub.f32 1.0, %v2316_v1  ;;  %v2314_v58 = vmul.f32 %v4349_v32, %v2313_v31 }
 0x8b9   : > { %v3213_v57 = vpop.eup %3212  ;;  %v2452_v12 = vmul.f32 1.442695, %v2431_v5 }
 0x8ba   : > { %v2876_v19 = vadd.f32 -1.0, %v3213_v57  ;;  %v2318_v60 = vmul.f32 %v3211_v30, %v2317_v47 }
 0x8bb   : > { %3214 = vpow2.f32 %v2452_v12 }
 0x8bc   : > { %v4423_v14 = vsel %vm2414_vm4, %v2374_v25, %v2876_v19  ;;  %v2319_v63 = vadd.f32 %v3211_v30, %v2318_v60 }
 0x8bd   : > { %v2518_v21 = vsel %vm1686_vm12, %v4423_v14, -inf }
 0x8be   : > { %2519 = vmax.xlane.f32.xlu0 %v2518_v21  ;;  %v2323_v24 = vsel %vm2322_vm7, %v3211_v30, %v2319_v63 }
 0x8bf   : > { %v2328_v40 = vsel %vm2325_vm11, %v2327_v4, %v2323_v24 }
 0x8c0   : > { %2397 = vmatmul.f32.gmra.mxu2 %v2299_v13  ;;  %v2329_v44 = vmul.f32 %v4352_v38, %v2328_v40 }
 0x8c1   : > { %v3215_v9 = vpop.eup %3214 }
 0x8c2   : > { %v2877_v48 = vadd.f32 -1.0, %v3215_v9 }
 0x8c4   : > { %v4434_v20 = vsel %vm2415_vm1, %v2377_v46, %v2877_v48 }
 0x8c5   : > { %v2521_v3 = vsel %vm1686_vm12, %v4434_v20, -inf }
 0x8c6   : > { %2522 = vmax.xlane.f32.xlu1 %v2521_v3 }
 0x8c8   : > { %2400 = vmatmul.f32.gmra.mxu2 %v2314_v58 }
 0x8d0   : > { %2403 = vmatmul.f32.gmra.mxu2 %v2329_v44 }
 0x8d4   : > { %v2380_v42 = vpop.f32.mrf.mxu2 }
 0x8d5   : > { %v2432_v27 = vmin.f32 %v2380_v42, 0.0  ;;  %vm2416_vm9 = vcmp.gt.f32.partialorder %v2380_v42, 0.0 }
 0x8d7   : > { %v2454_v22 = vmul.f32 1.442695, %v2432_v27 }
 0x8d9   : > { %3216 = vpow2.f32 %v2454_v22 }
 0x8df   : > { %v3217_v37 = vpop.eup %3216 }
 0x8e0   : > { %v2878_v25 = vadd.f32 -1.0, %v3217_v37 }
 0x8e2   : > { %v4443_v8 = vsel %vm2416_vm9, %v2380_v42, %v2878_v25 }
 0x8e3   : > { %v2524_v32 = vsel %vm1686_vm12, %v4443_v8, -inf }
 0x8e4   : > { %2525 = vmax.xlane.f32.xlu2 %v2524_v32 }
 0x8e8   : > { %v2383_v53 = vpop.f32.mrf.mxu2 }
 0x8e9   : > { %v2433_v18 = vmin.f32 %v2383_v53, 0.0  ;;  %vm2417_vm5 = vcmp.gt.f32.partialorder %v2383_v53, 0.0 }
 0x8eb   : > { %v2456_v15 = vmul.f32 1.442695, %v2433_v18  ;;  %v2104_v39 = vpop.xlane.xlu1 %2103 }
 0x8ec   : > { %3218 = vrcp.f32 %v2104_v39  ;;  %v2341_v56 = vand.u32 2147483648, %v2104_v39  ;;  %v2339_v0 = vand.u32 2147483647, %v2104_v39  ;;  %vm2335_vm15 = vweird.f32 %v2104_v39 }
 0x8ed   : > { %3220 = vpow2.f32 %v2456_v15 }
 0x8ee   : > { %v2342_v5 = vor.u32 1.1754944e-38, %v2341_v56  ;;  %vm2340_vm4 = vcmp.eq.f32.partialorder %v2339_v0, 8.507059e+37 }
 0x8f0   : > { %v2386_v38 = vpop.f32.mrf.mxu2 }
 0x8f1   : > { %v2434_v28 = vmin.f32 %v2386_v38, 0.0  ;;  %vm2418_vm14 = vcmp.gt.f32.partialorder %v2386_v38, 0.0 }
 0x8f2   : > { %v3219_v34 = vpop.eup %3218 }
 0x8f3   : > { %v3221_v16 = vpop.eup %3220  ;;  %v2331_v10 = vmul.f32 %v3219_v34, %v2104_v39  ;;  %v2458_v7 = vmul.f32 1.442695, %v2434_v28  ;;  %vm2336_vm6 = vweird.f32 %v3219_v34 }
 0x8f4   : > { %v2879_v61 = vadd.f32 -1.0, %v3221_v16  ;;  %vm2337_vm10 = vmor %vm2335_vm15, %vm2336_vm6 }
 0x8f5   : > { %v2332_v54 = vsub.f32 1.0, %v2331_v10  ;;  %3222 = vpow2.f32 %v2458_v7 }
 0x8f6   : > { %v4447_v52 = vsel %vm2417_vm5, %v2383_v53, %v2879_v61 }
 0x8f7   : > { %v2333_v30 = vmul.f32 %v3219_v34, %v2332_v54  ;;  %v2527_v17 = vsel %vm1686_vm12, %v4447_v52, -inf }
 0x8f8   : > { %2528 = vmax.xlane.f32.xlu0 %v2527_v17  ;;  %v2389_v46 = vpop.f32.mrf.mxu2 }
 0x8f9   : > { %v2435_v36 = vmin.f32 %v2389_v46, 0.0  ;;  %v2334_v49 = vadd.f32 %v3219_v34, %v2333_v30  ;;  %vm2419_vm8 = vcmp.gt.f32.partialorder %v2389_v46, 0.0 }
 0x8fb   : > { %v3223_v41 = vpop.eup %3222  ;;  %v2460_v1 = vmul.f32 1.442695, %v2435_v36  ;;  %v2338_v29 = vsel %vm2337_vm10, %v3219_v34, %v2334_v49 }
 0x8fc   : > { %v2880_v57 = vadd.f32 -1.0, %v3223_v41  ;;  %v2343_v12 = vsel %vm2340_vm4, %v2342_v5, %v2338_v29 }
 0x8fd   : > { %3224 = vpow2.f32 %v2460_v1  ;;  %v2344_v59 = vmul.f32 %v4360_v26, %v2343_v12 }
 0x8fe   : > { %v4452_v19 = vsel %vm2418_vm14, %v2386_v38, %v2880_v57 }
 0x8ff   : > { %2406 = vmatmul.f32.gmra.mxu2 %v2344_v59  ;;  %v2530_v2 = vsel %vm1686_vm12, %v4452_v19, -inf }
 0x900   : > { %2531 = vmax.xlane.f32.xlu1 %v2530_v2 }
 0x903   : > { %v3225_v47 = vpop.eup %3224 }
 0x904   : > { %v2881_v6 = vadd.f32 -1.0, %v3225_v47 }
 0x906   : > { %v4456_v11 = vsel %vm2419_vm8, %v2389_v46, %v2881_v6 }
 0x907   : > { %v2533_v21 = vsel %vm1686_vm12, %v4456_v11, -inf }
 0x908   : > { %2534 = vmax.xlane.f32.xlu2 %v2533_v21 }
 0x910   : > { %v2508_v22 = vpop.xlane.xlu2 %2507 }
 0x911   : > { %v4469_v32 = vsub.f32 %v4366_v51, %v2508_v22 }
 0x913   : > { %v2570_v38 = vmul.f32 1.442695, %v4469_v32 }
 0x918   : > { %v2511_v28 = vpop.xlane.xlu0 %2510 }
 0x919   : > { %v4477_v61 = vsub.f32 %v4377_v33, %v2511_v28 }
 0x91b   : > { %v2572_v30 = vmul.f32 1.442695, %v4477_v61 }
 0x929   : > { %v2517_v16 = vpop.xlane.xlu2 %2516 }
 0x92a   : > { %v4480_v51 = vsub.f32 %v4410_v55, %v2517_v16 }
 0x92c   : > { %v2576_v17 = vmul.f32 1.442695, %v4480_v51 }
 0x931   : > { %v2520_v0 = vpop.xlane.xlu0 %2519 }
 0x932   : > { %v4489_v5 = vsub.f32 %v4423_v14, %v2520_v0 }
 0x933   : > { %v2392_v13 = vpop.f32.mrf.mxu2 }
 0x934   : > { %v2436_v43 = vmin.f32 %v2392_v13, 0.0  ;;  %vm2420_vm0 = vcmp.gt.f32.partialorder %v2392_v13, 0.0  ;;  %v2578_v57 = vmul.f32 1.442695, %v4489_v5 }
 0x936   : > { %v2462_v60 = vmul.f32 1.442695, %v2436_v43 }
 0x938   : > { %3226 = vpow2.f32 %v2462_v60 }
 0x93b   : > { %v2395_v26 = vpop.f32.mrf.mxu2 }
 0x93c   : > { %v2437_v45 = vmin.f32 %v2395_v26, 0.0  ;;  %vm2421_vm13 = vcmp.gt.f32.partialorder %v2395_v26, 0.0 }
 0x93e   : > { %v3227_v9 = vpop.eup %3226  ;;  %v2464_v62 = vmul.f32 1.442695, %v2437_v45 }
 0x93f   : > { %v2882_v48 = vadd.f32 -1.0, %v3227_v9 }
 0x940   : > { %3228 = vpow2.f32 %v2464_v62 }
 0x941   : > { %v4460_v31 = vsel %vm2420_vm0, %v2392_v13, %v2882_v48 }
 0x942   : > { %v2536_v63 = vsel %vm1686_vm12, %v4460_v31, -inf }
 0x943   : > { %2537 = vmax.xlane.f32.xlu0 %v2536_v63  ;;  %v2398_v35 = vpop.f32.mrf.mxu2 }
 0x944   : > { %v2438_v3 = vmin.f32 %v2398_v35, 0.0  ;;  %vm2422_vm1 = vcmp.gt.f32.partialorder %v2398_v35, 0.0 }
 0x946   : > { %v3229_v58 = vpop.eup %3228  ;;  %v2466_v50 = vmul.f32 1.442695, %v2438_v3  ;;  %v2514_v3 = vpop.xlane.xlu1 %2513 }
 0x947   : > { %v2883_v24 = vadd.f32 -1.0, %v3229_v58 }
 0x948   : > { %3230 = vpow2.f32 %v2466_v50 }
 0x949   : > { %v4464_v4 = vsel %vm2421_vm13, %v2395_v26, %v2883_v24 }
 0x94a   : > { %v2539_v40 = vsel %vm1686_vm12, %v4464_v4, -inf }
 0x94b   : > { %2540 = vmax.xlane.f32.xlu1 %v2539_v40  ;;  %v2401_v44 = vpop.f32.mrf.mxu2  ;;  %v4516_v40 = vsub.f32 %v4390_v23, %v2514_v3 }
 0x94c   : > { %v2439_v42 = vmin.f32 %v2401_v44, 0.0  ;;  %vm2423_vm2 = vcmp.gt.f32.partialorder %v2401_v44, 0.0 }
 0x94e   : > { %v3231_v27 = vpop.eup %3230  ;;  %v2468_v37 = vmul.f32 1.442695, %v2439_v42 }
 0x94f   : > { %v2884_v25 = vadd.f32 -1.0, %v3231_v27 }
 0x950   : > { %3232 = vpow2.f32 %v2468_v37 }
 0x951   : > { %v4471_v53 = vsel %vm2422_vm1, %v2398_v35, %v2884_v25 }
 0x952   : > { %v2542_v18 = vsel %vm1686_vm12, %v4471_v53, -inf }
 0x953   : > { %2543 = vmax.xlane.f32.xlu2 %v2542_v18  ;;  %v2404_v15 = vpop.f32.mrf.mxu2 }
 0x954   : > { %v2440_v39 = vmin.f32 %v2404_v15, 0.0  ;;  %vm2424_vm3 = vcmp.gt.f32.partialorder %v2404_v15, 0.0 }
 0x956   : > { %v3233_v34 = vpop.eup %3232  ;;  %v2470_v10 = vmul.f32 1.442695, %v2440_v39 }
 0x957   : > { %v2885_v7 = vadd.f32 -1.0, %v3233_v34  ;;  %v2526_v33 = vpop.xlane.xlu2 %2525 }
 0x958   : > { %3234 = vpow2.f32 %v2470_v10  ;;  %v4492_v55 = vsub.f32 %v4443_v8, %v2526_v33 }
 0x959   : > { %3236 = vpow2.f32 %v2570_v38  ;;  %v4482_v54 = vsel %vm2423_vm2, %v2401_v44, %v2885_v7  ;;  %v2574_v44 = vmul.f32 1.442695, %v4516_v40 }
 0x95a   : > { %v2545_v56 = vsel %vm1686_vm12, %v4482_v54, -inf  ;;  %3238 = vpow2.f32 %v2572_v30  ;;  %v2582_v12 = vmul.f32 1.442695, %v4492_v55 }
 0x95b   : > { %2546 = vmax.xlane.f32.xlu0 %v2545_v56  ;;  %3240 = vpow2.f32 %v2576_v17 }
 0x95c   : > { %3242 = vpow2.f32 %v2578_v57 }
 0x95d   : > { %3244 = vpow2.f32 %v2582_v12 }
 0x95e   : > { %v3235_v46 = vpop.eup %3234 }
 0x95f   : > { %v3237_v36 = vpop.eup %3236  ;;  %v2886_v49 = vadd.f32 -1.0, %v3235_v46 }
 0x960   : > { %v2602_v1 = vsel %vm1686_vm12, %v3237_v36, 0.0  ;;  %v3239_v14 = vpop.eup %3238 }
 0x961   : > { %v4494_v41 = vsel %vm2424_vm3, %v2404_v15, %v2886_v49  ;;  %v3241_v59 = vpop.eup %3240  ;;  %v2605_v2 = vsel %vm1686_vm12, %v3239_v14, 0.0 }
 0x962   : > { %v2548_v29 = vsel %vm1686_vm12, %v4494_v41, -inf  ;;  %v2611_v8 = vsel %vm1686_vm12, %v3241_v59, 0.0  ;;  %v3243_v21 = vpop.eup %3242 }
 0x963   : > { %2603 = vadd.xlane.f32.xlu0 %v2602_v1  ;;  %2549 = vmax.xlane.f32.xlu1 %v2548_v29  ;;  %v3245_v43 = vpop.eup %3244  ;;  %v2614_v26 = vsel %vm1686_vm12, %v3243_v21, 0.0 }
 0x964   : > { %v2620_v60 = vsel %vm1686_vm12, %v3245_v43, 0.0 }
 0x96b   : > { %v2529_v47 = vpop.xlane.xlu0 %2528  ;;  %2612 = vadd.xlane.f32.xlu0 %v2611_v8  ;;  %2606 = vadd.xlane.f32.xlu1 %v2605_v2 }
 0x96c   : > { %v4504_v6 = vsub.f32 %v4447_v52, %v2529_v47 }
 0x96e   : > { %v2584_v13 = vmul.f32 1.442695, %v4504_v6 }
 0x970   : > { %3246 = vpow2.f32 %v2584_v13 }
 0x973   : > { %2621 = vadd.xlane.f32.xlu0 %v2620_v60  ;;  %2615 = vadd.xlane.f32.xlu1 %v2614_v26 }
 0x976   : > { %v3247_v45 = vpop.eup %3246 }
 0x977   : > { %v2623_v9 = vsel %vm1686_vm12, %v3247_v45, 0.0 }
 0x97b   : > { %v2535_v62 = vpop.xlane.xlu2 %2534  ;;  %2624 = vadd.xlane.f32.xlu1 %v2623_v9 }
 0x97c   : > { %v4511_v48 = vsub.f32 %v4456_v11, %v2535_v62  ;;  %v2523_v11 = vpop.xlane.xlu1 %2522 }
 0x97d   : > { %v4520_v22 = vsub.f32 %v4434_v20, %v2523_v11 }
 0x97e   : > { %v2588_v52 = vmul.f32 1.442695, %v4511_v48 }
 0x97f   : > { %v2580_v23 = vmul.f32 1.442695, %v4520_v22 }
 0x980   : > { %3248 = vpow2.f32 %v2588_v52 }
 0x982   : > { %v2407_v63 = vpop.f32.mrf.mxu2 }
 0x983   : > { %v2441_v35 = vmin.f32 %v2407_v63, 0.0  ;;  %vm2425_vm7 = vcmp.gt.f32.partialorder %v2407_v63, 0.0 }
 0x984   : > { %v2532_v18 = vpop.xlane.xlu1 %2531 }
 0x985   : > { %v2472_v58 = vmul.f32 1.442695, %v2441_v35  ;;  %v4528_v39 = vsub.f32 %v4452_v19, %v2532_v18 }
 0x986   : > { %v3249_v50 = vpop.eup %3248 }
 0x987   : > { %3250 = vpow2.f32 %v2472_v58  ;;  %v2629_v24 = vsel %vm1686_vm12, %v3249_v50, 0.0  ;;  %v2586_v20 = vmul.f32 1.442695, %v4528_v39 }
 0x988   : > { %2630 = vadd.xlane.f32.xlu0 %v2629_v24  ;;  %3252 = vpow2.f32 %v2574_v44 }
 0x989   : > { %3254 = vpow2.f32 %v2580_v23 }
 0x98a   : > { %3256 = vpow2.f32 %v2586_v20 }
 0x98d   : > { %v3251_v42 = vpop.eup %3250 }
 0x98e   : > { %v2887_v27 = vadd.f32 -1.0, %v3251_v42  ;;  %v3253_v15 = vpop.eup %3252 }
 0x98f   : > { %v2608_v38 = vsel %vm1686_vm12, %v3253_v15, 0.0  ;;  %v3255_v28 = vpop.eup %3254 }
 0x990   : > { %v4522_v37 = vsel %vm2425_vm7, %v2407_v63, %v2887_v27  ;;  %v2617_v34 = vsel %vm1686_vm12, %v3255_v28, 0.0  ;;  %v3257_v16 = vpop.eup %3256 }
 0x991   : > { %v2551_v25 = vsel %vm1686_vm12, %v4522_v37, -inf  ;;  %v2626_v10 = vsel %vm1686_vm12, %v3257_v16, 0.0 }
 0x992   : > { %2552 = vmax.xlane.f32.xlu2 %v2551_v25 }
 0x99a   : > { %2609 = vadd.xlane.f32.xlu2 %v2608_v38 }
 0x9a2   : > { %2618 = vadd.xlane.f32.xlu2 %v2617_v34 }
 0x9aa   : > { %2627 = vadd.xlane.f32.xlu2 %v2626_v10 }
 0x9b6   : > { %v2538_v7 = vpop.xlane.xlu0 %2537 }
 0x9b7   : > { %v4535_v56 = vsub.f32 %v4460_v31, %v2538_v7 }
 0x9b9   : > { %v2590_v19 = vmul.f32 1.442695, %v4535_v56 }
 0x9bb   : > { %3258 = vpow2.f32 %v2590_v19 }
 0x9be   : > { %v2541_v30 = vpop.xlane.xlu1 %2540 }
 0x9bf   : > { %v4539_v17 = vsub.f32 %v4464_v4, %v2541_v30 }
 0x9c1   : > { %v3259_v0 = vpop.eup %3258  ;;  %v2592_v46 = vmul.f32 1.442695, %v4539_v17 }
 0x9c2   : > { %v2632_v33 = vsel %vm1686_vm12, %v3259_v0, 0.0 }
 0x9c3   : > { %3260 = vpow2.f32 %v2592_v46  ;;  %2633 = vadd.xlane.f32.xlu1 %v2632_v33 }
 0x9c6   : > { %v2544_v36 = vpop.xlane.xlu2 %2543 }
 0x9c7   : > { %v4544_v49 = vsub.f32 %v4471_v53, %v2544_v36 }
 0x9c9   : > { %v3261_v31 = vpop.eup %3260  ;;  %v2594_v1 = vmul.f32 1.442695, %v4544_v49 }
 0x9ca   : > { %v2635_v29 = vsel %vm1686_vm12, %v3261_v31, 0.0 }
 0x9cb   : > { %3262 = vpow2.f32 %v2594_v1  ;;  %2636 = vadd.xlane.f32.xlu2 %v2635_v29 }
 0x9ce   : > { %v2547_v4 = vpop.xlane.xlu0 %2546 }
 0x9cf   : > { %v4549_v57 = vsub.f32 %v4482_v54, %v2547_v4 }
 0x9d1   : > { %v3263_v12 = vpop.eup %3262  ;;  %v2596_v14 = vmul.f32 1.442695, %v4549_v57 }
 0x9d2   : > { %v2638_v59 = vsel %vm1686_vm12, %v3263_v12, 0.0 }
 0x9d3   : > { %3264 = vpow2.f32 %v2596_v14  ;;  %2639 = vadd.xlane.f32.xlu0 %v2638_v59 }
 0x9d6   : > { %v2604_v53 = vpop.xlane.xlu0 %2603  ;;  %v2550_v8 = vpop.xlane.xlu1 %2549 }
 0x9d7   : > { %3266 = vlog2.f32 %v2604_v53  ;;  %v4554_v2 = vsub.f32 %v4494_v41, %v2550_v8 }
 0x9d9   : > { %v3265_v47 = vpop.eup %3264  ;;  %v2598_v21 = vmul.f32 1.442695, %v4554_v2 }
 0x9da   : > { %v2641_v54 = vsel %vm1686_vm12, %v3265_v47, 0.0 }
 0x9db   : > { %3268 = vpow2.f32 %v2598_v21  ;;  %2642 = vadd.xlane.f32.xlu1 %v2641_v54 }
 0x9dd   : > { %v3267_v13 = vpop.eup %3266 }
 0x9de   : > { %v2651_v43 = vmul.f32 0.6931472, %v3267_v13  ;;  %v2613_v60 = vpop.xlane.xlu0 %2612  ;;  %v2607_v26 = vpop.xlane.xlu1 %2606 }
 0x9df   : > { %3270 = vlog2.f32 %v2613_v60 }
 0x9e0   : > { %v2682_v41 = vsub.f32 %v4469_v32, %v2651_v43  ;;  %3272 = vlog2.f32 %v2607_v26 }
 0x9e1   : > { %v3269_v45 = vpop.eup %3268 }
 0x9e2   : > { %2698 = vst.msk [vmem:[%s4562_s14] sm:$0xff] %vm1686_vm12, %v2682_v41  ;;  %v2644_v9 = vsel %vm1686_vm12, %v3269_v45, 0.0 }
 0x9e3   : > { %2645 = vadd.xlane.f32.xlu2 %v2644_v9 }
 0x9e5   : > { %v3271_v62 = vpop.eup %3270 }
 0x9e6   : > { %v3273_v52 = vpop.eup %3272  ;;  %v2657_v63 = vmul.f32 0.6931472, %v3271_v62  ;;  %v2622_v35 = vpop.xlane.xlu0 %2621 }
 0x9e7   : > { %v2616_v3 = vpop.xlane.xlu1 %2615  ;;  %v2653_v58 = vmul.f32 0.6931472, %v3273_v52  ;;  %3274 = vlog2.f32 %v2622_v35 }
 0x9e8   : > { %v2685_v32 = vsub.f32 %v4480_v51, %v2657_v63  ;;  %3276 = vlog2.f32 %v2616_v3 }
 0x9e9   : > { %v2683_v50 = vsub.f32 %v4477_v61, %v2653_v58 }
 0x9ea   : > { %2701 = vst.msk [vmem:[%s4562_s14 + $0x18] sm:$0xff] %vm1686_vm12, %v2685_v32 }
 0x9eb   : > { %2699 = vst.msk [vmem:[%s4562_s14 + $0x8] sm:$0xff] %vm1686_vm12, %v2683_v50 }
 0x9ed   : > { %v3275_v24 = vpop.eup %3274 }
 0x9ee   : > { %v3277_v44 = vpop.eup %3276  ;;  %v2663_v42 = vmul.f32 0.6931472, %v3275_v24 }
 0x9ef   : > { %v2625_v11 = vpop.xlane.xlu1 %2624  ;;  %v2659_v27 = vmul.f32 0.6931472, %v3277_v44 }
 0x9f0   : > { %3278 = vlog2.f32 %v2625_v11  ;;  %v2688_v25 = vsub.f32 %v4492_v55, %v2663_v42 }
 0x9f1   : > { %v2686_v23 = vsub.f32 %v4489_v5, %v2659_v27 }
 0x9f2   : > { %2704 = vst.msk [vmem:[%s4562_s14 + $0x30] sm:$0xff] %vm1686_vm12, %v2688_v25 }
 0x9f3   : > { %2702 = vst.msk [vmem:[%s4562_s14 + $0x20] sm:$0xff] %vm1686_vm12, %v2686_v23 }
 0x9f6   : > { %v3279_v61 = vpop.eup %3278 }
 0x9f7   : > { %v2665_v51 = vmul.f32 0.6931472, %v3279_v61 }
 0x9f9   : > { %v2689_v18 = vsub.f32 %v4504_v6, %v2665_v51 }
 0x9fb   : > { %2705 = vst.msk [vmem:[%s4562_s14 + $0x38] sm:$0xff] %vm1686_vm12, %v2689_v18  ;;  %v2631_v15 = vpop.xlane.xlu0 %2630 }
 0x9fc   : > { %3280 = vlog2.f32 %v2631_v15 }
 0xa02   : > { %v3281_v38 = vpop.eup %3280 }
 0xa03   : > { %v2669_v20 = vmul.f32 0.6931472, %v3281_v38 }
 0xa05   : > { %v2691_v28 = vsub.f32 %v4511_v48, %v2669_v20  ;;  %v2553_v55 = vpop.xlane.xlu2 %2552 }
 0xa06   : > { %v2569_v5 = vsub.f32 %v4522_v37, %v2553_v55 }
 0xa07   : > { %2707 = vst.msk [vmem:[%s4562_s14 + $0x48] sm:$0xff] %vm1686_vm12, %v2691_v28 }
 0xa08   : > { %v2600_v34 = vmul.f32 1.442695, %v2569_v5 }
 0xa0a   : > { %3282 = vpow2.f32 %v2600_v34 }
 0xa0d   : > { %v2610_v16 = vpop.xlane.xlu2 %2609 }
 0xa0e   : > { %3284 = vlog2.f32 %v2610_v16 }
 0xa10   : > { %v3283_v6 = vpop.eup %3282 }
 0xa11   : > { %v2647_v10 = vsel %vm1686_vm12, %v3283_v6, 0.0 }
 0xa12   : > { %2648 = vadd.xlane.f32.xlu0 %v2647_v10 }
 0xa14   : > { %v3285_v7 = vpop.eup %3284 }
 0xa15   : > { %v2655_v19 = vmul.f32 0.6931472, %v3285_v7  ;;  %v2619_v30 = vpop.xlane.xlu2 %2618 }
 0xa16   : > { %3286 = vlog2.f32 %v2619_v30 }
 0xa17   : > { %v2684_v48 = vsub.f32 %v4516_v40, %v2655_v19 }
 0xa19   : > { %2700 = vst.msk [vmem:[%s4562_s14 + $0x10] sm:$0xff] %vm1686_vm12, %v2684_v48 }
 0xa1c   : > { %v3287_v37 = vpop.eup %3286 }
 0xa1d   : > { %v2661_v0 = vmul.f32 0.6931472, %v3287_v37  ;;  %v2628_v46 = vpop.xlane.xlu2 %2627 }
 0xa1e   : > { %3288 = vlog2.f32 %v2628_v46 }
 0xa1f   : > { %v2687_v33 = vsub.f32 %v4520_v22, %v2661_v0 }
 0xa21   : > { %2703 = vst.msk [vmem:[%s4562_s14 + $0x28] sm:$0xff] %vm1686_vm12, %v2687_v33 }
 0xa24   : > { %v3289_v36 = vpop.eup %3288 }
 0xa25   : > { %v2667_v31 = vmul.f32 0.6931472, %v3289_v36 }
 0xa27   : > { %v2690_v1 = vsub.f32 %v4528_v39, %v2667_v31 }
 0xa29   : > { %2706 = vst.msk [vmem:[%s4562_s14 + $0x40] sm:$0xff] %vm1686_vm12, %v2690_v1 }
 0xa36   : > { %v2634_v29 = vpop.xlane.xlu1 %2633 }
 0xa37   : > { %3290 = vlog2.f32 %v2634_v29 }
 0xa3d   : > { %v3291_v40 = vpop.eup %3290 }
 0xa3e   : > { %v2671_v4 = vmul.f32 0.6931472, %v3291_v40  ;;  %v2637_v12 = vpop.xlane.xlu2 %2636 }
 0xa3f   : > { %3292 = vlog2.f32 %v2637_v12 }
 0xa40   : > { %v2692_v14 = vsub.f32 %v4535_v56, %v2671_v4 }
 0xa42   : > { %2708 = vst.msk [vmem:[%s4562_s14 + $0x50] sm:$0xff] %vm1686_vm12, %v2692_v14 }
 0xa45   : > { %v3293_v22 = vpop.eup %3292 }
 0xa46   : > { %v2673_v59 = vmul.f32 0.6931472, %v3293_v22  ;;  %v2640_v53 = vpop.xlane.xlu0 %2639 }
 0xa47   : > { %3294 = vlog2.f32 %v2640_v53 }
 0xa48   : > { %v2693_v39 = vsub.f32 %v4539_v17, %v2673_v59 }
 0xa4a   : > { %2709 = vst.msk [vmem:[%s4562_s14 + $0x58] sm:$0xff] %vm1686_vm12, %v2693_v39 }
 0xa4d   : > { %v3295_v8 = vpop.eup %3294 }
 0xa4e   : > { %v2675_v47 = vmul.f32 0.6931472, %v3295_v8  ;;  %v2643_v21 = vpop.xlane.xlu1 %2642 }
 0xa4f   : > { %3296 = vlog2.f32 %v2643_v21 }
 0xa50   : > { %v2694_v54 = vsub.f32 %v4544_v49, %v2675_v47 }
 0xa52   : > { %2710 = vst.msk [vmem:[%s4562_s14 + $0x60] sm:$0xff] %vm1686_vm12, %v2694_v54 }
 0xa55   : > { %v3297_v56 = vpop.eup %3296 }
 0xa56   : > { %v2677_v13 = vmul.f32 0.6931472, %v3297_v56  ;;  %v2646_v43 = vpop.xlane.xlu2 %2645 }
 0xa57   : > { %3298 = vlog2.f32 %v2646_v43 }
 0xa58   : > { %v2695_v60 = vsub.f32 %v4549_v57, %v2677_v13 }
 0xa5a   : > { %2711 = vst.msk [vmem:[%s4562_s14 + $0x68] sm:$0xff] %vm1686_vm12, %v2695_v60 }
 0xa5d   : > { %v3299_v17 = vpop.eup %3298 }
 0xa5e   : > { %v2679_v26 = vmul.f32 0.6931472, %v3299_v17 }
 0xa60   : > { %v2696_v41 = vsub.f32 %v4554_v2, %v2679_v26 }
 0xa62   : > { %2712 = vst.msk [vmem:[%s4562_s14 + $0x70] sm:$0xff] %vm1686_vm12, %v2696_v41 }
 0xa85   : > { %v2649_v45 = vpop.xlane.xlu0 %2648 }
 0xa86   : > { %3300 = vlog2.f32 %v2649_v45 }
 0xa8c   : > { %v3301_v49 = vpop.eup %3300 }
 0xa8d   : > { %v2681_v9 = vmul.f32 0.6931472, %v3301_v49 }
 0xa8f   : > { %v2697_v62 = vsub.f32 %v2569_v5, %v2681_v9 }
 0xa91   : > { %2713 = vst.msk [vmem:[%s4562_s14 + $0x78] sm:$0xff] %vm1686_vm12, %v2697_v62 }
 0xa92 PF: > { %s16_s21 = sadd.s32 1, %s3308_s21  }
 0xa93   : > { %p13_p4 = scmp.ge.s32.totalorder %s16_s21, 4  }
 0xa95   :  { %15 = sbr.rel (!%p13_p4) target bundleno = 1 (0x1), region = 77 }

</bundles_post_ra>
